<compile_context>
chip_gen: v5e
topology: v5e:2x2
jax: 0.10.0
libtpu: 0.0.40
codegen_flags: <defaults>
</compile_context>

<pallas_src>
import functools

import numpy as np
import jax
import jax.numpy as jnp
from jax import lax
from jax.experimental import pallas as pl
from jax.experimental.pallas import tpu as pltpu


def _bilinear_matrix(n_in: int, n_out: int) -> np.ndarray:
    """Interpolation matrix matching nn.Upsample(scale_factor=2, mode='bilinear',
    align_corners=True): out = M @ in along one spatial axis."""
    m = np.zeros((n_out, n_in), dtype=np.float32)
    if n_out == 1 or n_in == 1:
        m[:, 0] = 1.0
        return m
    scale = (n_in - 1) / (n_out - 1)
    for i in range(n_out):
        src = i * scale
        lo = min(int(np.floor(src)), n_in - 1)
        hi = min(lo + 1, n_in - 1)
        f = src - lo
        m[i, lo] += 1.0 - f
        m[i, hi] += f
    return m


def _device_kind() -> str:
    try:
        return jax.devices()[0].device_kind.lower()
    except Exception:
        return ""


def _upsample_sepconv_kernel(x_ref, k_ref, uw_ref, s_ref, b_ref, sc_ref, of_ref,
                             o_ref, *scratch, kt, ohp, owp, eps, neg_slope,
                             mxu_dtype):
    # Per grid step (g, n, k):
    #   x_ref  : (1, ck, W)        input chunk, channels*rows flattened
    #   k_ref  : (3, Dg*OHp, ck)   folded H-interp + reflect + depthwise + pointwise
    #   uw_ref : (3, W, OWs)       folded W-interp + reflect + dx shift + zero border
    #   s_ref  : (Dg, Dg*OHp)      0/1 band-sum selector (InstanceNorm stats, f32)
    #   b_ref  : (Dg*OHp, Dg)      selector transpose (band -> rows broadcast)
    #   sc/of  : (Dg*OHp, 1)       InstanceNorm scale / offset, repeated per row
    #   o_ref  : (1, Dg*OHp, OWs)
    x = x_ref[0]                                                    # (ck, W)
    contrib = None
    for dx in range(3):
        # dominant matmul: contraction over the C*H chunk at width W
        y = jnp.dot(k_ref[dx], x, preferred_element_type=jnp.float32)     # (rows, W)
        # small matmul: W-direction interpolation into the lane-dense plane
        part = jnp.dot(y.astype(mxu_dtype), uw_ref[dx],
                       preferred_element_type=jnp.float32)                # (rows, OWs)
        contrib = part if contrib is None else contrib + part

    def _norm_and_store(z):
        # InstanceNorm over the zero-padded (OHp, OWp) plane + LeakyReLU(0.2).
        # Columns >= OWp of z are exactly zero (zero columns of Uw) so they do
        # not perturb the sums; the count uses the true plane size OHp*OWp.
        inv_cnt = 1.0 / float(ohp * owp)
        band_sum = jnp.sum(jnp.dot(s_ref[...], z, preferred_element_type=jnp.float32),
                           axis=1, keepdims=True)                   # (Dg, 1)
        band_ssq = jnp.sum(jnp.dot(s_ref[...], z * z, preferred_element_type=jnp.float32),
                           axis=1, keepdims=True)                   # (Dg, 1)
        mean = band_sum * inv_cnt
        var = band_ssq * inv_cnt - mean * mean                      # unbiased=False
        mean_row = jnp.dot(b_ref[...], mean, preferred_element_type=jnp.float32)
        var_row = jnp.dot(b_ref[...], var, preferred_element_type=jnp.float32)
        inv_row = sc_ref[...] * lax.rsqrt(var_row + eps)            # scale / std
        out = (z - mean_row) * inv_row + of_ref[...]
        o_ref[0] = jnp.where(out >= 0, out, neg_slope * out).astype(o_ref.dtype)

    if kt == 1:
        _norm_and_store(contrib)
    else:
        acc_ref = scratch[0]

        @pl.when(pl.program_id(2) == 0)
        def _():
            acc_ref[...] = jnp.zeros_like(acc_ref)

        acc_ref[...] += contrib

        @pl.when(pl.program_id(2) == kt - 1)
        def _():
            _norm_and_store(acc_ref[...])


def upsample_forward(x, dw_w, pw_w, in_scale, in_offset, *,
                     eps=1e-5, neg_slope=0.2, channel_groups=None,
                     k_chunk=None, use_bf16_mxu=True):
    """Forward of the PyTorch `Upsample` block.

    x         : (N, C, H, W)
    dw_w      : (C, 3, 3)  depthwise conv weight  (PyTorch (C,1,3,3) squeezed)
    pw_w      : (D, C)     1x1 pointwise weight   (PyTorch (D,C,1,1) squeezed)
    in_scale  : (D,)       InstanceNorm scale
    in_offset : (D,)       InstanceNorm offset
    returns   : (N, D, 2H+2, 2W+2)

    channel_groups : parallel grid axis over output-channel groups; defaults to
        2 only on 2-TensorCore chips (v4/v7x) when N is odd, else 1.
    k_chunk        : optional C*H contraction tile (multiple of 128) so the
        folded-K block stays bounded in VMEM at production sizes (mostly v7x).
    use_bf16_mxu   : cast MXU operands to bf16 (f32 accumulation); recommended
        on every TPU generation.  False = all-f32 path for tight validation.
    """
    N, C, H, W = x.shape
    D = pw_w.shape[0]
    assert H >= 2 and W >= 2, "spatial dims must be >= 2 for reflect padding"
    OH, OW = 2 * H, 2 * W
    OHp, OWp = OH + 2, OW + 2           # final output spatial (1x1 conv zero pad)
    # lane-dense stores: pad the stored width to one full 128-lane tile when
    # OWp is small (costs no extra compute, removes masked vst); crop later.
    OWs = 128 if OWp < 128 else OWp

    kind = _device_kind()
    is_v7 = ("v7" in kind) or ("7x" in kind)
    megacore = is_v7 or ("v4" in kind)          # chips with 2 TensorCores

    if channel_groups is None:
        channel_groups = 1
        if megacore and (N % 2 == 1) and D % 2 == 0 and ((D // 2) * OHp) % 8 == 0:
            channel_groups = 2
    assert D % channel_groups == 0
    Dg = D // channel_groups
    assert channel_groups == 1 or (Dg * OHp) % 8 == 0, \
        "choose channel_groups so that (D/channel_groups)*(2H+2) is a multiple of 8"

    CH = C * H
    if k_chunk is None or k_chunk >= CH:
        ck, kt = CH, 1
    else:
        assert CH % k_chunk == 0 and k_chunk % 128 == 0, \
            "k_chunk must divide C*H and be a multiple of 128"
        ck, kt = k_chunk, CH // k_chunk

    mxu_dtype = jnp.bfloat16 if use_bf16_mxu else jnp.float32
    hp = lax.Precision.HIGHEST

    # ---- fold all linear stages into matrices (tiny, weight-only work) -----
    # W direction: bilinear upsample + reflect pad; the per-tap dx shift is
    # folded host-side; border columns (1x1 conv zero pad) and the lane-pad
    # columns beyond OWp are zeroed directly in Uw.
    uw4 = np.pad(_bilinear_matrix(W, OW), ((2, 2), (0, 0)), mode="reflect")   # (OW+4, W)
    uw_shift = np.zeros((3, W, OWs), dtype=np.float32)
    for dx in range(3):
        uw_shift[dx, :, :OWp] = uw4[dx:dx + OWp, :].T
    uw_shift[:, :, 0] = 0.0
    uw_shift[:, :, OWp - 1] = 0.0

    # H direction: upsample + reflect + depthwise row taps + 1x1 pointwise,
    # folded into K[dx] (row index = d*OHp + out_row, col index = c*H + in_row).
    uh4 = np.pad(_bilinear_matrix(H, OH), ((2, 2), (0, 0)), mode="reflect")   # (OH+4, H)
    shifted_uh = np.stack([uh4[dy:dy + OHp] for dy in range(3)], axis=0)      # (3, OHp, H)
    dw = dw_w.reshape(C, 3, 3).astype(jnp.float32)
    pw = pw_w.reshape(D, C).astype(jnp.float32)
    g_mat = jnp.einsum('cyx,yoh->xcoh', dw, jnp.asarray(shifted_uh),
                       precision=hp)                                          # (3, C, OHp, H)
    k_mat = jnp.einsum('dc,xcoh->xdoch', pw, g_mat)                           # (3, D, OHp, C, H)
    k_flat = k_mat.reshape(3, D * OHp, CH)
    # zero border rows of the final plane (1x1 conv padding=1) directly in K
    row_in_plane = np.arange(D * OHp) % OHp
    row_keep = ((row_in_plane != 0) & (row_in_plane != OHp - 1)).astype(np.float32)
    k_flat = k_flat * jnp.asarray(row_keep)[None, :, None]

    # band-sum selector matrices for per-channel InstanceNorm statistics (f32)
    s_mat = np.kron(np.eye(Dg, dtype=np.float32),
                    np.ones((1, OHp), np.float32))                            # (Dg, Dg*OHp)
    b_mat = np.ascontiguousarray(s_mat.T)                                     # (Dg*OHp, Dg)

    scale_rows = jnp.repeat(in_scale.astype(jnp.float32).reshape(D, 1), OHp, axis=0)
    offset_rows = jnp.repeat(in_offset.astype(jnp.float32).reshape(D, 1), OHp, axis=0)

    x2d = x.astype(mxu_dtype).reshape(N, CH, W)

    kernel = functools.partial(_upsample_sepconv_kernel, kt=kt, ohp=OHp, owp=OWp,
                               eps=eps, neg_slope=neg_slope, mxu_dtype=mxu_dtype)

    grid_spec = pltpu.PrefetchScalarGridSpec(
        num_scalar_prefetch=0,
        # channel-group axis outermost, batch next, contraction innermost:
        # the big K block index is constant across n, so K stays VMEM-resident.
        grid=(channel_groups, N, kt),
        in_specs=[
            pl.BlockSpec((1, ck, W), lambda g, n, k: (n, k, 0)),
            pl.BlockSpec((3, Dg * OHp, ck), lambda g, n, k: (0, g, k)),
            pl.BlockSpec((3, W, OWs), lambda g, n, k: (0, 0, 0)),
            pl.BlockSpec((Dg, Dg * OHp), lambda g, n, k: (0, 0)),
            pl.BlockSpec((Dg * OHp, Dg), lambda g, n, k: (0, 0)),
            pl.BlockSpec((Dg * OHp, 1), lambda g, n, k: (g, 0)),
            pl.BlockSpec((Dg * OHp, 1), lambda g, n, k: (g, 0)),
        ],
        out_specs=pl.BlockSpec((1, Dg * OHp, OWs), lambda g, n, k: (n, g, 0)),
        scratch_shapes=([pltpu.VMEM((Dg * OHp, OWs), jnp.float32)] if kt > 1 else []),
    )

    out = pl.pallas_call(
        kernel,
        out_shape=jax.ShapeDtypeStruct((N, D * OHp, OWs), jnp.float32),
        grid_spec=grid_spec,
        compiler_params=pltpu.CompilerParams(
            dimension_semantics=("parallel", "parallel", "arbitrary"),
            # v5e/v6e: 128 MiB physical VMEM -> allow large resident blocks;
            # v7x: 64 MiB physical -> stay below the scoped budget.
            vmem_limit_bytes=(40 if is_v7 else 64) * 1024 * 1024,
        ),
    )(x2d,
      k_flat.astype(mxu_dtype),
      jnp.asarray(uw_shift, dtype=mxu_dtype),
      jnp.asarray(s_mat),
      jnp.asarray(b_mat),
      scale_rows,
      offset_rows)

    # crop the lane-padding columns with a cheap XLA slice
    return out.reshape(N, D, OHp, OWs)[:, :, :, :OWp]


def _reference(x, dw_w, pw_w, in_scale, in_offset, eps=1e-5, neg_slope=0.2):
    """Plain-JAX reference of the PyTorch forward (for self-check)."""
    N, C, H, W = x.shape
    D = pw_w.shape[0]
    hp = lax.Precision.HIGHEST
    uh = jnp.asarray(_bilinear_matrix(H, 2 * H))
    uw = jnp.asarray(_bilinear_matrix(W, 2 * W))
    y = jnp.einsum('oh,nchw->ncow', uh, x, precision=hp)
    y = jnp.einsum('pw,ncow->ncop', uw, y, precision=hp)
    yp = jnp.pad(y, ((0, 0), (0, 0), (1, 1), (1, 1)), mode='reflect')
    z = lax.conv_general_dilated(yp, dw_w.reshape(C, 1, 3, 3), (1, 1), 'VALID',
                                 feature_group_count=C,
                                 dimension_numbers=('NCHW', 'OIHW', 'NCHW'),
                                 precision=hp)
    z = lax.conv_general_dilated(z, pw_w.reshape(D, C, 1, 1), (1, 1),
                                 ((1, 1), (1, 1)),
                                 dimension_numbers=('NCHW', 'OIHW', 'NCHW'),
                                 precision=hp)
    mean = z.mean(axis=(2, 3), keepdims=True)
    var = ((z - mean) ** 2).mean(axis=(2, 3), keepdims=True)
    nrm = (in_scale.reshape(1, D, 1, 1) * (z - mean) / jnp.sqrt(var + eps)
           + in_offset.reshape(1, D, 1, 1))
    return jnp.where(nrm >= 0, nrm, neg_slope * nrm)


if __name__ == "__main__":
    key = jax.random.PRNGKey(0)
    k_x, k_dw, k_pw, k_s, k_o = jax.random.split(key, 5)
    N, Cin, H, W = 2, 4, 16, 16
    Cout = 8

    x = jax.random.normal(k_x, (N, Cin, H, W), dtype=jnp.float32)
    # trunc_normal_(std=0.02) truncates at ~100 sigma -> plain normal is fine
    dw_w = 0.02 * jax.random.normal(k_dw, (Cin, 3, 3), dtype=jnp.float32)   # (C,1,3,3) squeezed
    pw_w = 0.02 * jax.random.normal(k_pw, (Cout, Cin), dtype=jnp.float32)   # (D,C,1,1) squeezed
    in_scale = 1.0 + 0.1 * jax.random.normal(k_s, (Cout,), dtype=jnp.float32)
    in_offset = 0.1 * jax.random.normal(k_o, (Cout,), dtype=jnp.float32)

    ref = _reference(x, dw_w, pw_w, in_scale, in_offset)

    # all-f32 path: tight structural check of the folded/reassociated kernel
    out_f32 = jax.block_until_ready(
        upsample_forward(x, dw_w, pw_w, in_scale, in_offset, use_bf16_mxu=False))
    assert out_f32.shape == (N, Cout, 2 * H + 2, 2 * W + 2), out_f32.shape
    np.testing.assert_allclose(np.asarray(out_f32), np.asarray(ref), atol=5e-4, rtol=5e-4)

    # default path: bf16 MXU operands (recommended on all TPU generations)
    out = jax.block_until_ready(upsample_forward(x, dw_w, pw_w, in_scale, in_offset))
    np.testing.assert_allclose(np.asarray(out), np.asarray(ref), atol=1e-1, rtol=1e-1)

    # two-TensorCore channel-split path (v7x/v4 default when N is odd);
    # correct on every chip, so exercise it explicitly here.
    out_g2 = jax.block_until_ready(
        upsample_forward(x, dw_w, pw_w, in_scale, in_offset, channel_groups=2))
    np.testing.assert_allclose(np.asarray(out_g2), np.asarray(ref), atol=1e-1, rtol=1e-1)

    # contraction-tiled path (bounds the folded-K VMEM block on v7x): C*H = 256,
    # k_chunk = 128 -> 2 accumulation steps over the inner "arbitrary" grid axis.
    Cin2 = 16
    k_x2, k_dw2, k_pw2 = jax.random.split(jax.random.PRNGKey(1), 3)
    x2 = jax.random.normal(k_x2, (N, Cin2, H, W), dtype=jnp.float32)
    dw2 = 0.02 * jax.random.normal(k_dw2, (Cin2, 3, 3), dtype=jnp.float32)
    pw2 = 0.02 * jax.random.normal(k_pw2, (Cout, Cin2), dtype=jnp.float32)
    ref2 = _reference(x2, dw2, pw2, in_scale, in_offset)
    out2_f32 = jax.block_until_ready(
        upsample_forward(x2, dw2, pw2, in_scale, in_offset,
                         k_chunk=128, use_bf16_mxu=False))
    np.testing.assert_allclose(np.asarray(out2_f32), np.asarray(ref2), atol=5e-4, rtol=5e-4)
    out2 = jax.block_until_ready(
        upsample_forward(x2, dw2, pw2, in_scale, in_offset, k_chunk=128))
    np.testing.assert_allclose(np.asarray(out2), np.asarray(ref2), atol=1e-1, rtol=1e-1)

    print("KERNEL_OK")
</pallas_src>

<mosaic_0001>
module attributes {stable_mosaic.version = 11 : i64} {
  func.func @_upsample_sepconv_kernel(%arg0: i32, %arg1: i32, %arg2: i32, %arg3: memref<1x64x16xf32, #tpu.memory_space<vmem>>, %arg4: memref<3x272x64xf32, #tpu.memory_space<vmem>>, %arg5: memref<3x16x128xf32, #tpu.memory_space<vmem>>, %arg6: memref<8x272xf32, #tpu.memory_space<vmem>>, %arg7: memref<272x8xf32, #tpu.memory_space<vmem>>, %arg8: memref<272x1xf32, #tpu.memory_space<vmem>>, %arg9: memref<272x1xf32, #tpu.memory_space<vmem>>, %arg10: memref<1x272x128xf32, #tpu.memory_space<vmem>>) attributes {dimension_semantics = [#tpu.dimension_semantics<parallel>, #tpu.dimension_semantics<parallel>, #tpu.dimension_semantics<arbitrary>], iteration_bounds = array<i64: 1, 2, 1>, scalar_prefetch = 0 : i64, scratch_operands = 0 : i64, tpu.core_type = #tpu.core_type<tc>, window_params = [{transform_indices = @transform_0, window_bounds = array<i64: 1, 64, 16>}, {transform_indices = @transform_1, window_bounds = array<i64: 3, 272, 64>}, {pipeline_mode = #tpu.pipeline_mode<synchronous>, transform_indices = @transform_2, window_bounds = array<i64: 3, 16, 128>}, {pipeline_mode = #tpu.pipeline_mode<synchronous>, transform_indices = @transform_3, window_bounds = array<i64: 8, 272>}, {pipeline_mode = #tpu.pipeline_mode<synchronous>, transform_indices = @transform_4, window_bounds = array<i64: 272, 8>}, {transform_indices = @transform_5, window_bounds = array<i64: 272, 1>}, {transform_indices = @transform_6, window_bounds = array<i64: 272, 1>}, {transform_indices = @transform_7, window_bounds = array<i64: 1, 272, 128>}]} {
    %c0 = arith.constant 0 : index
    %c0_0 = arith.constant 0 : index
    %c0_1 = arith.constant 0 : index
    %0 = vector.load %arg3[%c0, %c0_0, %c0_1] : memref<1x64x16xf32, #tpu.memory_space<vmem>>, vector<1x64x16xf32>
    %1 = vector.shape_cast %0 : vector<1x64x16xf32> to vector<64x16xf32>
    %c0_2 = arith.constant 0 : index
    %c0_3 = arith.constant 0 : index
    %c0_4 = arith.constant 0 : index
    %2 = vector.load %arg4[%c0_2, %c0_3, %c0_4] : memref<3x272x64xf32, #tpu.memory_space<vmem>>, vector<1x272x64xf32>
    %3 = vector.shape_cast %2 : vector<1x272x64xf32> to vector<272x64xf32>
    %cst = arith.constant dense<0.000000e+00> : vector<272x16xf32>
    %4 = tpu.matmul %3, %1, %cst {dimension_numbers = #tpu.dot_dimension_numbers<[1], [0], [0], [1], [0, 0, 1, 1], [], []>} : vector<272x64xf32>, vector<64x16xf32>, vector<272x16xf32> -> vector<272x16xf32>
    %c0_5 = arith.constant 0 : index
    %c0_6 = arith.constant 0 : index
    %c0_7 = arith.constant 0 : index
    %5 = vector.load %arg5[%c0_5, %c0_6, %c0_7] : memref<3x16x128xf32, #tpu.memory_space<vmem>>, vector<1x16x128xf32>
    %6 = vector.shape_cast %5 : vector<1x16x128xf32> to vector<16x128xf32>
    %cst_8 = arith.constant dense<0.000000e+00> : vector<272x128xf32>
    %7 = tpu.matmul %4, %6, %cst_8 {dimension_numbers = #tpu.dot_dimension_numbers<[1], [0], [0], [1], [0, 0, 1, 1], [], []>} : vector<272x16xf32>, vector<16x128xf32>, vector<272x128xf32> -> vector<272x128xf32>
    %c1 = arith.constant 1 : index
    %c0_9 = arith.constant 0 : index
    %c0_10 = arith.constant 0 : index
    %8 = vector.load %arg4[%c1, %c0_9, %c0_10] : memref<3x272x64xf32, #tpu.memory_space<vmem>>, vector<1x272x64xf32>
    %9 = vector.shape_cast %8 : vector<1x272x64xf32> to vector<272x64xf32>
    %cst_11 = arith.constant dense<0.000000e+00> : vector<272x16xf32>
    %10 = tpu.matmul %9, %1, %cst_11 {dimension_numbers = #tpu.dot_dimension_numbers<[1], [0], [0], [1], [0, 0, 1, 1], [], []>} : vector<272x64xf32>, vector<64x16xf32>, vector<272x16xf32> -> vector<272x16xf32>
    %c1_12 = arith.constant 1 : index
    %c0_13 = arith.constant 0 : index
    %c0_14 = arith.constant 0 : index
    %11 = vector.load %arg5[%c1_12, %c0_13, %c0_14] : memref<3x16x128xf32, #tpu.memory_space<vmem>>, vector<1x16x128xf32>
    %12 = vector.shape_cast %11 : vector<1x16x128xf32> to vector<16x128xf32>
    %cst_15 = arith.constant dense<0.000000e+00> : vector<272x128xf32>
    %13 = tpu.matmul %10, %12, %cst_15 {dimension_numbers = #tpu.dot_dimension_numbers<[1], [0], [0], [1], [0, 0, 1, 1], [], []>} : vector<272x16xf32>, vector<16x128xf32>, vector<272x128xf32> -> vector<272x128xf32>
    %14 = arith.addf %7, %13 : vector<272x128xf32>
    %c2 = arith.constant 2 : index
    %c0_16 = arith.constant 0 : index
    %c0_17 = arith.constant 0 : index
    %15 = vector.load %arg4[%c2, %c0_16, %c0_17] : memref<3x272x64xf32, #tpu.memory_space<vmem>>, vector<1x272x64xf32>
    %16 = vector.shape_cast %15 : vector<1x272x64xf32> to vector<272x64xf32>
    %cst_18 = arith.constant dense<0.000000e+00> : vector<272x16xf32>
    %17 = tpu.matmul %16, %1, %cst_18 {dimension_numbers = #tpu.dot_dimension_numbers<[1], [0], [0], [1], [0, 0, 1, 1], [], []>} : vector<272x64xf32>, vector<64x16xf32>, vector<272x16xf32> -> vector<272x16xf32>
    %c2_19 = arith.constant 2 : index
    %c0_20 = arith.constant 0 : index
    %c0_21 = arith.constant 0 : index
    %18 = vector.load %arg5[%c2_19, %c0_20, %c0_21] : memref<3x16x128xf32, #tpu.memory_space<vmem>>, vector<1x16x128xf32>
    %19 = vector.shape_cast %18 : vector<1x16x128xf32> to vector<16x128xf32>
    %cst_22 = arith.constant dense<0.000000e+00> : vector<272x128xf32>
    %20 = tpu.matmul %17, %19, %cst_22 {dimension_numbers = #tpu.dot_dimension_numbers<[1], [0], [0], [1], [0, 0, 1, 1], [], []>} : vector<272x16xf32>, vector<16x128xf32>, vector<272x128xf32> -> vector<272x128xf32>
    %21 = arith.addf %14, %20 : vector<272x128xf32>
    %c0_23 = arith.constant 0 : index
    %c0_24 = arith.constant 0 : index
    %22 = vector.load %arg6[%c0_23, %c0_24] : memref<8x272xf32, #tpu.memory_space<vmem>>, vector<8x272xf32>
    %cst_25 = arith.constant dense<0.000000e+00> : vector<8x128xf32>
    %23 = tpu.matmul %22, %21, %cst_25 {dimension_numbers = #tpu.dot_dimension_numbers<[1], [0], [0], [1], [0, 0, 1, 1], [], []>} : vector<8x272xf32>, vector<272x128xf32>, vector<8x128xf32> -> vector<8x128xf32>
    %cst_26 = arith.constant dense<0.000000e+00> : vector<8xf32>
    %24 = vector.multi_reduction <add>, %23, %cst_26 [1] : vector<8x128xf32> to vector<8xf32>
    %25 = vector.shape_cast %24 : vector<8xf32> to vector<8x1xf32>
    %c0_27 = arith.constant 0 : index
    %c0_28 = arith.constant 0 : index
    %26 = vector.load %arg6[%c0_27, %c0_28] : memref<8x272xf32, #tpu.memory_space<vmem>>, vector<8x272xf32>
    %27 = arith.mulf %21, %21 : vector<272x128xf32>
    %cst_29 = arith.constant dense<0.000000e+00> : vector<8x128xf32>
    %28 = tpu.matmul %26, %27, %cst_29 {dimension_numbers = #tpu.dot_dimension_numbers<[1], [0], [0], [1], [0, 0, 1, 1], [], []>} : vector<8x272xf32>, vector<272x128xf32>, vector<8x128xf32> -> vector<8x128xf32>
    %cst_30 = arith.constant dense<0.000000e+00> : vector<8xf32>
    %29 = vector.multi_reduction <add>, %28, %cst_30 [1] : vector<8x128xf32> to vector<8xf32>
    %30 = vector.shape_cast %29 : vector<8xf32> to vector<8x1xf32>
    %cst_31 = arith.constant 8.6505193E-4 : f32
    %31 = vector.broadcast %cst_31 : f32 to vector<8x1xf32>
    %32 = arith.mulf %25, %31 : vector<8x1xf32>
    %cst_32 = arith.constant 8.6505193E-4 : f32
    %33 = vector.broadcast %cst_32 : f32 to vector<8x1xf32>
    %34 = arith.mulf %30, %33 : vector<8x1xf32>
    %35 = arith.mulf %32, %32 : vector<8x1xf32>
    %36 = arith.subf %34, %35 : vector<8x1xf32>
    %c0_33 = arith.constant 0 : index
    %c0_34 = arith.constant 0 : index
    %37 = vector.load %arg7[%c0_33, %c0_34] : memref<272x8xf32, #tpu.memory_space<vmem>>, vector<272x8xf32>
    %cst_35 = arith.constant dense<0.000000e+00> : vector<272x1xf32>
    %38 = tpu.matmul %37, %32, %cst_35 {dimension_numbers = #tpu.dot_dimension_numbers<[1], [0], [0], [1], [0, 0, 1, 1], [], []>} : vector<272x8xf32>, vector<8x1xf32>, vector<272x1xf32> -> vector<272x1xf32>
    %c0_36 = arith.constant 0 : index
    %c0_37 = arith.constant 0 : index
    %39 = vector.load %arg7[%c0_36, %c0_37] : memref<272x8xf32, #tpu.memory_space<vmem>>, vector<272x8xf32>
    %cst_38 = arith.constant dense<0.000000e+00> : vector<272x1xf32>
    %40 = tpu.matmul %39, %36, %cst_38 {dimension_numbers = #tpu.dot_dimension_numbers<[1], [0], [0], [1], [0, 0, 1, 1], [], []>} : vector<272x8xf32>, vector<8x1xf32>, vector<272x1xf32> -> vector<272x1xf32>
    %c0_39 = arith.constant 0 : index
    %c0_40 = arith.constant 0 : index
    %41 = vector.load %arg8[%c0_39, %c0_40] : memref<272x1xf32, #tpu.memory_space<vmem>>, vector<272x1xf32>
    %cst_41 = arith.constant 9.99999974E-6 : f32
    %42 = vector.broadcast %cst_41 : f32 to vector<272x1xf32>
    %43 = arith.addf %40, %42 : vector<272x1xf32>
    %44 = math.rsqrt %43 : vector<272x1xf32>
    %45 = arith.mulf %41, %44 : vector<272x1xf32>
    %46 = vector.broadcast %38 : vector<272x1xf32> to vector<272x128xf32>
    %47 = arith.subf %21, %46 : vector<272x128xf32>
    %48 = vector.broadcast %45 : vector<272x1xf32> to vector<272x128xf32>
    %49 = arith.mulf %47, %48 : vector<272x128xf32>
    %c0_42 = arith.constant 0 : index
    %c0_43 = arith.constant 0 : index
    %50 = vector.load %arg9[%c0_42, %c0_43] : memref<272x1xf32, #tpu.memory_space<vmem>>, vector<272x1xf32>
    %51 = vector.broadcast %50 : vector<272x1xf32> to vector<272x128xf32>
    %52 = arith.addf %49, %51 : vector<272x128xf32>
    %cst_44 = arith.constant 0.000000e+00 : f32
    %53 = vector.broadcast %cst_44 : f32 to vector<272x128xf32>
    %54 = arith.cmpf oge, %52, %53 : vector<272x128xf32>
    %cst_45 = arith.constant 2.000000e-01 : f32
    %55 = vector.broadcast %cst_45 : f32 to vector<272x128xf32>
    %56 = arith.mulf %55, %52 : vector<272x128xf32>
    %57 = arith.select %54, %52, %56 : vector<272x128xi1>, vector<272x128xf32>
    %c0_46 = arith.constant 0 : index
    %c0_47 = arith.constant 0 : index
    %c0_48 = arith.constant 0 : index
    %58 = vector.load %arg10[%c0_46, %c0_47, %c0_48] : memref<1x272x128xf32, #tpu.memory_space<vmem>>, vector<1x272x128xf32>
    %59 = vector.shape_cast %58 : vector<1x272x128xf32> to vector<272x128xf32>
    %60 = vector.shape_cast %57 : vector<272x128xf32> to vector<1x272x128xf32>
    tpu.vector_store %arg10[%c0_46, %c0_47, %c0_48], %60 {strides = array<i32>} : memref<1x272x128xf32, #tpu.memory_space<vmem>>, vector<1x272x128xf32>,
    return
  }
  func.func @transform_0(%arg0: i32, %arg1: i32, %arg2: i32) -> (i32, i32, i32) {
    %c0_i32 = arith.constant 0 : i32
    %c0_i32_0 = arith.constant 0 : i32
    return %arg1, %arg2, %c0_i32 : i32, i32, i32
  }
  func.func @transform_1(%arg0: i32, %arg1: i32, %arg2: i32) -> (i32, i32, i32) {
    %c0_i32 = arith.constant 0 : i32
    %c0_i32_0 = arith.constant 0 : i32
    return %c0_i32, %arg0, %arg2 : i32, i32, i32
  }
  func.func @transform_2(%arg0: i32, %arg1: i32, %arg2: i32) -> (i32, i32, i32) {
    %c0_i32 = arith.constant 0 : i32
    %c0_i32_0 = arith.constant 0 : i32
    %c0_i32_1 = arith.constant 0 : i32
    %c0_i32_2 = arith.constant 0 : i32
    return %c0_i32, %c0_i32_0, %c0_i32_1 : i32, i32, i32
  }
  func.func @transform_3(%arg0: i32, %arg1: i32, %arg2: i32) -> (i32, i32) {
    %c0_i32 = arith.constant 0 : i32
    %c0_i32_0 = arith.constant 0 : i32
    %c0_i32_1 = arith.constant 0 : i32
    return %c0_i32, %c0_i32_0 : i32, i32
  }
  func.func @transform_4(%arg0: i32, %arg1: i32, %arg2: i32) -> (i32, i32) {
    %c0_i32 = arith.constant 0 : i32
    %c0_i32_0 = arith.constant 0 : i32
    %c0_i32_1 = arith.constant 0 : i32
    return %c0_i32, %c0_i32_0 : i32, i32
  }
  func.func @transform_5(%arg0: i32, %arg1: i32, %arg2: i32) -> (i32, i32) {
    %c0_i32 = arith.constant 0 : i32
    %c0_i32_0 = arith.constant 0 : i32
    return %arg0, %c0_i32 : i32, i32
  }
  func.func @transform_6(%arg0: i32, %arg1: i32, %arg2: i32) -> (i32, i32) {
    %c0_i32 = arith.constant 0 : i32
    %c0_i32_0 = arith.constant 0 : i32
    return %arg0, %c0_i32 : i32, i32
  }
  func.func @transform_7(%arg0: i32, %arg1: i32, %arg2: i32) -> (i32, i32, i32) {
    %c0_i32 = arith.constant 0 : i32
    %c0_i32_0 = arith.constant 0 : i32
    return %arg1, %arg0, %c0_i32 : i32, i32, i32
  }
}

</mosaic_0001>

<bundles_post_ra>
// kernel: tpu_custom_call.1
= control target key start
LH: loop header
LB: loop body
LE: loop exit
PB: predicated region body
PF: predicated region fallthrough
CT: control target
= control target key end

     0   :  { %12 = vsyncpa [#allocation3], 0  ;;  %s6008_s0 = inlined_call_operand.vmem [shape: f32[2,64,16], index: 0, kind: input, shape index: {}]   ;;  %s6009_s1 = inlined_call_operand.vmem [shape: f32[3,272,64], index: 1, kind: input, shape index: {}]   ;;  %s6010_s2 = inlined_call_operand.vmem [shape: f32[3,16,128], index: 2, kind: input, shape index: {}]   ;;  %s6011_s3 = inlined_call_operand.vmem [shape: f32[8,272], index: 3, kind: input, shape index: {}]   ;;  %s6012_s4 = inlined_call_operand.vmem [shape: f32[272,8], index: 4, kind: input, shape index: {}]   ;;  %s6013_s5 = inlined_call_operand.vmem [shape: f32[272,1], index: 5, kind: input, shape index: {}]   ;;  %s6014_s6 = inlined_call_operand.vmem [shape: f32[272,1], index: 6, kind: input, shape index: {}]   ;;  %s6015_s7 = inlined_call_operand.hbm [shape: f32[2,272,128], index: 7, kind: output, shape index: {}]  }
   0x1   :  { %14 = vsyncpa [#allocation3 + $0x1], 0  ;;  %s4371_s24 = smov 0   ;;  %s4373_s25 = smov 0  }
   0x2   :  { %s4375_s26 = smov 0   ;;  %s4377_s27 = smov 0  }
   0x3   :  { %s4379_s28 = smov 0   ;;  %s4381_s29 = smov 0  }
   0x4 LB: > { %s3755_s30 = sadd.s32 4294967295, %s4326_s29   ;;  %s3756_s8 = sadd.s32 4294967294, %s4326_s29   ;;  %s4326_s29 = sphi %s4381_s29, %s20_s29   ;;  %s4322_s28 = sphi %s4379_s28, %s6102_s28   ;;  %s4318_s27 = sphi %s4377_s27, %s6101_s27   ;;  %s4314_s26 = sphi %s4375_s26, %s6100_s26   ;;  %s4310_s25 = sphi %s4373_s25, %s6099_s25   ;;  %s4306_s24 = sphi %s4371_s24, %s6098_s24  }
   0x5   : > { %s35_s9 = sadd.s32 1, %s4322_s28  ;;  %s219_s10 = sadd.s32 1, %s4314_s26 }
   0x6   : > { %p37_p0 = scmp.ge.s32.totalorder %s35_s9, 2  ;;  %p229_p1 = scmp.ne.s32.totalorder %s4314_s26, %s4310_s25 }
   0x7   : > { %p230_p2 = scmp.eq.s32.totalorder %s3755_s30, 1  ;;  %p235_p3 = scmp.ne.s32.totalorder %s4310_s25, %s4306_s24 }
   0x8   : > { %s6104_s9 = smov (%p37_p0, %s35_s9), 0  ;;  %p236_p5 = scmp.eq.s32.totalorder %s3756_s8, 1 }
   0x9   : > { %p4411_p4 = por %p230_p2, %p229_p1  ;;  %s214_s12 = ssub.s32 %s4322_s28, %s6104_s9 }
   0xa   : > { %p3762_p6 = scmp.ge.s32.totalorder %s4326_s29, 1  ;;  %p217_p7 = scmp.eq.s32.totalorder %s214_s12, 0 }
   0xb   : > { %p4418_p8 = por %p236_p5, %p235_p3  ;;  %p306_p9 = scmp.lt.s32.totalorder %s4326_s29, 3 }
   0xc   : > { %s4424_s14 = scalar_select %p217_p7, %s4314_s26, %s219_s10  }
   0xd   : > { %p307_p10 = pnand %p3762_p6, %p306_p9 }
   0xf   : > { %310 = sbr.rel (%p307_p10) target bundleno = 1794 (0x702), region = 48 }
  0x14   : > { %p361_p11 = scmp.lt.s32.totalorder %s4318_s27, 1  ;;  %v400_v8 = vld [vmem:[%s6009_s1] sm:$0xff]  ;;  %vm434_vm0 = vcmask 523264   ;;  %v3799_v9 = vld [vmem:[%s6009_s1 + $0x110] sm:$0xff]  ;;  %v401_v10 = vld [vmem:[%s6009_s1 + $0x8] sm:$0xff]  ;;  %vm917_vm1 = vcmask 130048  }
  0x15   : > { %v3800_v11 = vld [vmem:[%s6009_s1 + $0x118] sm:$0xff]  ;;  %v402_v12 = vld [vmem:[%s6009_s1 + $0x10] sm:$0xff]  ;;  %v3801_v13 = vld [vmem:[%s6009_s1 + $0x120] sm:$0xff]  ;;  %vm2076_vm2 = vcmask 64512   ;;  %s357_s21 = sand.u32 1, %s4310_s25   ;;  %s4117_s17 = smul.u32 272, %s4318_s27 }
  0x16   : > { %s362_s15 = scalar_select %p361_p11, %s4318_s27, 1  ;;  %v403_v14 = vld [vmem:[%s6009_s1 + $0x18] sm:$0xff]  ;;  %v3802_v15 = vld [vmem:[%s6009_s1 + $0x128] sm:$0xff]  ;;  %v404_v16 = vld [vmem:[%s6009_s1 + $0x20] sm:$0xff] }
  0x17   : > { %v3803_v17 = vld [vmem:[%s6009_s1 + $0x130] sm:$0xff]  ;;  %v405_v18 = vld [vmem:[%s6009_s1 + $0x28] sm:$0xff]  ;;  %v3804_v19 = vld [vmem:[%s6009_s1 + $0x138] sm:$0xff]  ;;  %s4116_s22 = smul.u32 272, %s357_s21  ;;  %s3621_s20 = scalar_lea.hbm %s6015_s7, %s4117_s17 }
  0x18   : > { %s4114_s16 = sshll.u32 %s362_s15, 6  ;;  %v406_v20 = vld [vmem:[%s6009_s1 + $0x30] sm:$0xff]  ;;  %v3805_v21 = vld [vmem:[%s6009_s1 + $0x140] sm:$0xff]  ;;  %v407_v22 = vld [vmem:[%s6009_s1 + $0x38] sm:$0xff]  ;;  %s3608_s23 = scalar_lea.sflag [#allocation3], %s357_s21 }
  0x19   : > { %s368_s19 = scalar_lea.vmem %s6008_s0, %s4114_s16  ;;  %v3806_v23 = vld [vmem:[%s6009_s1 + $0x148] sm:$0xff]  ;;  %v408_v24 = vld [vmem:[%s6009_s1 + $0x40] sm:$0xff]  ;;  %v3807_v25 = vld [vmem:[%s6009_s1 + $0x150] sm:$0xff]  ;;  %s5731_s8 = scalar_lea.vmem [#allocation2], %s4116_s22 }
  0x1a   : > { %v4431_v0 = vld [vmem:[%s368_s19 + $0x38] sm:$0xff]  ;;  %v4433_v1 = vld [vmem:[%s368_s19 + $0x30] sm:$0xff]  ;;  %v4437_v2 = vld [vmem:[%s368_s19 + $0x28] sm:$0xff]  ;;  %s3622_s27 = sshll.u32 %s5731_s8, 4  ;;  %s3624_s22 = sshll.u32 %s3621_s20, 4  ;;  %s3623_s27 = int_to_ptr.vmem [resolvable:$true] %s3622_s27  ;;  %s3625_s22 = int_to_ptr.hbm [resolvable:$true] %s3624_s22 }
  0x1b   : > { %545 = vmatpush.msra.mxu0 %v4431_v0  ;;  %803 = vmatpush.msra.mxu1 %v4431_v0  ;;  %v4441_v3 = vld [vmem:[%s368_s19 + $0x20] sm:$0xff]  ;;  %v4445_v4 = vld [vmem:[%s368_s19 + $0x18] sm:$0xff]  ;;  %v4449_v5 = vld [vmem:[%s368_s19 + $0x10] sm:$0xff]  ;;  %s4262_s30 = sshra.s32 %s3625_s22, 4  ;;  %s4268_s16 = scalar_lea.hbm %s6015_s7, 544  ;;  %s4263_s30 = int_to_ptr.hbm [resolvable:$true] %s4262_s30 }
  0x1c   : > { %v4453_v6 = vld [vmem:[%s368_s19 + $0x8] sm:$0xff]  ;;  %v4457_v7 = vld [vmem:[%s368_s19] sm:$0xff]  ;;  %v3808_v27 = vld [vmem:[%s6009_s1 + $0x158] sm:$0xff]  ;;  %s4264_s10 = scalar_lea.hbm %s4263_s30, 272  ;;  %p4269_p1 = scmp.lt.s32.totalorder %s4263_s30, %s6015_s7 }
  0x1d   : > { %546 = vmatpush.msra.mxu0 %v4433_v1  ;;  %804 = vmatpush.msra.mxu1 %v4433_v1  ;;  %v409_v26 = vld [vmem:[%s6009_s1 + $0x48] sm:$0xff]  ;;  %v410_v28 = vld [vmem:[%s6009_s1 + $0x50] sm:$0xff]  ;;  %v3809_v29 = vld [vmem:[%s6009_s1 + $0x160] sm:$0xff]  ;;  %p4265_p12 = scmp.ne.s32.totalorder %s4263_s30, %s4264_s10  ;;  %p4270_p2 = scmp.lt.s32.totalorder %s4268_s16, %s4264_s10 }
  0x1e   : > { %v411_v30 = vld [vmem:[%s6009_s1 + $0x58] sm:$0xff]  ;;  %v3810_v31 = vld [vmem:[%s6009_s1 + $0x168] sm:$0xff]  ;;  %v3867_v34 = vld [vmem:[%s6010_s2 + $0x10] sm:$0xff] }
  0x1f   : > { %547 = vmatpush.msra.mxu0 %v4437_v2  ;;  %805 = vmatpush.msra.mxu1 %v4437_v2  ;;  %v3868_v32 = vld [vmem:[%s6010_s2 + $0x18] sm:$0xff]  ;;  %v657_v33 = vld [vmem:[%s6010_s2 + $0x8] sm:$0xff]  ;;  %v656_v35 = vld [vmem:[%s6010_s2] sm:$0xff]  ;;  %p4266_p13 = pnand %p4265_p12, %p4411_p4  ;;  %p4271_p3 = por %p4270_p2, %p4269_p1 }
  0x20   : > { %1034 = vmatpush.msra.mxu2 %v3868_v32  ;;  %1255 = vmatpush.msra.mxu3 %v657_v33  ;;  %v412_v36 = vld [vmem:[%s6009_s1 + $0x60] sm:$0xff]  ;;  %v3811_v37 = vld [vmem:[%s6009_s1 + $0x170] sm:$0xff]  ;;  %v413_v38 = vld [vmem:[%s6009_s1 + $0x68] sm:$0xff] }
  0x21   : > { %548 = vmatpush.msra.mxu0 %v4441_v3  ;;  %806 = vmatpush.msra.mxu1 %v4441_v3  ;;  %v3812_v39 = vld [vmem:[%s6009_s1 + $0x178] sm:$0xff]  ;;  %v414_v40 = vld [vmem:[%s6009_s1 + $0x70] sm:$0xff]  ;;  %v3813_v41 = vld [vmem:[%s6009_s1 + $0x180] sm:$0xff]  ;;  %p4267_p0 = pneg %p4266_p13 }
  0x22   : > { %1035 = vmatpush.msra.mxu2 %v3867_v34  ;;  %1256 = vmatpush.msra.mxu3 %v656_v35  ;;  %v415_v42 = vld [vmem:[%s6009_s1 + $0x78] sm:$0xff]  ;;  %v3814_v43 = vld [vmem:[%s6009_s1 + $0x188] sm:$0xff]  ;;  %v416_v46 = vld [vmem:[%s6009_s1 + $0x80] sm:$0xff] }
  0x23   : > { %549 = vmatpush.msra.mxu0 %v4445_v4  ;;  %807 = vmatpush.msra.mxu1 %v4445_v4  ;;  %v3815_v47 = vld [vmem:[%s6009_s1 + $0x190] sm:$0xff]  ;;  %v417_v50 = vld [vmem:[%s6009_s1 + $0x88] sm:$0xff]  ;;  %v3816_v51 = vld [vmem:[%s6009_s1 + $0x198] sm:$0xff]  ;;  %p4272_p5 = pnand %p4271_p3, %p4267_p0 }
  0x24   : > { %1505 = vmatpush.msrb.mxu2 %v4431_v0  ;;  %v418_v54 = vld [vmem:[%s6009_s1 + $0x90] sm:$0xff]  ;;  %v3817_v55 = vld [vmem:[%s6009_s1 + $0x1a0] sm:$0xff]  ;;  %v419_v58 = vld [vmem:[%s6009_s1 + $0x98] sm:$0xff] }
  0x25   : > { %550 = vmatpush.msra.mxu0 %v4449_v5  ;;  %808 = vmatpush.msra.mxu1 %v4449_v5  ;;  %v3818_v59 = vld [vmem:[%s6009_s1 + $0x1a8] sm:$0xff]  ;;  %v420_v62 = vld [vmem:[%s6009_s1 + $0xa0] sm:$0xff]  ;;  %v3819_v63 = vld [vmem:[%s6009_s1 + $0x1b0] sm:$0xff] }
  0x26   : > { %1506 = vmatpush.msrb.mxu2 %v4433_v1  ;;  %v429_v34 = vld [vmem:[%s6009_s1 + $0xe8] sm:$0xff]  ;;  %v3828_v35 = vld [vmem:[%s6009_s1 + $0x1f8] sm:$0xff] }
  0x27   : > { %551 = vmatpush.msra.mxu0 %v4453_v6  ;;  %809 = vmatpush.msra.mxu1 %v4453_v6 }
  0x28   : > { %1507 = vmatpush.msrb.mxu2 %v4437_v2  ;;  %v421_v2 = vld [vmem:[%s6009_s1 + $0xa8] sm:$0xff] }
  0x29   : > { %552 = vmatpush.msra.mxu0 %v4457_v7  ;;  %810 = vmatpush.msra.mxu1 %v4457_v7 }
  0x2a   : > { %3765 = vmatmul.msk.f32.vlgmr.msra.gmra.mxu0 %vm434_vm0, %v400_v8  ;;  %3833 = vmatmul.msk.f32.vlgmr.msra.gmra.mxu1 %vm434_vm0, %v3799_v9 }
  0x2b   : > { %1508 = vmatpush.msrb.mxu2 %v4441_v3  ;;  %v3820_v3 = vld [vmem:[%s6009_s1 + $0x1b8] sm:$0xff] }
  0x2d   : > { %1509 = vmatpush.msrb.mxu2 %v4445_v4 }
  0x2f   : > { %1510 = vmatpush.msrb.mxu2 %v4449_v5 }
  0x31   : > { %1511 = vmatpush.msrb.mxu2 %v4453_v6  ;;  %v422_v6 = vld [vmem:[%s6009_s1 + $0xb0] sm:$0xff] }
  0x32   : > { %3766 = vmatmul.msk.f32.gmra.mxu0 %vm434_vm0, %v401_v10  ;;  %3834 = vmatmul.msk.f32.gmra.mxu1 %vm434_vm0, %v3800_v11  ;;  %v423_v10 = vld [vmem:[%s6009_s1 + $0xb8] sm:$0xff]  ;;  %v3822_v11 = vld [vmem:[%s6009_s1 + $0x1c8] sm:$0xff] }
  0x33   : > { %1512 = vmatpush.msrb.mxu2 %v4457_v7  ;;  %v3821_v7 = vld [vmem:[%s6009_s1 + $0x1c0] sm:$0xff] }
  0x3a   : > { %3767 = vmatmul.msk.f32.gmra.mxu0 %vm434_vm0, %v402_v12  ;;  %3835 = vmatmul.msk.f32.gmra.mxu1 %vm434_vm0, %v3801_v13 }
  0x42   : > { %3768 = vmatmul.msk.f32.gmra.mxu0 %vm434_vm0, %v403_v14  ;;  %3836 = vmatmul.msk.f32.gmra.mxu1 %vm434_vm0, %v3802_v15  ;;  %v424_v14 = vld [vmem:[%s6009_s1 + $0xc0] sm:$0xff]  ;;  %v3823_v15 = vld [vmem:[%s6009_s1 + $0x1d0] sm:$0xff] }
  0x4a   : > { %3769 = vmatmul.msk.f32.gmra.mxu0 %vm434_vm0, %v404_v16  ;;  %3837 = vmatmul.msk.f32.gmra.mxu1 %vm434_vm0, %v3803_v17 }
  0x52   : > { %3770 = vmatmul.msk.f32.gmra.mxu0 %vm434_vm0, %v405_v18  ;;  %3838 = vmatmul.msk.f32.gmra.mxu1 %vm434_vm0, %v3804_v19  ;;  %v425_v18 = vld [vmem:[%s6009_s1 + $0xc8] sm:$0xff]  ;;  %v3824_v19 = vld [vmem:[%s6009_s1 + $0x1d8] sm:$0xff] }
  0x5a   : > { %3771 = vmatmul.msk.f32.gmra.mxu0 %vm434_vm0, %v406_v20  ;;  %3839 = vmatmul.msk.f32.gmra.mxu1 %vm434_vm0, %v3805_v21 }
  0x62   : > { %3772 = vmatmul.msk.f32.gmra.mxu0 %vm434_vm0, %v407_v22  ;;  %3840 = vmatmul.msk.f32.gmra.mxu1 %vm434_vm0, %v3806_v23  ;;  %v426_v22 = vld [vmem:[%s6009_s1 + $0xd0] sm:$0xff]  ;;  %v3825_v23 = vld [vmem:[%s6009_s1 + $0x1e0] sm:$0xff] }
  0x6a   : > { %3773 = vmatmul.msk.f32.gmra.mxu0 %vm434_vm0, %v408_v24  ;;  %3841 = vmatmul.msk.f32.gmra.mxu1 %vm434_vm0, %v3807_v25 }
  0x72   : > { %3774 = vmatmul.msk.f32.gmra.mxu0 %vm434_vm0, %v409_v26  ;;  %3842 = vmatmul.msk.f32.gmra.mxu1 %vm434_vm0, %v3808_v27  ;;  %v427_v26 = vld [vmem:[%s6009_s1 + $0xd8] sm:$0xff]  ;;  %v3826_v27 = vld [vmem:[%s6009_s1 + $0x1e8] sm:$0xff] }
  0x7a   : > { %3775 = vmatmul.msk.f32.gmra.mxu0 %vm434_vm0, %v410_v28  ;;  %3843 = vmatmul.msk.f32.gmra.mxu1 %vm434_vm0, %v3809_v29 }
  0x82   : > { %3776 = vmatmul.msk.f32.gmra.mxu0 %vm434_vm0, %v411_v30  ;;  %3844 = vmatmul.msk.f32.gmra.mxu1 %vm434_vm0, %v3810_v31  ;;  %v428_v30 = vld [vmem:[%s6009_s1 + $0xe0] sm:$0xff]  ;;  %v3827_v31 = vld [vmem:[%s6009_s1 + $0x1f0] sm:$0xff] }
  0x8a   : > { %3777 = vmatmul.msk.f32.gmra.mxu0 %vm434_vm0, %v412_v36  ;;  %3845 = vmatmul.msk.f32.gmra.mxu1 %vm434_vm0, %v3811_v37 }
  0x92   : > { %3778 = vmatmul.msk.f32.gmra.mxu0 %vm434_vm0, %v413_v38  ;;  %3846 = vmatmul.msk.f32.gmra.mxu1 %vm434_vm0, %v3812_v39  ;;  %v430_v38 = vld [vmem:[%s6009_s1 + $0xf0] sm:$0xff]  ;;  %v3829_v39 = vld [vmem:[%s6009_s1 + $0x200] sm:$0xff] }
  0x9a   : > { %3779 = vmatmul.msk.f32.gmra.mxu0 %vm434_vm0, %v414_v40  ;;  %3847 = vmatmul.msk.f32.gmra.mxu1 %vm434_vm0, %v3813_v41 }
  0xa2   : > { %3780 = vmatmul.msk.f32.gmra.mxu0 %vm434_vm0, %v415_v42  ;;  %3848 = vmatmul.msk.f32.gmra.mxu1 %vm434_vm0, %v3814_v43  ;;  %v431_v42 = vld [vmem:[%s6009_s1 + $0xf8] sm:$0xff]  ;;  %v3830_v43 = vld [vmem:[%s6009_s1 + $0x208] sm:$0xff] }
  0xa7   : > { %v554_v44 = vpop.f32.mrf.mxu0  ;;  %v812_v45 = vpop.f32.mrf.mxu1 }
  0xa8   : > { %3869 = vmatmul.msk.f32.vlgmr.msra.gmra.mxu2 %vm917_vm1, %v812_v45  ;;  %3903 = vmatmul.msk.f32.vlgmr.msra.gmra.mxu3 %vm917_vm1, %v554_v44 }
  0xaa   : > { %3781 = vmatmul.msk.f32.gmra.mxu0 %vm434_vm0, %v416_v46  ;;  %3849 = vmatmul.msk.f32.gmra.mxu1 %vm434_vm0, %v3815_v47  ;;  %v432_v46 = vld [vmem:[%s6009_s1 + $0x100] sm:$0xff]  ;;  %v3831_v47 = vld [vmem:[%s6009_s1 + $0x210] sm:$0xff] }
  0xaf   : > { %v557_v48 = vpop.f32.mrf.mxu0  ;;  %v815_v49 = vpop.f32.mrf.mxu1 }
  0xb0   : > { %3870 = vmatmul.msk.f32.gmra.mxu2 %vm917_vm1, %v815_v49  ;;  %3904 = vmatmul.msk.f32.gmra.mxu3 %vm917_vm1, %v557_v48 }
  0xb2   : > { %3782 = vmatmul.msk.f32.gmra.mxu0 %vm434_vm0, %v417_v50  ;;  %3850 = vmatmul.msk.f32.gmra.mxu1 %vm434_vm0, %v3816_v51 }
  0xb7   : > { %v560_v52 = vpop.f32.mrf.mxu0  ;;  %v818_v53 = vpop.f32.mrf.mxu1 }
  0xb8   : > { %3871 = vmatmul.msk.f32.gmra.mxu2 %vm917_vm1, %v818_v53  ;;  %3905 = vmatmul.msk.f32.gmra.mxu3 %vm917_vm1, %v560_v52  ;;  %v433_v53 = vld [vmem:[%s6009_s1 + $0x108] sm:$0xff] }
  0xba   : > { %3783 = vmatmul.msk.f32.gmra.mxu0 %vm434_vm0, %v418_v54  ;;  %3851 = vmatmul.msk.f32.gmra.mxu1 %vm434_vm0, %v3817_v55  ;;  %v3832_v54 = vld [vmem:[%s6009_s1 + $0x218] sm:$0xff] }
  0xbf   : > { %v563_v56 = vpop.f32.mrf.mxu0  ;;  %v821_v57 = vpop.f32.mrf.mxu1 }
  0xc0   : > { %3872 = vmatmul.msk.f32.gmra.mxu2 %vm917_vm1, %v821_v57  ;;  %3906 = vmatmul.msk.f32.gmra.mxu3 %vm917_vm1, %v563_v56 }
  0xc2   : > { %3784 = vmatmul.msk.f32.gmra.mxu0 %vm434_vm0, %v419_v58  ;;  %3852 = vmatmul.msk.f32.gmra.mxu1 %vm434_vm0, %v3818_v59 }
  0xc7   : > { %v566_v60 = vpop.f32.mrf.mxu0  ;;  %v824_v61 = vpop.f32.mrf.mxu1 }
  0xc8   : > { %3873 = vmatmul.msk.f32.gmra.mxu2 %vm917_vm1, %v824_v61  ;;  %3907 = vmatmul.msk.f32.gmra.mxu3 %vm917_vm1, %v566_v60 }
  0xca   : > { %3785 = vmatmul.msk.f32.gmra.mxu0 %vm434_vm0, %v420_v62  ;;  %3853 = vmatmul.msk.f32.gmra.mxu1 %vm434_vm0, %v3819_v63 }
  0xcf   : > { %v569_v0 = vpop.f32.mrf.mxu0  ;;  %v827_v1 = vpop.f32.mrf.mxu1 }
  0xd0   : > { %3874 = vmatmul.msk.f32.gmra.mxu2 %vm917_vm1, %v827_v1  ;;  %3908 = vmatmul.msk.f32.gmra.mxu3 %vm917_vm1, %v569_v0 }
  0xd2   : > { %3786 = vmatmul.msk.f32.gmra.mxu0 %vm434_vm0, %v421_v2  ;;  %3854 = vmatmul.msk.f32.gmra.mxu1 %vm434_vm0, %v3820_v3 }
  0xd7   : > { %v572_v4 = vpop.f32.mrf.mxu0  ;;  %v830_v5 = vpop.f32.mrf.mxu1 }
  0xd8   : > { %3875 = vmatmul.msk.f32.gmra.mxu2 %vm917_vm1, %v830_v5  ;;  %3909 = vmatmul.msk.f32.gmra.mxu3 %vm917_vm1, %v572_v4 }
  0xda   : > { %3787 = vmatmul.msk.f32.gmra.mxu0 %vm434_vm0, %v422_v6  ;;  %3855 = vmatmul.msk.f32.gmra.mxu1 %vm434_vm0, %v3821_v7 }
  0xdf   : > { %v575_v8 = vpop.f32.mrf.mxu0  ;;  %v833_v9 = vpop.f32.mrf.mxu1 }
  0xe0   : > { %3876 = vmatmul.msk.f32.gmra.mxu2 %vm917_vm1, %v833_v9  ;;  %3910 = vmatmul.msk.f32.gmra.mxu3 %vm917_vm1, %v575_v8 }
  0xe2   : > { %3788 = vmatmul.msk.f32.gmra.mxu0 %vm434_vm0, %v423_v10  ;;  %3856 = vmatmul.msk.f32.gmra.mxu1 %vm434_vm0, %v3822_v11 }
  0xe7   : > { %v578_v12 = vpop.f32.mrf.mxu0  ;;  %v836_v13 = vpop.f32.mrf.mxu1 }
  0xe8   : > { %3877 = vmatmul.msk.f32.gmra.mxu2 %vm917_vm1, %v836_v13  ;;  %3911 = vmatmul.msk.f32.gmra.mxu3 %vm917_vm1, %v578_v12 }
  0xea   : > { %3789 = vmatmul.msk.f32.gmra.mxu0 %vm434_vm0, %v424_v14  ;;  %3857 = vmatmul.msk.f32.gmra.mxu1 %vm434_vm0, %v3823_v15 }
  0xef   : > { %v581_v16 = vpop.f32.mrf.mxu0  ;;  %v839_v17 = vpop.f32.mrf.mxu1 }
  0xf0   : > { %3878 = vmatmul.msk.f32.gmra.mxu2 %vm917_vm1, %v839_v17  ;;  %3912 = vmatmul.msk.f32.gmra.mxu3 %vm917_vm1, %v581_v16 }
  0xf2   : > { %3790 = vmatmul.msk.f32.gmra.mxu0 %vm434_vm0, %v425_v18  ;;  %3858 = vmatmul.msk.f32.gmra.mxu1 %vm434_vm0, %v3824_v19 }
  0xf7   : > { %v584_v20 = vpop.f32.mrf.mxu0  ;;  %v842_v21 = vpop.f32.mrf.mxu1 }
  0xf8   : > { %3879 = vmatmul.msk.f32.gmra.mxu2 %vm917_vm1, %v842_v21  ;;  %3913 = vmatmul.msk.f32.gmra.mxu3 %vm917_vm1, %v584_v20 }
  0xfa   : > { %3791 = vmatmul.msk.f32.gmra.mxu0 %vm434_vm0, %v426_v22  ;;  %3859 = vmatmul.msk.f32.gmra.mxu1 %vm434_vm0, %v3825_v23 }
  0xff   : > { %v587_v24 = vpop.f32.mrf.mxu0  ;;  %v845_v25 = vpop.f32.mrf.mxu1 }
 0x100   : > { %3880 = vmatmul.msk.f32.gmra.mxu2 %vm917_vm1, %v845_v25  ;;  %3914 = vmatmul.msk.f32.gmra.mxu3 %vm917_vm1, %v587_v24 }
 0x102   : > { %3792 = vmatmul.msk.f32.gmra.mxu0 %vm434_vm0, %v427_v26  ;;  %3860 = vmatmul.msk.f32.gmra.mxu1 %vm434_vm0, %v3826_v27 }
 0x107   : > { %v590_v28 = vpop.f32.mrf.mxu0  ;;  %v848_v29 = vpop.f32.mrf.mxu1 }
 0x108   : > { %3881 = vmatmul.msk.f32.gmra.mxu2 %vm917_vm1, %v848_v29  ;;  %3915 = vmatmul.msk.f32.gmra.mxu3 %vm917_vm1, %v590_v28 }
 0x10a   : > { %3793 = vmatmul.msk.f32.gmra.mxu0 %vm434_vm0, %v428_v30  ;;  %3861 = vmatmul.msk.f32.gmra.mxu1 %vm434_vm0, %v3827_v31 }
 0x10f   : > { %v593_v32 = vpop.f32.mrf.mxu0  ;;  %v851_v33 = vpop.f32.mrf.mxu1 }
 0x110   : > { %3882 = vmatmul.msk.f32.gmra.mxu2 %vm917_vm1, %v851_v33  ;;  %3916 = vmatmul.msk.f32.gmra.mxu3 %vm917_vm1, %v593_v32 }
 0x112   : > { %3794 = vmatmul.msk.f32.gmra.mxu0 %vm434_vm0, %v429_v34  ;;  %3862 = vmatmul.msk.f32.gmra.mxu1 %vm434_vm0, %v3828_v35 }
 0x117   : > { %v596_v36 = vpop.f32.mrf.mxu0  ;;  %v854_v37 = vpop.f32.mrf.mxu1 }
 0x118   : > { %3883 = vmatmul.msk.f32.gmra.mxu2 %vm917_vm1, %v854_v37  ;;  %3917 = vmatmul.msk.f32.gmra.mxu3 %vm917_vm1, %v596_v36 }
 0x11a   : > { %3795 = vmatmul.msk.f32.gmra.mxu0 %vm434_vm0, %v430_v38  ;;  %3863 = vmatmul.msk.f32.gmra.mxu1 %vm434_vm0, %v3829_v39 }
 0x11f   : > { %v599_v40 = vpop.f32.mrf.mxu0  ;;  %v857_v41 = vpop.f32.mrf.mxu1 }
 0x120   : > { %3884 = vmatmul.msk.f32.gmra.mxu2 %vm917_vm1, %v857_v41  ;;  %3918 = vmatmul.msk.f32.gmra.mxu3 %vm917_vm1, %v599_v40 }
 0x122   : > { %3796 = vmatmul.msk.f32.gmra.mxu0 %vm434_vm0, %v431_v42  ;;  %3864 = vmatmul.msk.f32.gmra.mxu1 %vm434_vm0, %v3830_v43 }
 0x127   : > { %v602_v44 = vpop.f32.mrf.mxu0  ;;  %v860_v45 = vpop.f32.mrf.mxu1 }
 0x128   : > { %3885 = vmatmul.msk.f32.gmra.mxu2 %vm917_vm1, %v860_v45  ;;  %3919 = vmatmul.msk.f32.gmra.mxu3 %vm917_vm1, %v602_v44 }
 0x12a   : > { %3797 = vmatmul.msk.f32.gmra.mxu0 %vm434_vm0, %v432_v46  ;;  %3865 = vmatmul.msk.f32.gmra.mxu1 %vm434_vm0, %v3831_v47 }
 0x12b   : > { %v1037_v48 = vpop.f32.mrf.mxu2  ;;  %v1258_v49 = vpop.f32.mrf.mxu3 }
 0x12c   : > { %v4781_v50 = vadd.f32 %v1258_v49, %v1037_v48 }
 0x12f   : > { %v605_v51 = vpop.f32.mrf.mxu0  ;;  %v863_v52 = vpop.f32.mrf.mxu1 }
 0x130   : > { %3886 = vmatmul.msk.f32.gmra.mxu2 %vm917_vm1, %v863_v52  ;;  %3920 = vmatmul.msk.f32.gmra.mxu3 %vm917_vm1, %v605_v51 }
 0x132   : > { %3798 = vmatmul.msk.f32.gmra.mxu0 %vm434_vm0, %v433_v53  ;;  %3866 = vmatmul.msk.f32.gmra.mxu1 %vm434_vm0, %v3832_v54 }
 0x133   : > { %v1040_v55 = vpop.f32.mrf.mxu2  ;;  %v1261_v56 = vpop.f32.mrf.mxu3 }
 0x134   : > { %v4793_v57 = vadd.f32 %v1261_v56, %v1040_v55 }
 0x137   : > { %v608_v58 = vpop.f32.mrf.mxu0  ;;  %v866_v59 = vpop.f32.mrf.mxu1 }
 0x138   : > { %3887 = vmatmul.msk.f32.gmra.mxu2 %vm917_vm1, %v866_v59  ;;  %3921 = vmatmul.msk.f32.gmra.mxu3 %vm917_vm1, %v608_v58 }
 0x13b   : > { %v1043_v60 = vpop.f32.mrf.mxu2  ;;  %v1264_v61 = vpop.f32.mrf.mxu3 }
 0x13c   : > { %v4797_v62 = vadd.f32 %v1264_v61, %v1043_v60  ;;  %v3937_v60 = vld [vmem:[%s6009_s1 + $0x220] sm:$0xff] }
 0x13f   : > { %v611_v63 = vpop.f32.mrf.mxu0  ;;  %v869_v0 = vpop.f32.mrf.mxu1 }
 0x140   : > { %3888 = vmatmul.msk.f32.gmra.mxu2 %vm917_vm1, %v869_v0  ;;  %3922 = vmatmul.msk.f32.gmra.mxu3 %vm917_vm1, %v611_v63  ;;  %v3938_v63 = vld [vmem:[%s6009_s1 + $0x228] sm:$0xff] }
 0x143   : > { %v1046_v1 = vpop.f32.mrf.mxu2  ;;  %v1267_v2 = vpop.f32.mrf.mxu3 }
 0x144   : > { %v4801_v3 = vadd.f32 %v1267_v2, %v1046_v1  ;;  %v3939_v1 = vld [vmem:[%s6009_s1 + $0x230] sm:$0xff] }
 0x147   : > { %v614_v4 = vpop.f32.mrf.mxu0  ;;  %v872_v5 = vpop.f32.mrf.mxu1 }
 0x148   : > { %3889 = vmatmul.msk.f32.gmra.mxu2 %vm917_vm1, %v872_v5  ;;  %3923 = vmatmul.msk.f32.gmra.mxu3 %vm917_vm1, %v614_v4  ;;  %v3940_v4 = vld [vmem:[%s6009_s1 + $0x238] sm:$0xff] }
 0x14b   : > { %v1049_v6 = vpop.f32.mrf.mxu2  ;;  %v1270_v7 = vpop.f32.mrf.mxu3 }
 0x14c   : > { %v4805_v8 = vadd.f32 %v1270_v7, %v1049_v6  ;;  %v3941_v7 = vld [vmem:[%s6009_s1 + $0x240] sm:$0xff] }
 0x14f   : > { %v617_v9 = vpop.f32.mrf.mxu0  ;;  %v875_v10 = vpop.f32.mrf.mxu1 }
 0x150   : > { %3890 = vmatmul.msk.f32.gmra.mxu2 %vm917_vm1, %v875_v10  ;;  %3924 = vmatmul.msk.f32.gmra.mxu3 %vm917_vm1, %v617_v9 }
 0x153   : > { %v1052_v11 = vpop.f32.mrf.mxu2  ;;  %v1273_v12 = vpop.f32.mrf.mxu3 }
 0x154   : > { %v4809_v13 = vadd.f32 %v1273_v12, %v1052_v11  ;;  %v3942_v11 = vld [vmem:[%s6009_s1 + $0x248] sm:$0xff] }
 0x157   : > { %v620_v14 = vpop.f32.mrf.mxu0  ;;  %v878_v15 = vpop.f32.mrf.mxu1 }
 0x158   : > { %3891 = vmatmul.msk.f32.gmra.mxu2 %vm917_vm1, %v878_v15  ;;  %3925 = vmatmul.msk.f32.gmra.mxu3 %vm917_vm1, %v620_v14  ;;  %v3943_v15 = vld [vmem:[%s6009_s1 + $0x250] sm:$0xff] }
 0x15b   : > { %v1055_v16 = vpop.f32.mrf.mxu2  ;;  %v1276_v17 = vpop.f32.mrf.mxu3 }
 0x15c   : > { %v4813_v18 = vadd.f32 %v1276_v17, %v1055_v16  ;;  %v3944_v17 = vld [vmem:[%s6009_s1 + $0x258] sm:$0xff] }
 0x15f   : > { %v623_v19 = vpop.f32.mrf.mxu0  ;;  %v881_v20 = vpop.f32.mrf.mxu1 }
 0x160   : > { %3892 = vmatmul.msk.f32.gmra.mxu2 %vm917_vm1, %v881_v20  ;;  %3926 = vmatmul.msk.f32.gmra.mxu3 %vm917_vm1, %v623_v19 }
 0x163   : > { %v1058_v21 = vpop.f32.mrf.mxu2  ;;  %v1279_v22 = vpop.f32.mrf.mxu3 }
 0x164   : > { %v4817_v23 = vadd.f32 %v1279_v22, %v1058_v21  ;;  %v3945_v21 = vld [vmem:[%s6009_s1 + $0x260] sm:$0xff] }
 0x167   : > { %v626_v24 = vpop.f32.mrf.mxu0  ;;  %v884_v25 = vpop.f32.mrf.mxu1 }
 0x168   : > { %3893 = vmatmul.msk.f32.gmra.mxu2 %vm917_vm1, %v884_v25  ;;  %3927 = vmatmul.msk.f32.gmra.mxu3 %vm917_vm1, %v626_v24  ;;  %v4006_v25 = vld [vmem:[%s6010_s2 + $0x28] sm:$0xff] }
 0x169   : > { %1735 = vmatpush.msrb.mxu3 %v4006_v25 }
 0x16b   : > { %v1061_v26 = vpop.f32.mrf.mxu2  ;;  %v1282_v27 = vpop.f32.mrf.mxu3 }
 0x16c   : > { %v4821_v28 = vadd.f32 %v1282_v27, %v1061_v26  ;;  %v3946_v26 = vld [vmem:[%s6009_s1 + $0x268] sm:$0xff] }
 0x16f   : > { %v629_v29 = vpop.f32.mrf.mxu0  ;;  %v887_v30 = vpop.f32.mrf.mxu1 }
 0x170   : > { %3894 = vmatmul.msk.f32.gmra.mxu2 %vm917_vm1, %v887_v30  ;;  %3928 = vmatmul.msk.f32.gmra.mxu3 %vm917_vm1, %v629_v29  ;;  %v3947_v30 = vld [vmem:[%s6009_s1 + $0x270] sm:$0xff] }
 0x173   : > { %v1064_v31 = vpop.f32.mrf.mxu2  ;;  %v1285_v32 = vpop.f32.mrf.mxu3 }
 0x174   : > { %v4825_v33 = vadd.f32 %v1285_v32, %v1064_v31 }
 0x177   : > { %v632_v34 = vpop.f32.mrf.mxu0  ;;  %v890_v35 = vpop.f32.mrf.mxu1 }
 0x178   : > { %3895 = vmatmul.msk.f32.gmra.mxu2 %vm917_vm1, %v890_v35  ;;  %3929 = vmatmul.msk.f32.gmra.mxu3 %vm917_vm1, %v632_v34  ;;  %v3948_v34 = vld [vmem:[%s6009_s1 + $0x278] sm:$0xff] }
 0x17b   : > { %v4829_v36 = vpop.f32.mrf.mxu2  ;;  %v4881_v5 = vpop.f32.mrf.mxu3 }
 0x17f   : > { %v635_v37 = vpop.f32.mrf.mxu0  ;;  %v893_v38 = vpop.f32.mrf.mxu1 }
 0x180   : > { %3896 = vmatmul.msk.f32.gmra.mxu2 %vm917_vm1, %v893_v38  ;;  %3930 = vmatmul.msk.f32.gmra.mxu3 %vm917_vm1, %v635_v37  ;;  %v3949_v37 = vld [vmem:[%s6009_s1 + $0x280] sm:$0xff] }
 0x183   : > { %v4833_v39 = vpop.f32.mrf.mxu2  ;;  %v4889_v9 = vpop.f32.mrf.mxu3 }
 0x187   : > { %v638_v40 = vpop.f32.mrf.mxu0  ;;  %v896_v41 = vpop.f32.mrf.mxu1 }
 0x188   : > { %3897 = vmatmul.msk.f32.gmra.mxu2 %vm917_vm1, %v896_v41  ;;  %3931 = vmatmul.msk.f32.gmra.mxu3 %vm917_vm1, %v638_v40  ;;  %v4005_v40 = vld [vmem:[%s6010_s2 + $0x20] sm:$0xff] }
 0x189   : > { %1736 = vmatpush.msrb.mxu3 %v4005_v40 }
 0x18b   : > { %v4837_v42 = vpop.f32.mrf.mxu2  ;;  %v4899_v14 = vpop.f32.mrf.mxu3 }
 0x18f   : > { %v641_v43 = vpop.f32.mrf.mxu0  ;;  %v899_v44 = vpop.f32.mrf.mxu1 }
 0x190   : > { %3898 = vmatmul.msk.f32.gmra.mxu2 %vm917_vm1, %v899_v44  ;;  %3932 = vmatmul.msk.f32.gmra.mxu3 %vm917_vm1, %v641_v43  ;;  %v3950_v43 = vld [vmem:[%s6009_s1 + $0x288] sm:$0xff] }
 0x193   : > { %v4841_v45 = vpop.f32.mrf.mxu2  ;;  %v4910_v19 = vpop.f32.mrf.mxu3 }
 0x197   : > { %v644_v46 = vpop.f32.mrf.mxu0  ;;  %v902_v47 = vpop.f32.mrf.mxu1 }
 0x198   : > { %3899 = vmatmul.msk.f32.gmra.mxu2 %vm917_vm1, %v902_v47  ;;  %3933 = vmatmul.msk.f32.gmra.mxu3 %vm917_vm1, %v644_v46  ;;  %v3951_v47 = vld [vmem:[%s6009_s1 + $0x290] sm:$0xff] }
 0x19b   : > { %v4845_v48 = vpop.f32.mrf.mxu2  ;;  %v4919_v22 = vpop.f32.mrf.mxu3 }
 0x19f   : > { %v647_v49 = vpop.f32.mrf.mxu0  ;;  %v905_v51 = vpop.f32.mrf.mxu1 }
 0x1a0   : > { %3900 = vmatmul.msk.f32.gmra.mxu2 %vm917_vm1, %v905_v51  ;;  %3934 = vmatmul.msk.f32.gmra.mxu3 %vm917_vm1, %v647_v49 }
 0x1a3   : > { %v4849_v52 = vpop.f32.mrf.mxu2  ;;  %v4930_v27 = vpop.f32.mrf.mxu3 }
 0x1a7   : > { %v650_v53 = vpop.f32.mrf.mxu0  ;;  %v908_v54 = vpop.f32.mrf.mxu1 }
 0x1a8   : > { %3901 = vmatmul.msk.f32.gmra.mxu2 %vm917_vm1, %v908_v54  ;;  %3935 = vmatmul.msk.f32.gmra.mxu3 %vm917_vm1, %v650_v53  ;;  %v3952_v53 = vld [vmem:[%s6009_s1 + $0x298] sm:$0xff] }
 0x1ab   : > { %v4853_v55 = vpop.f32.mrf.mxu2  ;;  %v4940_v32 = vpop.f32.mrf.mxu3 }
 0x1af   : > { %v653_v56 = vpop.f32.mrf.mxu0  ;;  %v911_v58 = vpop.f32.mrf.mxu1 }
 0x1b0   : > { %3902 = vmatmul.msk.f32.gmra.mxu2 %vm917_vm1, %v911_v58  ;;  %3936 = vmatmul.msk.f32.gmra.mxu3 %vm917_vm1, %v653_v56  ;;  %v3953_v58 = vld [vmem:[%s6009_s1 + $0x2a0] sm:$0xff] }
 0x1b3   : > { %v4857_v59 = vpop.f32.mrf.mxu2  ;;  %v4951_v38 = vpop.f32.mrf.mxu3 }
 0x1b8   : > { %3971 = vmatmul.msk.f32.vlgmr.msrb.gmra.mxu2 %vm434_vm0, %v3937_v60 }
 0x1bb   : > { %v4863_v61 = vpop.f32.mrf.mxu2  ;;  %v4963_v44 = vpop.f32.mrf.mxu3 }
 0x1c0   : > { %3972 = vmatmul.msk.f32.gmra.mxu2 %vm434_vm0, %v3938_v63  ;;  %v3954_v63 = vld [vmem:[%s6009_s1 + $0x2a8] sm:$0xff] }
 0x1c3   : > { %v4869_v0 = vpop.f32.mrf.mxu2  ;;  %v4971_v49 = vpop.f32.mrf.mxu3 }
 0x1c8   : > { %3973 = vmatmul.msk.f32.gmra.mxu2 %vm434_vm0, %v3939_v1 }
 0x1cb   : > { %v4875_v2 = vpop.f32.mrf.mxu2  ;;  %v4981_v56 = vpop.f32.mrf.mxu3 }
 0x1d0   : > { %3974 = vmatmul.msk.f32.gmra.mxu2 %vm434_vm0, %v3940_v4 }
 0x1d3   : > { %v4883_v6 = vpop.f32.mrf.mxu2  ;;  %v4991_v1 = vpop.f32.mrf.mxu3 }
 0x1d8   : > { %3975 = vmatmul.msk.f32.gmra.mxu2 %vm434_vm0, %v3941_v7  ;;  %v3955_v7 = vld [vmem:[%s6009_s1 + $0x2b0] sm:$0xff] }
 0x1db   : > { %v4891_v10 = vpop.f32.mrf.mxu2 }
 0x1e0   : > { %3976 = vmatmul.msk.f32.gmra.mxu2 %vm434_vm0, %v3942_v11  ;;  %v4999_v11 = vpop.f32.mrf.mxu3 }
 0x1e3   : > { %v4897_v12 = vpop.f32.mrf.mxu2 }
 0x1e8   : > { %3977 = vmatmul.msk.f32.gmra.mxu2 %vm434_vm0, %v3943_v15 }
 0x1eb   : > { %v4905_v16 = vpop.f32.mrf.mxu2 }
 0x1f0   : > { %3978 = vmatmul.msk.f32.gmra.mxu2 %vm434_vm0, %v3944_v17  ;;  %v3956_v17 = vld [vmem:[%s6009_s1 + $0x2b8] sm:$0xff] }
 0x1f3   : > { %v4913_v20 = vpop.f32.mrf.mxu2 }
 0x1f4   : > { %6032 = vst [vmem:[#allocation5_spill] sm:$0xff] %v4913_v20 }
 0x1f8   : > { %3979 = vmatmul.msk.f32.gmra.mxu2 %vm434_vm0, %v3945_v21  ;;  %v5006_v21 = vpop.f32.mrf.mxu3 }
 0x1fb   : > { %v4921_v24 = vpop.f32.mrf.mxu2 }
 0x1fc   : > { %6033 = vst [vmem:[#allocation6_spill] sm:$0xff] %v4921_v24 }
 0x200   : > { %3980 = vmatmul.msk.f32.gmra.mxu2 %vm434_vm0, %v3946_v26  ;;  %v3957_v26 = vld [vmem:[%s6009_s1 + $0x2c0] sm:$0xff] }
 0x203   : > { %v4932_v29 = vpop.f32.mrf.mxu2 }
 0x208   : > { %3981 = vmatmul.msk.f32.gmra.mxu2 %vm434_vm0, %v3947_v30 }
 0x20b   : > { %v4938_v31 = vpop.f32.mrf.mxu2 }
 0x210   : > { %3982 = vmatmul.msk.f32.gmra.mxu2 %vm434_vm0, %v3948_v34  ;;  %v5014_v34 = vpop.f32.mrf.mxu3 }
 0x213   : > { %v4946_v35 = vpop.f32.mrf.mxu2 }
 0x218   : > { %3983 = vmatmul.msk.f32.gmra.mxu2 %vm434_vm0, %v3949_v37  ;;  %v3958_v37 = vld [vmem:[%s6009_s1 + $0x2c8] sm:$0xff] }
 0x21b   : > { %v4957_v41 = vpop.f32.mrf.mxu2 }
 0x220   : > { %3984 = vmatmul.msk.f32.gmra.mxu2 %vm434_vm0, %v3950_v43  ;;  %v3959_v43 = vld [vmem:[%s6009_s1 + $0x2d0] sm:$0xff] }
 0x223   : > { %v4965_v46 = vpop.f32.mrf.mxu2 }
 0x228   : > { %3985 = vmatmul.msk.f32.gmra.mxu2 %vm434_vm0, %v3951_v47  ;;  %v5024_v47 = vpop.f32.mrf.mxu3 }
 0x229   : > { %6036 = vst [vmem:[#allocation9_spill] sm:$0xff] %v5024_v47 }
 0x22b   : > { %v4973_v51 = vpop.f32.mrf.mxu2 }
 0x22c   : > { %6034 = vst [vmem:[#allocation7_spill] sm:$0xff] %v4973_v51 }
 0x230   : > { %3986 = vmatmul.msk.f32.gmra.mxu2 %vm434_vm0, %v3952_v53 }
 0x233   : > { %v4979_v54 = vpop.f32.mrf.mxu2 }
 0x234   : > { %6035 = vst [vmem:[#allocation8_spill] sm:$0xff] %v4979_v54 }
 0x238   : > { %3987 = vmatmul.msk.f32.gmra.mxu2 %vm434_vm0, %v3953_v58  ;;  %v3960_v58 = vld [vmem:[%s6009_s1 + $0x2d8] sm:$0xff] }
 0x23b   : > { %v1514_v60 = vpop.f32.mrf.mxu2 }
 0x23c   : > { %4007 = vmatmul.msk.f32.vlgmr.msrb.gmra.mxu3 %vm917_vm1, %v1514_v60  ;;  %v5032_v60 = vpop.f32.mrf.mxu3 }
 0x23d   : > { %6037 = vst [vmem:[#allocation10_spill] sm:$0xff] %v5032_v60 }
 0x240   : > { %3988 = vmatmul.msk.f32.gmra.mxu2 %vm434_vm0, %v3954_v63 }
 0x243   : > { %v1517_v4 = vpop.f32.mrf.mxu2 }
 0x244   : > { %4008 = vmatmul.msk.f32.gmra.mxu3 %vm917_vm1, %v1517_v4  ;;  %v3961_v4 = vld [vmem:[%s6009_s1 + $0x2e0] sm:$0xff] }
 0x248   : > { %3989 = vmatmul.msk.f32.gmra.mxu2 %vm434_vm0, %v3955_v7  ;;  %v5039_v7 = vpop.f32.mrf.mxu3 }
 0x24b   : > { %v1520_v15 = vpop.f32.mrf.mxu2 }
 0x24c   : > { %4009 = vmatmul.msk.f32.gmra.mxu3 %vm917_vm1, %v1520_v15 }
 0x250   : > { %3990 = vmatmul.msk.f32.gmra.mxu2 %vm434_vm0, %v3956_v17  ;;  %v3962_v17 = vld [vmem:[%s6009_s1 + $0x2e8] sm:$0xff] }
 0x253   : > { %v1523_v25 = vpop.f32.mrf.mxu2 }
 0x254   : > { %4010 = vmatmul.msk.f32.gmra.mxu3 %vm917_vm1, %v1523_v25 }
 0x258   : > { %3991 = vmatmul.msk.f32.gmra.mxu2 %vm434_vm0, %v3957_v26  ;;  %v5047_v26 = vpop.f32.mrf.mxu3 }
 0x25b   : > { %v1526_v30 = vpop.f32.mrf.mxu2 }
 0x25c   : > { %4011 = vmatmul.msk.f32.gmra.mxu3 %vm917_vm1, %v1526_v30  ;;  %v3963_v30 = vld [vmem:[%s6009_s1 + $0x2f0] sm:$0xff] }
 0x260   : > { %3992 = vmatmul.msk.f32.gmra.mxu2 %vm434_vm0, %v3958_v37 }
 0x263   : > { %v1529_v40 = vpop.f32.mrf.mxu2 }
 0x264   : > { %4012 = vmatmul.msk.f32.gmra.mxu3 %vm917_vm1, %v1529_v40  ;;  %v3964_v40 = vld [vmem:[%s6009_s1 + $0x2f8] sm:$0xff] }
 0x268   : > { %3993 = vmatmul.msk.f32.gmra.mxu2 %vm434_vm0, %v3959_v43  ;;  %v5057_v43 = vpop.f32.mrf.mxu3 }
 0x26b   : > { %v1532_v53 = vpop.f32.mrf.mxu2 }
 0x26c   : > { %4013 = vmatmul.msk.f32.gmra.mxu3 %vm917_vm1, %v1532_v53 }
 0x270   : > { %3994 = vmatmul.msk.f32.gmra.mxu2 %vm434_vm0, %v3960_v58  ;;  %v3965_v58 = vld [vmem:[%s6009_s1 + $0x300] sm:$0xff] }
 0x273   : > { %v1535_v63 = vpop.f32.mrf.mxu2 }
 0x274   : > { %4014 = vmatmul.msk.f32.gmra.mxu3 %vm917_vm1, %v1535_v63  ;;  %v5065_v63 = vpop.f32.mrf.mxu3 }
 0x278   : > { %3995 = vmatmul.msk.f32.gmra.mxu2 %vm434_vm0, %v3961_v4 }
 0x27b   : > { %v1538_v15 = vpop.f32.mrf.mxu2 }
 0x27c   : > { %4015 = vmatmul.msk.f32.gmra.mxu3 %vm917_vm1, %v1538_v15  ;;  %v3966_v15 = vld [vmem:[%s6009_s1 + $0x308] sm:$0xff] }
 0x280   : > { %3996 = vmatmul.msk.f32.gmra.mxu2 %vm434_vm0, %v3962_v17  ;;  %v5072_v17 = vpop.f32.mrf.mxu3 }
 0x283   : > { %v1541_v25 = vpop.f32.mrf.mxu2 }
 0x284   : > { %4016 = vmatmul.msk.f32.gmra.mxu3 %vm917_vm1, %v1541_v25 }
 0x288   : > { %3997 = vmatmul.msk.f32.gmra.mxu2 %vm434_vm0, %v3963_v30  ;;  %v3967_v30 = vld [vmem:[%s6009_s1 + $0x310] sm:$0xff] }
 0x28b   : > { %v1544_v37 = vpop.f32.mrf.mxu2 }
 0x28c   : > { %4017 = vmatmul.msk.f32.gmra.mxu3 %vm917_vm1, %v1544_v37 }
 0x290   : > { %3998 = vmatmul.msk.f32.gmra.mxu2 %vm434_vm0, %v3964_v40  ;;  %v5080_v40 = vpop.f32.mrf.mxu3 }
 0x291   : > { %6038 = vst [vmem:[#allocation11_spill] sm:$0xff] %v5080_v40 }
 0x293   : > { %v1547_v53 = vpop.f32.mrf.mxu2 }
 0x294   : > { %4018 = vmatmul.msk.f32.gmra.mxu3 %vm917_vm1, %v1547_v53  ;;  %v3968_v53 = vld [vmem:[%s6009_s1 + $0x318] sm:$0xff] }
 0x298   : > { %3999 = vmatmul.msk.f32.gmra.mxu2 %vm434_vm0, %v3965_v58 }
 0x29b   : > { %v1550_v4 = vpop.f32.mrf.mxu2 }
 0x29c   : > { %4019 = vmatmul.msk.f32.gmra.mxu3 %vm917_vm1, %v1550_v4  ;;  %v3969_v4 = vld [vmem:[%s6009_s1 + $0x320] sm:$0xff] }
 0x2a0   : > { %4000 = vmatmul.msk.f32.gmra.mxu2 %vm434_vm0, %v3966_v15  ;;  %v5090_v15 = vpop.f32.mrf.mxu3 }
 0x2a1   : > { %6039 = vst [vmem:[#allocation12_spill] sm:$0xff] %v5090_v15 }
 0x2a3   : > { %v1553_v25 = vpop.f32.mrf.mxu2 }
 0x2a4   : > { %4020 = vmatmul.msk.f32.gmra.mxu3 %vm917_vm1, %v1553_v25 }
 0x2a8   : > { %4001 = vmatmul.msk.f32.gmra.mxu2 %vm434_vm0, %v3967_v30  ;;  %v3970_v30 = vld [vmem:[%s6009_s1 + $0x328] sm:$0xff] }
 0x2ab   : > { %v1556_v37 = vpop.f32.mrf.mxu2 }
 0x2ac   : > { %4021 = vmatmul.msk.f32.gmra.mxu3 %vm917_vm1, %v1556_v37 }
 0x2b0   : > { %4002 = vmatmul.msk.f32.gmra.mxu2 %vm434_vm0, %v3968_v53 }
 0x2b3   : > { %v1559_v58 = vpop.f32.mrf.mxu2 }
 0x2b4   : > { %4022 = vmatmul.msk.f32.gmra.mxu3 %vm917_vm1, %v1559_v58 }
 0x2b8   : > { %4003 = vmatmul.msk.f32.gmra.mxu2 %vm434_vm0, %v3969_v4 }
 0x2bb   : > { %v1562_v25 = vpop.f32.mrf.mxu2 }
 0x2bc   : > { %4023 = vmatmul.msk.f32.gmra.mxu3 %vm917_vm1, %v1562_v25 }
 0x2bf   : > { %v1738_v37 = vpop.f32.mrf.mxu3 }
 0x2c0   : > { %v5098_v53 = vadd.f32 %v1738_v37, %v4781_v50  ;;  %4004 = vmatmul.msk.f32.gmra.mxu2 %vm434_vm0, %v3970_v30 }
 0x2c3   : > { %v1565_v58 = vpop.f32.mrf.mxu2 }
 0x2c4   : > { %4024 = vmatmul.msk.f32.gmra.mxu3 %vm917_vm1, %v1565_v58 }
 0x2c7   : > { %v1741_v40 = vpop.f32.mrf.mxu3 }
 0x2c8   : > { %v5103_v51 = vadd.f32 %v1741_v40, %v4793_v57 }
 0x2cb   : > { %v1568_v4 = vpop.f32.mrf.mxu2 }
 0x2cc   : > { %4025 = vmatmul.msk.f32.gmra.mxu3 %vm917_vm1, %v1568_v4 }
 0x2cf   : > { %v1744_v25 = vpop.f32.mrf.mxu3 }
 0x2d0   : > { %v5107_v15 = vadd.f32 %v1744_v25, %v4797_v62 }
 0x2d3   : > { %v1571_v54 = vpop.f32.mrf.mxu2 }
 0x2d4   : > { %4026 = vmatmul.msk.f32.gmra.mxu3 %vm917_vm1, %v1571_v54 }
 0x2d7   : > { %v1747_v50 = vpop.f32.mrf.mxu3 }
 0x2d8   : > { %v5111_v30 = vadd.f32 %v1747_v50, %v4801_v3 }
 0x2db   : > { %v1574_v37 = vpop.f32.mrf.mxu2 }
 0x2dc   : > { %4027 = vmatmul.msk.f32.gmra.mxu3 %vm917_vm1, %v1574_v37 }
 0x2df   : > { %v1750_v58 = vpop.f32.mrf.mxu3 }
 0x2e0   : > { %v5115_v57 = vadd.f32 %v1750_v58, %v4805_v8 }
 0x2e3   : > { %v1577_v40 = vpop.f32.mrf.mxu2 }
 0x2e4   : > { %4028 = vmatmul.msk.f32.gmra.mxu3 %vm917_vm1, %v1577_v40 }
 0x2e7   : > { %v1753_v4 = vpop.f32.mrf.mxu3 }
 0x2e8   : > { %v5119_v62 = vadd.f32 %v1753_v4, %v4809_v13 }
 0x2eb   : > { %v1580_v25 = vpop.f32.mrf.mxu2 }
 0x2ec   : > { %4029 = vmatmul.msk.f32.gmra.mxu3 %vm917_vm1, %v1580_v25 }
 0x2ef   : > { %v1756_v54 = vpop.f32.mrf.mxu3 }
 0x2f0   : > { %v5123_v3 = vadd.f32 %v1756_v54, %v4813_v18 }
 0x2f3   : > { %v1583_v50 = vpop.f32.mrf.mxu2 }
 0x2f4   : > { %4030 = vmatmul.msk.f32.gmra.mxu3 %vm917_vm1, %v1583_v50 }
 0x2f7   : > { %v1759_v37 = vpop.f32.mrf.mxu3 }
 0x2f8   : > { %v5127_v8 = vadd.f32 %v1759_v37, %v4817_v23 }
 0x2fb   : > { %v1586_v58 = vpop.f32.mrf.mxu2 }
 0x2fc   : > { %4031 = vmatmul.msk.f32.gmra.mxu3 %vm917_vm1, %v1586_v58 }
 0x2ff   : > { %v1762_v40 = vpop.f32.mrf.mxu3 }
 0x300   : > { %v5131_v13 = vadd.f32 %v1762_v40, %v4821_v28 }
 0x303   : > { %v1589_v4 = vpop.f32.mrf.mxu2 }
 0x304   : > { %4032 = vmatmul.msk.f32.gmra.mxu3 %vm917_vm1, %v1589_v4 }
 0x307   : > { %v1765_v25 = vpop.f32.mrf.mxu3 }
 0x30b   : > { %v1592_v18 = vpop.f32.mrf.mxu2 }
 0x30c   : > { %4033 = vmatmul.msk.f32.gmra.mxu3 %vm917_vm1, %v1592_v18  ;;  %v1304_v18 = vadd.f32 %v4930_v27, %v4849_v52 }
 0x30f   : > { %v1768_v54 = vpop.f32.mrf.mxu3 }
 0x313   : > { %v1595_v50 = vpop.f32.mrf.mxu2 }
 0x314   : > { %4034 = vmatmul.msk.f32.gmra.mxu3 %vm917_vm1, %v1595_v50  ;;  %v1301_v50 = vadd.f32 %v4919_v22, %v4845_v48  ;;  %v1307_v22 = vadd.f32 %v4940_v32, %v4853_v55 }
 0x317   : > { %v1771_v23 = vpop.f32.mrf.mxu3 }
 0x31b   : > { %v1598_v37 = vpop.f32.mrf.mxu2 }
 0x31c   : > { %4035 = vmatmul.msk.f32.gmra.mxu3 %vm917_vm1, %v1598_v37 }
 0x31f   : > { %v1774_v58 = vpop.f32.mrf.mxu3 }
 0x323   : > { %v1601_v47 = vpop.f32.mrf.mxu2 }
 0x324   : > { %4036 = vmatmul.msk.f32.gmra.mxu3 %vm917_vm1, %v1601_v47  ;;  %v1298_v47 = vadd.f32 %v4910_v19, %v4841_v45  ;;  %v1292_v45 = vadd.f32 %v4889_v9, %v4833_v39 }
 0x327   : > { %v1777_v28 = vpop.f32.mrf.mxu3 }
 0x328   : > { %v5155_v52 = vadd.f32 %v1777_v28, %v1298_v47  ;;  %v1947_v47 = vmul.f32 %v5119_v62, %v5119_v62 }
 0x32a   : > { %v1955_v39 = vmul.f32 %v5155_v52, %v5155_v52 }
 0x32b   : > { %v1604_v40 = vpop.f32.mrf.mxu2 }
 0x32c   : > { %4037 = vmatmul.msk.f32.gmra.mxu3 %vm917_vm1, %v1604_v40 }
 0x32f   : > { %v1780_v4 = vpop.f32.mrf.mxu3 }
 0x330   : > { %v5148_v24 = vadd.f32 %v1780_v4, %v1301_v50  ;;  %v1950_v4 = vmul.f32 %v5131_v13, %v5131_v13 }
 0x332   : > { %v1956_v19 = vmul.f32 %v5148_v24, %v5148_v24 }
 0x333   : > { %v1607_v20 = vpop.f32.mrf.mxu2 }
 0x334   : > { %4038 = vmatmul.msk.f32.gmra.mxu3 %vm917_vm1, %v1607_v20  ;;  %v1295_v20 = vadd.f32 %v4899_v14, %v4837_v42  ;;  %v1289_v42 = vadd.f32 %v4881_v5, %v4829_v36  ;;  %v5170_v14 = vadd.f32 %v1771_v23, %v1292_v45  ;;  %v5183_v36 = vadd.f32 %v1765_v25, %v4825_v33 }
 0x335   : > { %v1310_v23 = vadd.f32 %v4951_v38, %v4857_v59  ;;  %v1949_v59 = vmul.f32 %v5127_v8, %v5127_v8  ;;  %v1948_v38 = vmul.f32 %v5123_v3, %v5123_v3 }
 0x336   : > { %v5161_v48 = vadd.f32 %v1774_v58, %v1295_v20  ;;  %v5177_v58 = vadd.f32 %v1768_v54, %v1289_v42  ;;  %v1953_v32 = vmul.f32 %v5170_v14, %v5170_v14  ;;  %v1951_v25 = vmul.f32 %v5183_v36, %v5183_v36 }
 0x337   : > { %v1783_v60 = vpop.f32.mrf.mxu3  ;;  %v1946_v20 = vmul.f32 %v5115_v57, %v5115_v57  ;;  %v1942_v42 = vmul.f32 %v5098_v53, %v5098_v53 }
 0x338   : > { %v5144_v37 = vadd.f32 %v1783_v60, %v1304_v18  ;;  %v1954_v55 = vmul.f32 %v5161_v48, %v5161_v48  ;;  %v1952_v54 = vmul.f32 %v5177_v58, %v5177_v58  ;;  %v1313_v18 = vadd.f32 %v4963_v44, %v4863_v61 }
 0x339   : > { %v1945_v61 = vmul.f32 %v5111_v30, %v5111_v30  ;;  %v1944_v44 = vmul.f32 %v5107_v15, %v5107_v15 }
 0x33a   : > { %1880 = vmatpush.msrb.mxu0 %v5144_v37  ;;  %v1957_v40 = vmul.f32 %v5144_v37, %v5144_v37 }
 0x33b   : > { %v1610_v27 = vpop.f32.mrf.mxu2 }
 0x33c   : > { %4039 = vmatmul.msk.f32.gmra.mxu3 %vm917_vm1, %v1610_v27  ;;  %1881 = vmatpush.msrb.mxu0 %v5148_v24  ;;  %v1316_v27 = vadd.f32 %v4971_v49, %v4869_v0 }
 0x33d   : > { %1976 = vmatpush.msrb.mxu1 %v1957_v40 }
 0x33e   : > { %1882 = vmatpush.msrb.mxu0 %v5155_v52 }
 0x33f   : > { %1977 = vmatpush.msrb.mxu1 %v1956_v19  ;;  %v1786_v60 = vpop.f32.mrf.mxu3  ;;  %v1943_v19 = vmul.f32 %v5103_v51, %v5103_v51 }
 0x340   : > { %v5174_v9 = vadd.f32 %v1786_v60, %v1307_v22  ;;  %1883 = vmatpush.msrb.mxu0 %v5161_v48  ;;  %v1319_v60 = vadd.f32 %v4981_v56, %v4875_v2  ;;  %v1331_v56 = vadd.f32 %v5014_v34, %v4905_v16 }
 0x341   : > { %1978 = vmatpush.msrb.mxu1 %v1955_v39  ;;  %v1322_v39 = vadd.f32 %v4991_v1, %v4883_v6 }
 0x342   : > { %1884 = vmatpush.msrb.mxu0 %v5170_v14 }
 0x343   : > { %1979 = vmatpush.msrb.mxu1 %v1954_v55  ;;  %v1613_v5 = vpop.f32.mrf.mxu2 }
 0x344   : > { %4040 = vmatmul.msk.f32.gmra.mxu3 %vm917_vm1, %v1613_v5  ;;  %1885 = vmatpush.msrb.mxu0 %v5177_v58 }
 0x345   : > { %1980 = vmatpush.msrb.mxu1 %v1953_v32  ;;  %v1325_v32 = vadd.f32 %v4999_v11, %v4891_v10 }
 0x346   : > { %1886 = vmatpush.msrb.mxu0 %v5183_v36 }
 0x347   : > { %1981 = vmatpush.msrb.mxu1 %v1952_v54  ;;  %v1789_v33 = vpop.f32.mrf.mxu3 }
 0x348   : > { %v5196_v28 = vadd.f32 %v1789_v33, %v1310_v23  ;;  %1887 = vmatpush.msrb.mxu0 %v5131_v13  ;;  %v1328_v33 = vadd.f32 %v5006_v21, %v4897_v12  ;;  %v1352_v12 = vadd.f32 %v5072_v17, %v4965_v46 }
 0x349   : > { %1982 = vmatpush.msrb.mxu1 %v1951_v25 }
 0x34a   : > { %1888 = vmatpush.msrb.mxu0 %v5127_v8 }
 0x34b   : > { %1983 = vmatpush.msrb.mxu1 %v1950_v4 }
 0x34c   : > { %1889 = vmatpush.msrb.mxu0 %v5123_v3 }
 0x34d   : > { %1984 = vmatpush.msrb.mxu1 %v1949_v59 }
 0x34e   : > { %1890 = vmatpush.msrb.mxu0 %v5119_v62 }
 0x34f   : > { %1985 = vmatpush.msrb.mxu1 %v1948_v38  ;;  %v1792_v50 = vpop.f32.mrf.mxu3 }
 0x350   : > { %v5212_v40 = vadd.f32 %v1792_v50, %v1313_v18  ;;  %1891 = vmatpush.msrb.mxu0 %v5115_v57  ;;  %v1349_v50 = vadd.f32 %v5065_v63, %v4957_v41 }
 0x351   : > { %1986 = vmatpush.msrb.mxu1 %v1947_v47  ;;  %v1346_v47 = vadd.f32 %v5057_v43, %v4946_v35  ;;  %v1340_v35 = vadd.f32 %v5039_v7, %v4932_v29  ;;  %v6050_v43 = vld [vmem:[#allocation10_spill] sm:$0xff]  ;;  %v6052_v7 = vld [vmem:[#allocation5_spill] sm:$0xff] }
 0x352   : > { %1892 = vmatpush.msrb.mxu0 %v5111_v30 }
 0x353   : > { %1987 = vmatpush.msrb.mxu1 %v1946_v20  ;;  %v1874_v20 = vld [vmem:[%s6011_s3] sm:$0xff] }
 0x354   : > { %1893 = vmatpush.msrb.mxu0 %v5107_v15 }
 0x355   : > { %1988 = vmatpush.msrb.mxu1 %v1945_v61  ;;  %v1343_v61 = vadd.f32 %v5047_v26, %v4938_v31  ;;  %v6049_v26 = vld [vmem:[#allocation6_spill] sm:$0xff] }
 0x356   : > { %1894 = vmatpush.msrb.mxu0 %v5103_v51  ;;  %v1337_v63 = vadd.f32 %v6050_v43, %v6049_v26  ;;  %v1958_v26 = vmul.f32 %v5174_v9, %v5174_v9 }
 0x357   : > { %1989 = vmatpush.msrb.mxu1 %v1944_v44  ;;  %v1795_v45 = vpop.f32.mrf.mxu3 }
 0x358   : > { %v5228_v22 = vadd.f32 %v1795_v45, %v1316_v27  ;;  %1895 = vmatpush.msrb.mxu0 %v5098_v53  ;;  %v6053_v45 = vld [vmem:[#allocation9_spill] sm:$0xff] }
 0x359   : > { %1990 = vmatpush.msrb.mxu1 %v1943_v19  ;;  %1896 = vmatmul.f32.vlgmr.msrb.gmra.mxu0 %v1874_v20  ;;  %v1334_v19 = vadd.f32 %v6053_v45, %v6052_v7 }
 0x35b   : > { %1991 = vmatpush.msrb.mxu1 %v1942_v42 }
 0x35c   : > { %1992 = vmatmul.f32.vlgmr.msrb.gmra.mxu1 %v1874_v20  ;;  %v1961_v20 = vmul.f32 %v5228_v22, %v5228_v22 }
 0x35f   : > { %v1798_v0 = vpop.f32.mrf.mxu3 }
 0x360   : > { %v5235_v49 = vadd.f32 %v1798_v0, %v1319_v60 }
 0x362   : > { %6040 = vst [vmem:[#allocation13_spill] sm:$0xff] %v5235_v49 }
 0x367   : > { %v1801_v55 = vpop.f32.mrf.mxu3 }
 0x368   : > { %v5239_v5 = vadd.f32 %v1801_v55, %v1322_v39 }
 0x36a   : > { %6041 = vst [vmem:[#allocation14_spill] sm:$0xff] %v5239_v5 }
 0x36f   : > { %v1804_v54 = vpop.f32.mrf.mxu3 }
 0x370   : > { %v5243_v23 = vadd.f32 %v1804_v54, %v1325_v32  ;;  %v6056_v32 = vld [vmem:[#allocation8_spill] sm:$0xff] }
 0x371   : > { %v6057_v54 = vld [vmem:[#allocation12_spill] sm:$0xff] }
 0x372   : > { %6042 = vst [vmem:[#allocation15_spill] sm:$0xff] %v5243_v23 }
 0x377   : > { %v1807_v25 = vpop.f32.mrf.mxu3 }
 0x378   : > { %v5247_v2 = vadd.f32 %v1807_v25, %v1328_v33  ;;  %v1358_v33 = vadd.f32 %v6057_v54, %v6056_v32 }
 0x37a   : > { %6043 = vst [vmem:[#allocation16_spill] sm:$0xff] %v5247_v2 }
 0x37f   : > { %v1810_v4 = vpop.f32.mrf.mxu3 }
 0x380   : > { %v5251_v6 = vadd.f32 %v1810_v4, %v1331_v56  ;;  %v6058_v4 = vld [vmem:[#allocation7_spill] sm:$0xff] }
 0x382   : > { %6044 = vst [vmem:[#allocation17_spill] sm:$0xff] %v5251_v6 }
 0x387   : > { %v1813_v1 = vpop.f32.mrf.mxu3 }
 0x388   : > { %v5294_v0 = vadd.f32 %v1813_v1, %v1334_v19  ;;  %v6059_v1 = vld [vmem:[#allocation11_spill] sm:$0xff] }
 0x38a   : > { %6055 = vst [vmem:[#allocation5_spill] sm:$0xff] %v5294_v0  ;;  %v1967_v25 = vmul.f32 %v5294_v0, %v5294_v0 }
 0x38f   : > { %v1816_v59 = vpop.f32.mrf.mxu3 }
 0x390   : > { %v5289_v42 = vadd.f32 %v1816_v59, %v1337_v63  ;;  %v1355_v59 = vadd.f32 %v6059_v1, %v6058_v4 }
 0x392   : > { %6054 = vst [vmem:[#allocation10_spill] sm:$0xff] %v5289_v42  ;;  %v1968_v55 = vmul.f32 %v5289_v42, %v5289_v42 }
 0x397   : > { %v1819_v38 = vpop.f32.mrf.mxu3 }
 0x398   : > { %v5282_v17 = vadd.f32 %v1819_v38, %v1340_v35  ;;  %v1959_v35 = vmul.f32 %v5196_v28, %v5196_v28 }
 0x39a   : > { %6051 = vst [vmem:[#allocation6_spill] sm:$0xff] %v5282_v17  ;;  %v1969_v39 = vmul.f32 %v5282_v17, %v5282_v17 }
 0x39f   : > { %v1822_v18 = vpop.f32.mrf.mxu3 }
 0x3a0   : > { %v5275_v46 = vadd.f32 %v1822_v18, %v1343_v61  ;;  %v1966_v18 = vmul.f32 %v5251_v6, %v5251_v6  ;;  %v1960_v61 = vmul.f32 %v5212_v40, %v5212_v40 }
 0x3a2   : > { %6048 = vst [vmem:[#allocation21_spill] sm:$0xff] %v5275_v46  ;;  %v1970_v60 = vmul.f32 %v5275_v46, %v5275_v46 }
 0x3a7   : > { %v1825_v10 = vpop.f32.mrf.mxu3 }
 0x3a8   : > { %v5268_v44 = vadd.f32 %v1825_v10, %v1346_v47  ;;  %v1962_v47 = vmul.f32 %v5235_v49, %v5235_v49 }
 0x3aa   : > { %6047 = vst [vmem:[#allocation20_spill] sm:$0xff] %v5268_v44  ;;  %v1971_v27 = vmul.f32 %v5268_v44, %v5268_v44 }
 0x3af   : > { %v1828_v11 = vpop.f32.mrf.mxu3 }
 0x3b0   : > { %v5259_v16 = vadd.f32 %v1828_v11, %v1349_v50  ;;  %v1876_v11 = vld [vmem:[%s6011_s3 + $0x10] sm:$0xff]  ;;  %v1965_v50 = vmul.f32 %v5247_v2, %v5247_v2 }
 0x3b2   : > { %6045 = vst [vmem:[#allocation18_spill] sm:$0xff] %v5259_v16  ;;  %v1972_v31 = vmul.f32 %v5259_v16, %v5259_v16 }
 0x3b7   : > { %v1831_v21 = vpop.f32.mrf.mxu3 }
 0x3b8   : > { %v5261_v34 = vadd.f32 %v1831_v21, %v1352_v12  ;;  %v1964_v12 = vmul.f32 %v5243_v23, %v5243_v23  ;;  %v1963_v21 = vmul.f32 %v5239_v5, %v5239_v5 }
 0x3ba   : > { %6046 = vst [vmem:[#allocation19_spill] sm:$0xff] %v5261_v34  ;;  %v1973_v41 = vmul.f32 %v5261_v34, %v5261_v34  ;;  %1900 = vmatpush.msra.mxu3 %v5261_v34 }
 0x3bc   : > { %1901 = vmatpush.msra.mxu3 %v5259_v16  ;;  %1996 = vmatpush.msra.mxu2 %v1973_v41  ;;  %v1875_v41 = vld [vmem:[%s6011_s3 + $0x8] sm:$0xff] }
 0x3be   : > { %1902 = vmatpush.msra.mxu3 %v5268_v44  ;;  %1997 = vmatpush.msra.mxu2 %v1972_v31 }
 0x3bf   : > { %v1834_v29 = vpop.f32.mrf.mxu3 }
 0x3c0   : > { %1903 = vmatpush.msra.mxu3 %v5275_v46  ;;  %1998 = vmatpush.msra.mxu2 %v1971_v27  ;;  %v5314_v10 = vadd.f32 %v1834_v29, %v1355_v59 }
 0x3c2   : > { %1904 = vmatpush.msra.mxu3 %v5282_v17  ;;  %1999 = vmatpush.msra.mxu2 %v1970_v60  ;;  %6061 = vst [vmem:[#allocation8_spill] sm:$0xff] %v5314_v10  ;;  %v1974_v43 = vmul.f32 %v5314_v10, %v5314_v10 }
 0x3c4   : > { %1905 = vmatpush.msra.mxu3 %v5289_v42  ;;  %2000 = vmatpush.msra.mxu2 %v1969_v39 }
 0x3c6   : > { %1906 = vmatpush.msra.mxu3 %v5294_v0  ;;  %2001 = vmatpush.msra.mxu2 %v1968_v55 }
 0x3c7   : > { %v1837_v56 = vpop.f32.mrf.mxu3 }
 0x3c8   : > { %v5309_v38 = vadd.f32 %v1837_v56, %v1358_v33  ;;  %1907 = vmatpush.msra.mxu3 %v5251_v6  ;;  %2002 = vmatpush.msra.mxu2 %v1967_v25  ;;  %v2042_v25 = vld [vmem:[%s6012_s4] sm:$0xff]  ;;  %v2075_v56 = vld [vmem:[%s6012_s4 + $0x108] sm:$0xff] }
 0x3ca   : > { %6060 = vst [vmem:[#allocation9_spill] sm:$0xff] %v5309_v38  ;;  %1908 = vmatpush.msra.mxu3 %v5247_v2  ;;  %1934 = vmatpush.msra.mxu0 %v5309_v38  ;;  %v1975_v31 = vmul.f32 %v5309_v38, %v5309_v38 }
 0x3cb   : > { %2003 = vmatpush.msra.mxu2 %v1966_v18  ;;  %v2043_v18 = vld [vmem:[%s6012_s4 + $0x8] sm:$0xff] }
 0x3cc   : > { %1909 = vmatpush.msra.mxu3 %v5243_v23  ;;  %1935 = vmatpush.msra.mxu0 %v5314_v10 }
 0x3cd   : > { %2004 = vmatpush.msra.mxu2 %v1965_v50  ;;  %4041 = vmatmul.msk.f32.vlgmr.msra.gmra.mxu0 %vm917_vm1, %v1876_v11  ;;  %v3235_v50 = vld [vmem:[%s6014_s6 + $0x10] sm:$0xff] }
 0x3ce   : > { %1910 = vmatpush.msra.mxu3 %v5239_v5 }
 0x3cf   : > { %2005 = vmatpush.msra.mxu2 %v1964_v12  ;;  %v4328_v12 = vmov 0  }
 0x3d0   : > { %1911 = vmatpush.msra.mxu3 %v5235_v49  ;;  %4178 = vset.pattern.permute.xlu1 %v4328_v12 }
 0x3d1   : > { %2006 = vmatpush.msra.mxu2 %v1963_v21  ;;  %4177 = vset.pattern.permute.xlu0 %v4328_v12  ;;  %v2044_v21 = vld [vmem:[%s6012_s4 + $0x10] sm:$0xff] }
 0x3d2   : > { %1912 = vmatpush.msra.mxu3 %v5228_v22  ;;  %3279 = vperm.xlu1 %4178, %v3235_v50   ;;  %v2051_v50 = vld [vmem:[%s6012_s4 + $0x48] sm:$0xff] }
 0x3d3   : > { %2007 = vmatpush.msra.mxu2 %v1962_v47  ;;  %4176 = vset.pattern.permute.xlu2 %v4328_v12  ;;  %v3234_v47 = vld [vmem:[%s6014_s6 + $0x8] sm:$0xff]  ;;  %v3255_v12 = vld [vmem:[%s6014_s6 + $0xb0] sm:$0xff] }
 0x3d4   : > { %1913 = vmatpush.msra.mxu3 %v5212_v40 }
 0x3d5   : > { %2008 = vmatpush.msra.mxu2 %v1961_v20  ;;  %v3238_v20 = vld [vmem:[%s6014_s6 + $0x28] sm:$0xff] }
 0x3d6   : > { %1914 = vmatpush.msra.mxu3 %v5196_v28  ;;  %v1897_v63 = vpop.f32.mrf.mxu0 }
 0x3d7   : > { %2009 = vmatpush.msra.mxu2 %v1960_v61  ;;  %v3233_v61 = vld [vmem:[%s6014_s6] sm:$0xff] }
 0x3d8   : > { %1915 = vmatpush.msra.mxu3 %v5174_v9  ;;  %3269 = vperm.xlu2 %4176, %v3233_v61   ;;  %v3258_v61 = vld [vmem:[%s6014_s6 + $0xc8] sm:$0xff] }
 0x3d9   : > { %2010 = vmatpush.msra.mxu2 %v1959_v35  ;;  %1916 = vmatmul.f32.vlgmr.msra.gmra.mxu3 %v1875_v41  ;;  %v1993_v45 = vpop.f32.mrf.mxu1  ;;  %v3237_v35 = vld [vmem:[%s6014_s6 + $0x20] sm:$0xff] }
 0x3da   : > { %2030 = vmatpush.msrb.mxu3 %v1975_v31  ;;  %3294 = vperm.xlu1 %4178, %v3238_v20   ;;  %v3241_v31 = vld [vmem:[%s6014_s6 + $0x40] sm:$0xff]  ;;  %v2052_v20 = vld [vmem:[%s6012_s4 + $0x50] sm:$0xff] }
 0x3db   : > { %2011 = vmatpush.msra.mxu2 %v1958_v26  ;;  %v3236_v26 = vld [vmem:[%s6014_s6 + $0x18] sm:$0xff] }
 0x3dc   : > { %2031 = vmatpush.msrb.mxu3 %v1974_v43  ;;  %2012 = vmatmul.f32.vlgmr.msra.gmra.mxu2 %v1875_v41  ;;  %v2045_v41 = vld [vmem:[%s6012_s4 + $0x18] sm:$0xff]  ;;  %v2046_v43 = vld [vmem:[%s6012_s4 + $0x20] sm:$0xff] }
 0x3e0   : > { %3284 = vperm.xlu2 %4176, %v3236_v26   ;;  %v3261_v26 = vld [vmem:[%s6014_s6 + $0xe0] sm:$0xff] }
 0x3e1   : > { %4042 = vmatmul.msk.f32.vlgmr.msrb.gmra.mxu3 %vm917_vm1, %v1876_v11 }
 0x3e2   : > { %3309 = vperm.xlu1 %4178, %v3241_v31   ;;  %v2053_v31 = vld [vmem:[%s6012_s4 + $0x58] sm:$0xff] }
 0x44a   : > { %v1937_v29 = vpop.f32.mrf.mxu0 }
 0x45c   : > { %v1917_v27 = vpop.f32.mrf.mxu3 }
 0x45d   : > { %v1918_v7 = vadd.f32 %v1917_v27, %v1897_v63  ;;  %v3240_v63 = vld [vmem:[%s6014_s6 + $0x38] sm:$0xff] }
 0x45e   : > { %v3244_v27 = vld [vmem:[%s6014_s6 + $0x58] sm:$0xff] }
 0x45f   : > { %v1938_v19 = vadd.f32 %v1937_v29, %v1918_v7  ;;  %v2013_v60 = vpop.f32.mrf.mxu2  ;;  %v3239_v29 = vld [vmem:[%s6014_s6 + $0x30] sm:$0xff]  ;;  %3324 = vperm.xlu1 %4178, %v3244_v27   ;;  %v2047_v7 = vld [vmem:[%s6012_s4 + $0x28] sm:$0xff] }
 0x460   : > { %v2014_v39 = vadd.f32 %v2013_v60, %v1993_v45  ;;  %3299 = vperm.xlu2 %4176, %v3239_v29   ;;  %v3243_v45 = vld [vmem:[%s6014_s6 + $0x50] sm:$0xff]  ;;  %v3242_v60 = vld [vmem:[%s6014_s6 + $0x48] sm:$0xff] }
 0x461   : > { %1940 = vadd.xlane.f32.xlu0 %v1938_v19  ;;  %v3247_v19 = vld [vmem:[%s6014_s6 + $0x70] sm:$0xff]  ;;  %v2055_v27 = vld [vmem:[%s6012_s4 + $0x68] sm:$0xff] }
 0x462   : > { %v3263_v29 = vld [vmem:[%s6014_s6 + $0xf0] sm:$0xff] }
 0x464   : > { %v2033_v55 = vpop.f32.mrf.mxu3 }
 0x465   : > { %v2034_v32 = vadd.f32 %v2033_v55, %v2014_v39  ;;  %v2048_v39 = vld [vmem:[%s6012_s4 + $0x30] sm:$0xff]  ;;  %v3246_v55 = vld [vmem:[%s6014_s6 + $0x68] sm:$0xff] }
 0x467   : > { %3339 = vperm.xlu1 %4178, %v3247_v19  }
 0x468   : > { %3314 = vperm.xlu2 %4176, %v3242_v60   ;;  %v2058_v60 = vld [vmem:[%s6012_s4 + $0x80] sm:$0xff] }
 0x469   : > { %2036 = vadd.xlane.f32.xlu0 %v2034_v32  ;;  %v3250_v32 = vld [vmem:[%s6014_s6 + $0x88] sm:$0xff] }
 0x46f   : > { %3354 = vperm.xlu1 %4178, %v3250_v32  }
 0x47d   : > { %3274 = vperm.xlu0 %4177, %v3234_v47   ;;  %v3254_v47 = vld [vmem:[%s6014_s6 + $0xa8] sm:$0xff] }
 0x485   : > { %3289 = vperm.xlu0 %4177, %v3237_v35   ;;  %v3257_v35 = vld [vmem:[%s6014_s6 + $0xc0] sm:$0xff] }
 0x48d   : > { %3304 = vperm.xlu0 %4177, %v3240_v63   ;;  %v3260_v63 = vld [vmem:[%s6014_s6 + $0xd8] sm:$0xff] }
 0x495   : > { %3319 = vperm.xlu0 %4177, %v3243_v45   ;;  %v2057_v45 = vld [vmem:[%s6012_s4 + $0x78] sm:$0xff] }
 0x49d   : > { %3334 = vperm.xlu0 %4177, %v3246_v55  }
 0x4d4   : > { %v1941_v54 = vpop.xlane.xlu0 %1940 }
 0x4d5   : > { %v2038_v33 = vmul.f32 0.00086505193, %v1941_v54  ;;  %v3245_v54 = vld [vmem:[%s6014_s6 + $0x60] sm:$0xff] }
 0x4d6   : > { %3329 = vperm.xlu2 %4176, %v3245_v54   ;;  %v2059_v54 = vld [vmem:[%s6012_s4 + $0x88] sm:$0xff] }
 0x4d7   : > { %2194 = vmatpush.msrb.mxu0 %v2038_v33  ;;  %4115 = vmatpush.msrb.mxu2 %v2038_v33  ;;  %v2040_v1 = vmul.f32 %v2038_v33, %v2038_v33  ;;  %v2049_v33 = vld [vmem:[%s6012_s4 + $0x38] sm:$0xff] }
 0x4d8   : > { %4043 = vmatmul.msk.f32.vlgmr.msrb.gmra.mxu0 %vm2076_vm2, %v2042_v25  ;;  %4076 = vmatmul.msk.f32.vlgmr.msrb.gmra.mxu2 %vm2076_vm2, %v2075_v56  ;;  %v3253_v56 = vld [vmem:[%s6014_s6 + $0xa0] sm:$0xff] }
 0x4d9   : > { %3369 = vperm.xlu1 %4178, %v3253_v56  }
 0x4dc   : > { %v2037_v4 = vpop.xlane.xlu0 %2036 }
 0x4dd   : > { %v2039_v59 = vmul.f32 0.00086505193, %v2037_v4  ;;  %v3248_v4 = vld [vmem:[%s6014_s6 + $0x78] sm:$0xff] }
 0x4de   : > { %3344 = vperm.xlu2 %4176, %v3248_v4  }
 0x4df   : > { %v2041_v11 = vsub.f32 %v2039_v59, %v2040_v1  ;;  %v2050_v1 = vld [vmem:[%s6012_s4 + $0x40] sm:$0xff]  ;;  %v3252_v59 = vld [vmem:[%s6014_s6 + $0x98] sm:$0xff] }
 0x4e0   : > { %4044 = vmatmul.msk.f32.gmra.mxu0 %vm2076_vm2, %v2043_v18 }
 0x4e1   : > { %2347 = vmatpush.msra.mxu1 %v2041_v11  ;;  %v3251_v11 = vld [vmem:[%s6014_s6 + $0x90] sm:$0xff] }
 0x4e2   : > { %4077 = vmatmul.msk.f32.vlgmr.msra.gmra.mxu1 %vm2076_vm2, %v2042_v25  ;;  %v3249_v25 = vld [vmem:[%s6014_s6 + $0x80] sm:$0xff] }
 0x4e3   : > { %3349 = vperm.xlu0 %4177, %v3249_v25  }
 0x4e6   : > { %3359 = vperm.xlu2 %4176, %v3251_v11  }
 0x4e8   : > { %4045 = vmatmul.msk.f32.gmra.mxu0 %vm2076_vm2, %v2044_v21 }
 0x4ea   : > { %4078 = vmatmul.msk.f32.gmra.mxu1 %vm2076_vm2, %v2043_v18  ;;  %v3256_v18 = vld [vmem:[%s6014_s6 + $0xb8] sm:$0xff] }
 0x4eb   : > { %3364 = vperm.xlu0 %4177, %v3252_v59   ;;  %3384 = vperm.xlu1 %4178, %v3256_v18   ;;  %v5547_v59 = vpop.permute.xlu1 %3279 }
 0x4ee   : > { %3374 = vperm.xlu2 %4176, %v3254_v47  }
 0x4f0   : > { %4046 = vmatmul.msk.f32.gmra.mxu0 %vm2076_vm2, %v2045_v41 }
 0x4f2   : > { %4079 = vmatmul.msk.f32.gmra.mxu1 %vm2076_vm2, %v2044_v21  ;;  %v3259_v21 = vld [vmem:[%s6014_s6 + $0xd0] sm:$0xff] }
 0x4f3   : > { %3379 = vperm.xlu0 %4177, %v3255_v12   ;;  %3399 = vperm.xlu1 %4178, %v3259_v21  }
 0x4f6   : > { %3389 = vperm.xlu2 %4176, %v3257_v35  }
 0x4f8   : > { %4047 = vmatmul.msk.f32.gmra.mxu0 %vm2076_vm2, %v2046_v43 }
 0x4fa   : > { %4080 = vmatmul.msk.f32.gmra.mxu1 %vm2076_vm2, %v2045_v41  ;;  %v3262_v41 = vld [vmem:[%s6014_s6 + $0xe8] sm:$0xff] }
 0x4fb   : > { %3394 = vperm.xlu0 %4177, %v3258_v61   ;;  %3414 = vperm.xlu1 %4178, %v3262_v41   ;;  %v2061_v41 = vld [vmem:[%s6012_s4 + $0x98] sm:$0xff] }
 0x4fe   : > { %3404 = vperm.xlu2 %4176, %v3260_v63   ;;  %v5557_v63 = vpop.permute.xlu1 %3294 }
 0x500   : > { %4048 = vmatmul.msk.f32.gmra.mxu0 %vm2076_vm2, %v2047_v7 }
 0x502   : > { %4081 = vmatmul.msk.f32.gmra.mxu1 %vm2076_vm2, %v2046_v43  ;;  %v2054_v43 = vld [vmem:[%s6012_s4 + $0x60] sm:$0xff] }
 0x503   : > { %3409 = vperm.xlu0 %4177, %v3261_v26  }
 0x506   : > { %3419 = vperm.xlu2 %4176, %v3263_v29   ;;  %v2298_v29 = vld [vmem:[%s6013_s5] sm:$0xff] }
 0x508   : > { %4049 = vmatmul.msk.f32.gmra.mxu0 %vm2076_vm2, %v2048_v39 }
 0x50a   : > { %4082 = vmatmul.msk.f32.gmra.mxu1 %vm2076_vm2, %v2047_v7  ;;  %v2056_v7 = vld [vmem:[%s6012_s4 + $0x70] sm:$0xff] }
 0x510   : > { %4050 = vmatmul.msk.f32.gmra.mxu0 %vm2076_vm2, %v2049_v33 }
 0x512   : > { %4083 = vmatmul.msk.f32.gmra.mxu1 %vm2076_vm2, %v2048_v39  ;;  %v5534_v39 = vpop.permute.xlu2 %3269 }
 0x518   : > { %4051 = vmatmul.msk.f32.gmra.mxu0 %vm2076_vm2, %v2050_v1 }
 0x51a   : > { %4084 = vmatmul.msk.f32.gmra.mxu1 %vm2076_vm2, %v2049_v33  ;;  %v5542_v56 = vpop.permute.xlu2 %3284 }
 0x520   : > { %4052 = vmatmul.msk.f32.gmra.mxu0 %vm2076_vm2, %v2051_v50 }
 0x522   : > { %4085 = vmatmul.msk.f32.gmra.mxu1 %vm2076_vm2, %v2050_v1  ;;  %v2060_v1 = vld [vmem:[%s6012_s4 + $0x90] sm:$0xff]  ;;  %v5551_v47 = vpop.permute.xlu2 %3299 }
 0x528   : > { %4053 = vmatmul.msk.f32.gmra.mxu0 %vm2076_vm2, %v2052_v20 }
 0x52a   : > { %4086 = vmatmul.msk.f32.gmra.mxu1 %vm2076_vm2, %v2051_v50 }
 0x530   : > { %4054 = vmatmul.msk.f32.gmra.mxu0 %vm2076_vm2, %v2053_v31 }
 0x532   : > { %4087 = vmatmul.msk.f32.gmra.mxu1 %vm2076_vm2, %v2052_v20 }
 0x538   : > { %4055 = vmatmul.msk.f32.gmra.mxu0 %vm2076_vm2, %v2054_v43 }
 0x53a   : > { %4088 = vmatmul.msk.f32.gmra.mxu1 %vm2076_vm2, %v2053_v31 }
 0x540   : > { %4056 = vmatmul.msk.f32.gmra.mxu0 %vm2076_vm2, %v2055_v27 }
 0x542   : > { %4089 = vmatmul.msk.f32.gmra.mxu1 %vm2076_vm2, %v2054_v43 }
 0x548   : > { %4057 = vmatmul.msk.f32.gmra.mxu0 %vm2076_vm2, %v2056_v7 }
 0x54a   : > { %4090 = vmatmul.msk.f32.gmra.mxu1 %vm2076_vm2, %v2055_v27 }
 0x550   : > { %4058 = vmatmul.msk.f32.gmra.mxu0 %vm2076_vm2, %v2057_v45 }
 0x552   : > { %4091 = vmatmul.msk.f32.gmra.mxu1 %vm2076_vm2, %v2056_v7 }
 0x555   : > { %v2196_v19 = vpop.f32.mrf.mxu0 }
 0x556   : > { %2827 = vperm.xlu1 %4178, %v2196_v19  }
 0x558   : > { %4059 = vmatmul.msk.f32.gmra.mxu0 %vm2076_vm2, %v2058_v60 }
 0x55a   : > { %4092 = vmatmul.msk.f32.gmra.mxu1 %vm2076_vm2, %v2057_v45 }
 0x55b   : > { %v2295_v55 = vpop.f32.mrf.mxu2 }
 0x55c   : > { %2992 = vperm.xlu0 %4177, %v2295_v55  }
 0x55d   : > { %v2199_v32 = vpop.f32.mrf.mxu0 }
 0x55e   : > { %2832 = vperm.xlu1 %4178, %v2199_v32  }
 0x55f   : > { %v2349_v33 = vpop.f32.mrf.mxu1 }
 0x560   : > { %v2350_v25 = vadd.f32 1e-05, %v2349_v33  ;;  %4060 = vmatmul.msk.f32.gmra.mxu0 %vm2076_vm2, %v2059_v54  ;;  %v5566_v33 = vpop.permute.xlu2 %3314 }
 0x562   : > { %4179 = vrsqrt.f32 %v2350_v25  ;;  %4093 = vmatmul.msk.f32.gmra.mxu1 %vm2076_vm2, %v2058_v60  ;;  %vm2457_vm4 = vweird.f32 %v2350_v25 }
 0x565   : > { %v2202_v4 = vpop.f32.mrf.mxu0 }
 0x566   : > { %2837 = vperm.xlu2 %4176, %v2202_v4  }
 0x567   : > { %v2352_v18 = vpop.f32.mrf.mxu1 }
 0x568   : > { %v4180_v11 = vpop.eup %4179  ;;  %v2353_v50 = vadd.f32 1e-05, %v2352_v18  ;;  %4061 = vmatmul.msk.f32.gmra.mxu0 %vm2076_vm2, %v2060_v1 }
 0x569   : > { %v2452_v12 = vmul.f32 %v4180_v11, %v2350_v25  ;;  %vm2458_vm3 = vweird.f32 %v4180_v11 }
 0x56a   : > { %4181 = vrsqrt.f32 %v2353_v50  ;;  %4094 = vmatmul.msk.f32.gmra.mxu1 %vm2076_vm2, %v2059_v54  ;;  %vm2459_vm5 = vmor %vm2457_vm4, %vm2458_vm3  ;;  %v2062_v54 = vld [vmem:[%s6012_s4 + $0xa0] sm:$0xff]  ;;  %vm2467_vm7 = vweird.f32 %v2353_v50 }
 0x56b   : > { %v2453_v21 = vmul.f32 %v4180_v11, %v2452_v12 }
 0x56d   : > { %v2454_v20 = vmul.f32 0.5, %v2453_v21  ;;  %v2205_v61 = vpop.f32.mrf.mxu0 }
 0x56e   : > { %2842 = vperm.xlu2 %4176, %v2205_v61  }
 0x56f   : > { %v2455_v35 = vsub.f32 1.5, %v2454_v20  ;;  %v2355_v31 = vpop.f32.mrf.mxu1  ;;  %v5573_v20 = vpop.permute.xlu1 %3309 }
 0x570   : > { %v4182_v26 = vpop.eup %4181  ;;  %v2356_v43 = vadd.f32 1e-05, %v2355_v31  ;;  %4062 = vmatmul.msk.f32.gmra.mxu0 %vm2076_vm2, %v2061_v41 }
 0x571   : > { %v2462_v27 = vmul.f32 %v4182_v26, %v2353_v50  ;;  %v2456_v7 = vmul.f32 %v4180_v11, %v2455_v35  ;;  %vm2468_vm6 = vweird.f32 %v4182_v26  ;;  %v2063_v50 = vld [vmem:[%s6012_s4 + $0xa8] sm:$0xff] }
 0x572   : > { %4183 = vrsqrt.f32 %v2356_v43  ;;  %4095 = vmatmul.msk.f32.gmra.mxu1 %vm2076_vm2, %v2060_v1  ;;  %vm2469_vm8 = vmor %vm2467_vm7, %vm2468_vm6  ;;  %vm2477_vm10 = vweird.f32 %v2356_v43 }
 0x573   : > { %v2463_v45 = vmul.f32 %v4182_v26, %v2462_v27  ;;  %v2460_v19 = vsel %vm2459_vm5, %v4180_v11, %v2456_v7  ;;  %v2299_v11 = vld [vmem:[%s6013_s5 + $0x8] sm:$0xff] }
 0x574   : > { %v2791_v60 = vmul.f32 %v2460_v19, %v2298_v29 }
 0x575   : > { %v2464_v55 = vmul.f32 0.5, %v2463_v45  ;;  %v2208_v32 = vpop.f32.mrf.mxu0 }
 0x576   : > { %2847 = vperm.xlu0 %4177, %v2208_v32   ;;  %3031 = vperm.xlu1 %4178, %v2791_v60   ;;  %v5578_v60 = vpop.permute.xlu0 %3274  ;;  %v2300_v32 = vld [vmem:[%s6013_s5 + $0x10] sm:$0xff] }
 0x577   : > { %v2465_v25 = vsub.f32 1.5, %v2464_v55  ;;  %v2358_v4 = vpop.f32.mrf.mxu1  ;;  %v5580_v55 = vpop.permute.xlu2 %3329 }
 0x578   : > { %v4184_v18 = vpop.eup %4183  ;;  %v2359_v12 = vadd.f32 1e-05, %v2358_v4  ;;  %4063 = vmatmul.msk.f32.gmra.mxu0 %vm2076_vm2, %v2062_v54 }
 0x579   : > { %v2472_v1 = vmul.f32 %v4184_v18, %v2356_v43  ;;  %v2466_v21 = vmul.f32 %v4182_v26, %v2465_v25  ;;  %vm2478_vm9 = vweird.f32 %v4184_v18  ;;  %v2064_v43 = vld [vmem:[%s6012_s4 + $0xb0] sm:$0xff] }
 0x57a   : > { %4185 = vrsqrt.f32 %v2359_v12  ;;  %4096 = vmatmul.msk.f32.gmra.mxu1 %vm2076_vm2, %v2061_v41  ;;  %vm2479_vm11 = vmor %vm2477_vm10, %vm2478_vm9  ;;  %vm2487_vm13 = vweird.f32 %v2359_v12 }
 0x57b   : > { %v2473_v61 = vmul.f32 %v4184_v18, %v2472_v1  ;;  %v2470_v35 = vsel %vm2469_vm8, %v4182_v26, %v2466_v21  ;;  %v5587_v21 = vpop.permute.xlu1 %3324 }
 0x57c   : > { %v2792_v31 = vmul.f32 %v2470_v35, %v2299_v11 }
 0x57d   : > { %v2474_v27 = vmul.f32 0.5, %v2473_v61  ;;  %v2211_v29 = vpop.f32.mrf.mxu0 }
 0x57e   : > { %3036 = vperm.xlu2 %4176, %v2792_v31   ;;  %2852 = vperm.xlu1 %4178, %v2211_v29  }
 0x57f   : > { %v2475_v7 = vsub.f32 1.5, %v2474_v27  ;;  %v2361_v45 = vpop.f32.mrf.mxu1 }
 0x580   : > { %v4186_v19 = vpop.eup %4185  ;;  %v2362_v41 = vadd.f32 1e-05, %v2361_v45  ;;  %4064 = vmatmul.msk.f32.gmra.mxu0 %vm2076_vm2, %v2063_v50 }
 0x581   : > { %v2482_v26 = vmul.f32 %v4186_v19, %v2359_v12  ;;  %v2476_v25 = vmul.f32 %v4184_v18, %v2475_v7  ;;  %vm2488_vm12 = vweird.f32 %v4186_v19  ;;  %v2065_v12 = vld [vmem:[%s6012_s4 + $0xb8] sm:$0xff] }
 0x582   : > { %4187 = vrsqrt.f32 %v2362_v41  ;;  %4097 = vmatmul.msk.f32.gmra.mxu1 %vm2076_vm2, %v2062_v54  ;;  %vm2489_vm14 = vmor %vm2487_vm13, %vm2488_vm12  ;;  %vm2497_vm0 = vweird.f32 %v2362_v41 }
 0x583   : > { %v2483_v4 = vmul.f32 %v4186_v19, %v2482_v26  ;;  %v2480_v1 = vsel %vm2479_vm11, %v4184_v18, %v2476_v25  ;;  %v2301_v18 = vld [vmem:[%s6013_s5 + $0x18] sm:$0xff]  ;;  %v5596_v26 = vpop.permute.xlu0 %3289 }
 0x584   : > { %v2793_v11 = vmul.f32 %v2480_v1, %v2300_v32  ;;  %v5599_v32 = vpop.permute.xlu2 %3344 }
 0x585   : > { %v2484_v61 = vmul.f32 0.5, %v2483_v4  ;;  %v2214_v35 = vpop.f32.mrf.mxu0 }
 0x586   : > { %3041 = vperm.xlu0 %4177, %v2793_v11   ;;  %2857 = vperm.xlu2 %4176, %v2214_v35   ;;  %v5604_v35 = vpop.permute.xlu1 %3339 }
 0x587   : > { %v2485_v31 = vsub.f32 1.5, %v2484_v61  ;;  %v2364_v27 = vpop.f32.mrf.mxu1 }
 0x588   : > { %v4188_v29 = vpop.eup %4187  ;;  %v2365_v7 = vadd.f32 1e-05, %v2364_v27  ;;  %4065 = vmatmul.msk.f32.gmra.mxu0 %vm2076_vm2, %v2064_v43 }
 0x589   : > { %v2492_v54 = vmul.f32 %v4188_v29, %v2362_v41  ;;  %v2486_v45 = vmul.f32 %v4186_v19, %v2485_v31  ;;  %vm2498_vm15 = vweird.f32 %v4188_v29  ;;  %v2066_v41 = vld [vmem:[%s6012_s4 + $0xc0] sm:$0xff] }
 0x58a   : > { %4189 = vrsqrt.f32 %v2365_v7  ;;  %4098 = vmatmul.msk.f32.gmra.mxu1 %vm2076_vm2, %v2063_v50  ;;  %vm2499_vm1 = vmor %vm2497_vm0, %vm2498_vm15  ;;  %vm2507_vm4 = vweird.f32 %v2365_v7 }
 0x58b   : > { %v2493_v25 = vmul.f32 %v4188_v29, %v2492_v54  ;;  %v2490_v4 = vsel %vm2489_vm14, %v4186_v19, %v2486_v45  ;;  %v2302_v19 = vld [vmem:[%s6013_s5 + $0x20] sm:$0xff] }
 0x58c   : > { %v2794_v1 = vmul.f32 %v2490_v4, %v2301_v18  ;;  %v5611_v4 = vpop.permute.xlu0 %3304 }
 0x58d   : > { %v2494_v11 = vmul.f32 0.5, %v2493_v25  ;;  %v2217_v61 = vpop.f32.mrf.mxu0 }
 0x58e   : > { %3046 = vperm.xlu1 %4178, %v2794_v1  }
 0x58f   : > { %v2495_v31 = vsub.f32 1.5, %v2494_v11  ;;  %v2367_v27 = vpop.f32.mrf.mxu1  ;;  %v5613_v11 = vpop.permute.xlu2 %3359 }
 0x590   : > { %v4190_v10 = vpop.eup %4189  ;;  %v2368_v50 = vadd.f32 1e-05, %v2367_v27  ;;  %4066 = vmatmul.msk.f32.gmra.mxu0 %vm2076_vm2, %v2065_v12 }
 0x591   : > { %v2502_v54 = vmul.f32 %v4190_v10, %v2365_v7  ;;  %v2496_v18 = vmul.f32 %v4188_v29, %v2495_v31  ;;  %vm2508_vm3 = vweird.f32 %v4190_v10 }
 0x592   : > { %4191 = vrsqrt.f32 %v2368_v50  ;;  %4099 = vmatmul.msk.f32.gmra.mxu1 %vm2076_vm2, %v2064_v43  ;;  %vm2509_vm5 = vmor %vm2507_vm4, %vm2508_vm3  ;;  %vm2517_vm7 = vweird.f32 %v2368_v50 }
 0x593   : > { %v2503_v45 = vmul.f32 %v4190_v10, %v2502_v54  ;;  %v2500_v25 = vsel %vm2499_vm1, %v4188_v29, %v2496_v18  ;;  %v5618_v54 = vpop.permute.xlu1 %3354 }
 0x594   : > { %v2795_v1 = vmul.f32 %v2500_v25, %v2302_v19  ;;  %v2303_v19 = vld [vmem:[%s6013_s5 + $0x28] sm:$0xff]  ;;  %v5628_v7 = vpop.permute.xlu0 %3319 }
 0x595   : > { %v2504_v27 = vmul.f32 0.5, %v2503_v45  ;;  %v2220_v38 = vpop.f32.mrf.mxu0 }
 0x596   : > { %3051 = vperm.xlu2 %4176, %v2795_v1   ;;  %2862 = vperm.xlu1 %4178, %v2217_v61  }
 0x597   : > { %v2505_v31 = vsub.f32 1.5, %v2504_v27  ;;  %v2370_v34 = vpop.f32.mrf.mxu1  ;;  %v2067_v27 = vld [vmem:[%s6012_s4 + $0xc8] sm:$0xff]  ;;  %v5630_v44 = vpop.permute.xlu2 %3374 }
 0x598   : > { %v4192_v43 = vpop.eup %4191  ;;  %v2371_v16 = vadd.f32 1e-05, %v2370_v34  ;;  %4067 = vmatmul.msk.f32.gmra.mxu0 %vm2076_vm2, %v2066_v41  ;;  %6062 = vst [vmem:[#allocation12_spill] sm:$0xff] %v5630_v44 }
 0x599   : > { %v2512_v29 = vmul.f32 %v4192_v43, %v2368_v50  ;;  %v2506_v18 = vmul.f32 %v4190_v10, %v2505_v31  ;;  %vm2518_vm6 = vweird.f32 %v4192_v43  ;;  %v2068_v50 = vld [vmem:[%s6012_s4 + $0xd0] sm:$0xff] }
 0x59a   : > { %4193 = vrsqrt.f32 %v2371_v16  ;;  %4100 = vmatmul.msk.f32.gmra.mxu1 %vm2076_vm2, %v2065_v12  ;;  %vm2519_vm8 = vmor %vm2517_vm7, %vm2518_vm6  ;;  %vm2527_vm10 = vweird.f32 %v2371_v16 }
 0x59b   : > { %v2513_v61 = vmul.f32 %v4192_v43, %v2512_v29  ;;  %v2510_v45 = vsel %vm2509_vm5, %v4190_v10, %v2506_v18 }
 0x59c   : > { %v2796_v25 = vmul.f32 %v2510_v45, %v2303_v19  ;;  %v2304_v19 = vld [vmem:[%s6013_s5 + $0x30] sm:$0xff]  ;;  %v5642_v46 = vpop.permute.xlu0 %3334 }
 0x59d   : > { %v2514_v1 = vmul.f32 0.5, %v2513_v61  ;;  %v2223_v34 = vpop.f32.mrf.mxu0 }
 0x59e   : > { %3056 = vperm.xlu0 %4177, %v2796_v25   ;;  %2867 = vperm.xlu2 %4176, %v2220_v38   ;;  %v5637_v38 = vpop.permute.xlu1 %3369 }
 0x59f   : > { %v2515_v31 = vsub.f32 1.5, %v2514_v1  ;;  %2872 = vperm.xlu1 %4178, %v2223_v34   ;;  %v2373_v17 = vpop.f32.mrf.mxu1  ;;  %6063 = vst [vmem:[#allocation7_spill] sm:$0xff] %v5637_v38  ;;  %v5644_v6 = vpop.permute.xlu2 %3389 }
 0x5a0   : > { %v4194_v12 = vpop.eup %4193  ;;  %v2374_v29 = vadd.f32 1e-05, %v2373_v17  ;;  %4068 = vmatmul.msk.f32.gmra.mxu0 %vm2076_vm2, %v2067_v27  ;;  %6064 = vst [vmem:[#allocation11_spill] sm:$0xff] %v5644_v6 }
 0x5a1   : > { %v2522_v10 = vmul.f32 %v4194_v12, %v2371_v16  ;;  %v2516_v18 = vmul.f32 %v4192_v43, %v2515_v31  ;;  %vm2528_vm9 = vweird.f32 %v4194_v12  ;;  %v2069_v16 = vld [vmem:[%s6012_s4 + $0xd8] sm:$0xff] }
 0x5a2   : > { %4195 = vrsqrt.f32 %v2374_v29  ;;  %4101 = vmatmul.msk.f32.gmra.mxu1 %vm2076_vm2, %v2066_v41  ;;  %vm2529_vm11 = vmor %vm2527_vm10, %vm2528_vm9  ;;  %vm2537_vm13 = vweird.f32 %v2374_v29 }
 0x5a3   : > { %v2523_v61 = vmul.f32 %v4194_v12, %v2522_v10  ;;  %v2520_v45 = vsel %vm2519_vm8, %v4192_v43, %v2516_v18  ;;  %v2305_v10 = vld [vmem:[%s6013_s5 + $0x38] sm:$0xff] }
 0x5a4   : > { %v2797_v25 = vmul.f32 %v2520_v45, %v2304_v19 }
 0x5a5   : > { %v2524_v1 = vmul.f32 0.5, %v2523_v61  ;;  %v2226_v17 = vpop.f32.mrf.mxu0 }
 0x5a6   : > { %2877 = vperm.xlu2 %4176, %v2226_v17  }
 0x5a7   : > { %v2525_v34 = vsub.f32 1.5, %v2524_v1  ;;  %3061 = vperm.xlu1 %4178, %v2797_v25   ;;  %v2376_v42 = vpop.f32.mrf.mxu1  ;;  %v5651_v25 = vpop.permute.xlu1 %3384 }
 0x5a8   : > { %v4196_v31 = vpop.eup %4195  ;;  %v2377_v41 = vadd.f32 1e-05, %v2376_v42  ;;  %4069 = vmatmul.msk.f32.gmra.mxu0 %vm2076_vm2, %v2068_v50  ;;  %6065 = vst [vmem:[#allocation22_spill] sm:$0xff] %v5651_v25 }
 0x5a9   : > { %v2532_v43 = vmul.f32 %v4196_v31, %v2374_v29  ;;  %v2526_v19 = vmul.f32 %v4194_v12, %v2525_v34  ;;  %vm2538_vm12 = vweird.f32 %v4196_v31  ;;  %v2070_v29 = vld [vmem:[%s6012_s4 + $0xe0] sm:$0xff] }
 0x5aa   : > { %4197 = vrsqrt.f32 %v2377_v41  ;;  %4102 = vmatmul.msk.f32.gmra.mxu1 %vm2076_vm2, %v2067_v27  ;;  %vm2539_vm14 = vmor %vm2537_vm13, %vm2538_vm12  ;;  %vm2547_vm0 = vweird.f32 %v2377_v41 }
 0x5ab   : > { %v2533_v18 = vmul.f32 %v4196_v31, %v2532_v43  ;;  %v2530_v61 = vsel %vm2529_vm11, %v4194_v12, %v2526_v19  ;;  %v2306_v12 = vld [vmem:[%s6013_s5 + $0x40] sm:$0xff]  ;;  %v5662_v19 = vpop.permute.xlu2 %3404 }
 0x5ac   : > { %v2798_v45 = vmul.f32 %v2530_v61, %v2305_v10  ;;  %v5660_v10 = vpop.permute.xlu0 %3349  ;;  %6066 = vst [vmem:[#allocation23_spill] sm:$0xff] %v5662_v19 }
 0x5ad   : > { %v2534_v42 = vmul.f32 0.5, %v2533_v18  ;;  %v2229_v1 = vpop.f32.mrf.mxu0 }
 0x5ae   : > { %3066 = vperm.xlu2 %4176, %v2798_v45  }
 0x5af   : > { %v2535_v17 = vsub.f32 1.5, %v2534_v42  ;;  %2882 = vperm.xlu1 %4178, %v2229_v1   ;;  %v2379_v6 = vpop.f32.mrf.mxu1  ;;  %v5668_v1 = vpop.permute.xlu1 %3399 }
 0x5b0   : > { %v4198_v34 = vpop.eup %4197  ;;  %v2380_v2 = vadd.f32 1e-05, %v2379_v6  ;;  %4070 = vmatmul.msk.f32.gmra.mxu0 %vm2076_vm2, %v2069_v16  ;;  %6067 = vst [vmem:[#allocation24_spill] sm:$0xff] %v5668_v1 }
 0x5b1   : > { %v2542_v27 = vmul.f32 %v4198_v34, %v2377_v41  ;;  %v2536_v43 = vmul.f32 %v4196_v31, %v2535_v17  ;;  %vm2548_vm15 = vweird.f32 %v4198_v34  ;;  %v2071_v41 = vld [vmem:[%s6012_s4 + $0xe8] sm:$0xff] }
 0x5b2   : > { %4199 = vrsqrt.f32 %v2380_v2  ;;  %4103 = vmatmul.msk.f32.gmra.mxu1 %vm2076_vm2, %v2068_v50  ;;  %vm2549_vm1 = vmor %vm2547_vm0, %vm2548_vm15  ;;  %vm2557_vm4 = vweird.f32 %v2380_v2 }
 0x5b3   : > { %v2543_v18 = vmul.f32 %v4198_v34, %v2542_v27  ;;  %v2540_v61 = vsel %vm2539_vm14, %v4196_v31, %v2536_v43  ;;  %v2307_v31 = vld [vmem:[%s6013_s5 + $0x48] sm:$0xff] }
 0x5b4   : > { %v2799_v6 = vmul.f32 %v2540_v61, %v2306_v12  ;;  %v5677_v61 = vpop.permute.xlu2 %3419 }
 0x5b5   : > { %v2544_v45 = vmul.f32 0.5, %v2543_v18  ;;  %v2232_v42 = vpop.f32.mrf.mxu0  ;;  %v5675_v18 = vpop.permute.xlu0 %3364  ;;  %6068 = vst [vmem:[#allocation25_spill] sm:$0xff] %v5677_v61 }
 0x5b6   : > { %3071 = vperm.xlu0 %4177, %v2799_v6   ;;  %2887 = vperm.xlu2 %4176, %v2232_v42  }
 0x5b7   : > { %v2545_v17 = vsub.f32 1.5, %v2544_v45  ;;  %v2382_v25 = vpop.f32.mrf.mxu1  ;;  %v5682_v44 = vpop.permute.xlu1 %3414 }
 0x5b8   : > { %v4200_v19 = vpop.eup %4199  ;;  %v2383_v0 = vadd.f32 1e-05, %v2382_v25  ;;  %4071 = vmatmul.msk.f32.gmra.mxu0 %vm2076_vm2, %v2070_v29  ;;  %6069 = vst [vmem:[#allocation26_spill] sm:$0xff] %v5682_v44 }
 0x5b9   : > { %v2552_v50 = vmul.f32 %v4200_v19, %v2380_v2  ;;  %v2546_v27 = vmul.f32 %v4198_v34, %v2545_v17  ;;  %vm2558_vm3 = vweird.f32 %v4200_v19 }
 0x5ba   : > { %4201 = vrsqrt.f32 %v2383_v0  ;;  %4104 = vmatmul.msk.f32.gmra.mxu1 %vm2076_vm2, %v2069_v16  ;;  %vm2559_vm5 = vmor %vm2557_vm4, %vm2558_vm3  ;;  %vm2567_vm7 = vweird.f32 %v2383_v0 }
 0x5bb   : > { %v2553_v12 = vmul.f32 %v4200_v19, %v2552_v50  ;;  %v2550_v43 = vsel %vm2549_vm1, %v4198_v34, %v2546_v27  ;;  %v2308_v50 = vld [vmem:[%s6013_s5 + $0x50] sm:$0xff] }
 0x5bc   : > { %v2800_v25 = vmul.f32 %v2550_v43, %v2307_v31 }
 0x5bd   : > { %v2554_v6 = vmul.f32 0.5, %v2553_v12  ;;  %v2235_v45 = vpop.f32.mrf.mxu0  ;;  %v5692_v2 = vpop.permute.xlu0 %3379 }
 0x5be   : > { %3076 = vperm.xlu1 %4178, %v2800_v25   ;;  %6070 = vst [vmem:[#allocation27_spill] sm:$0xff] %v5692_v2 }
 0x5bf   : > { %v2555_v42 = vsub.f32 1.5, %v2554_v6  ;;  %v2385_v17 = vpop.f32.mrf.mxu1 }
 0x5c0   : > { %v4202_v1 = vpop.eup %4201  ;;  %v2386_v16 = vadd.f32 1e-05, %v2385_v17  ;;  %4072 = vmatmul.msk.f32.gmra.mxu0 %vm2076_vm2, %v2071_v41  ;;  %v2072_v17 = vld [vmem:[%s6012_s4 + $0xf0] sm:$0xff]  ;;  %v5694_v61 = vpop.permute.xlu2 %2837 }
 0x5c1   : > { %v2562_v34 = vmul.f32 %v4202_v1, %v2383_v0  ;;  %v2556_v31 = vmul.f32 %v4200_v19, %v2555_v42  ;;  %vm2568_vm6 = vweird.f32 %v4202_v1  ;;  %v2073_v0 = vld [vmem:[%s6012_s4 + $0xf8] sm:$0xff] }
 0x5c2   : > { %4203 = vrsqrt.f32 %v2386_v16  ;;  %4105 = vmatmul.msk.f32.gmra.mxu1 %vm2076_vm2, %v2070_v29  ;;  %vm2569_vm8 = vmor %vm2567_vm7, %vm2568_vm6  ;;  %vm2577_vm10 = vweird.f32 %v2386_v16 }
 0x5c3   : > { %v2563_v27 = vmul.f32 %v4202_v1, %v2562_v34  ;;  %v2560_v12 = vsel %vm2559_vm5, %v4200_v19, %v2556_v31 }
 0x5c4   : > { %v2801_v43 = vmul.f32 %v2560_v12, %v2308_v50  ;;  %v2309_v50 = vld [vmem:[%s6013_s5 + $0x58] sm:$0xff] }
 0x5c5   : > { %v2564_v25 = vmul.f32 0.5, %v2563_v27  ;;  %v2238_v6 = vpop.f32.mrf.mxu0  ;;  %v5706_v49 = vpop.permute.xlu0 %3394 }
 0x5c6   : > { %3081 = vperm.xlu2 %4176, %v2801_v43   ;;  %2892 = vperm.xlu1 %4178, %v2235_v45   ;;  %6071 = vst [vmem:[#allocation28_spill] sm:$0xff] %v5706_v49 }
 0x5c7   : > { %v2565_v42 = vsub.f32 1.5, %v2564_v25  ;;  %v2388_v44 = vpop.f32.mrf.mxu1 }
 0x5c8   : > { %v4204_v5 = vpop.eup %4203  ;;  %v2389_v29 = vadd.f32 1e-05, %v2388_v44  ;;  %4073 = vmatmul.msk.f32.gmra.mxu0 %vm2076_vm2, %v2072_v17  ;;  %v5697_v34 = vpop.permute.xlu1 %2827 }
 0x5c9   : > { %v2572_v19 = vmul.f32 %v4204_v5, %v2386_v16  ;;  %v2566_v31 = vmul.f32 %v4202_v1, %v2565_v42  ;;  %vm2578_vm9 = vweird.f32 %v4204_v5  ;;  %v5708_v2 = vpop.permute.xlu2 %2842  ;;  %v2074_v16 = vld [vmem:[%s6012_s4 + $0x100] sm:$0xff] }
 0x5ca   : > { %4205 = vrsqrt.f32 %v2389_v29  ;;  %4106 = vmatmul.msk.f32.gmra.mxu1 %vm2076_vm2, %v2071_v41  ;;  %vm2579_vm11 = vmor %vm2577_vm10, %vm2578_vm9  ;;  %vm2587_vm13 = vweird.f32 %v2389_v29 }
 0x5cb   : > { %v2573_v45 = vmul.f32 %v4204_v5, %v2572_v19  ;;  %v2570_v27 = vsel %vm2569_vm8, %v4202_v1, %v2566_v31  ;;  %v2310_v19 = vld [vmem:[%s6013_s5 + $0x60] sm:$0xff] }
 0x5cc   : > { %v2802_v43 = vmul.f32 %v2570_v27, %v2309_v50 }
 0x5cd   : > { %v2574_v12 = vmul.f32 0.5, %v2573_v45  ;;  %v2241_v44 = vpop.f32.mrf.mxu0 }
 0x5ce   : > { %2897 = vperm.xlu2 %4176, %v2238_v6   ;;  %3086 = vperm.xlu0 %4177, %v2802_v43  }
 0x5cf   : > { %v2575_v25 = vsub.f32 1.5, %v2574_v12  ;;  %v2391_v41 = vpop.f32.mrf.mxu1 }
 0x5d0   : > { %v4206_v38 = vpop.eup %4205  ;;  %v2392_v42 = vadd.f32 1e-05, %v2391_v41  ;;  %4074 = vmatmul.msk.f32.gmra.mxu0 %vm2076_vm2, %v2073_v0  ;;  %v2833_v45 = vpop.permute.xlu1 %2832 }
 0x5d1   : > { %v2582_v1 = vmul.f32 %v4206_v38, %v2389_v29  ;;  %v2576_v6 = vmul.f32 %v4204_v5, %v2575_v25  ;;  %vm2588_vm12 = vweird.f32 %v4206_v38  ;;  %v2996_v25 = vsub.f32 %v5103_v51, %v2833_v45 }
 0x5d2   : > { %4207 = vrsqrt.f32 %v2392_v42  ;;  %4107 = vmatmul.msk.f32.gmra.mxu1 %vm2076_vm2, %v2072_v17  ;;  %vm2589_vm14 = vmor %vm2587_vm13, %vm2588_vm12  ;;  %vm2597_vm1 = vweird.f32 %v2392_v42 }
 0x5d3   : > { %v2583_v50 = vmul.f32 %v4206_v38, %v2582_v1  ;;  %v2580_v31 = vsel %vm2579_vm11, %v4204_v5, %v2576_v6 }
 0x5d4   : > { %v2803_v27 = vmul.f32 %v2580_v31, %v2310_v19 }
 0x5d5   : > { %v2584_v12 = vmul.f32 0.5, %v2583_v50  ;;  %v2244_v43 = vpop.f32.mrf.mxu0  ;;  %v2311_v50 = vld [vmem:[%s6013_s5 + $0x68] sm:$0xff] }
 0x5d6   : > { %3091 = vperm.xlu1 %4178, %v2803_v27   ;;  %2902 = vperm.xlu0 %4177, %v2241_v44   ;;  %v5726_v27 = vpop.permute.xlu0 %3409 }
 0x5d7   : > { %v2585_v41 = vsub.f32 1.5, %v2584_v12  ;;  %v2394_v49 = vpop.f32.mrf.mxu1  ;;  %6072 = vst [vmem:[#allocation29_spill] sm:$0xff] %v5726_v27 }
 0x5d8   : > { %v4208_v17 = vpop.eup %4207  ;;  %v2395_v1 = vadd.f32 1e-05, %v2394_v49  ;;  %v3037_v5 = vpop.permute.xlu2 %3036  ;;  %4075 = vmatmul.msk.f32.gmra.mxu0 %vm2076_vm2, %v2074_v16 }
 0x5d9   : > { %v2592_v19 = vmul.f32 %v4208_v17, %v2392_v42  ;;  %v3200_v6 = vmul.f32 %v3037_v5, %v2996_v25  ;;  %v2586_v31 = vmul.f32 %v4206_v38, %v2585_v41  ;;  %vm2598_vm0 = vweird.f32 %v4208_v17 }
 0x5da   : > { %4209 = vrsqrt.f32 %v2395_v1  ;;  %4108 = vmatmul.msk.f32.gmra.mxu1 %vm2076_vm2, %v2073_v0  ;;  %vm2599_vm3 = vmor %vm2597_vm1, %vm2598_vm0  ;;  %v2995_v42 = vsub.f32 %v5098_v53, %v5697_v34  ;;  %vm2607_vm5 = vweird.f32 %v2395_v1  ;;  %v2313_v53 = vld [vmem:[%s6013_s5 + $0x78] sm:$0xff] }
 0x5db   : > { %v2593_v51 = vmul.f32 %v4208_v17, %v2592_v19  ;;  %v3438_v49 = vadd.f32 %v5578_v60, %v3200_v6  ;;  %v2590_v29 = vsel %vm2589_vm14, %v4206_v38, %v2586_v31  ;;  %v2312_v38 = vld [vmem:[%s6013_s5 + $0x70] sm:$0xff] }
 0x5dc   : > { %v2804_v44 = vmul.f32 %v2590_v29, %v2311_v50 }
 0x5dd   : > { %v2594_v45 = vmul.f32 0.5, %v2593_v51  ;;  %vm3472_vm15 = vcmp.ge.f32.partialorder %v3438_v49, 0.0  ;;  %v3506_v12 = vmul.f32 0.2, %v3438_v49  ;;  %v2247_v25 = vpop.f32.mrf.mxu0 }
 0x5de   : > { %3096 = vperm.xlu2 %4176, %v2804_v44   ;;  %2907 = vperm.xlu1 %4178, %v2244_v43   ;;  %v5738_v50 = vpop.permute.xlu0 %2992 }
 0x5df   : > { %v2595_v5 = vsub.f32 1.5, %v2594_v45  ;;  %v3540_v41 = vsel %vm3472_vm15, %v3438_v49, %v3506_v12  ;;  %v2397_v27 = vpop.f32.mrf.mxu1 }
 0x5e0   : > { %v4210_v23 = vpop.eup %4209  ;;  %3574 = vst [vmem:[%s5731_s8 + $0x8] sm:$0xff] %v3540_v41  ;;  %v2398_v0 = vadd.f32 1e-05, %v2397_v27  ;;  %v5742_v45 = vpop.permute.xlu2 %2857 }
 0x5e1   : > { %v2602_v60 = vmul.f32 %v4210_v23, %v2395_v1  ;;  %v2596_v19 = vmul.f32 %v4208_v17, %v2595_v5  ;;  %vm2608_vm4 = vweird.f32 %v4210_v23 }
 0x5e2   : > { %4211 = vrsqrt.f32 %v2398_v0  ;;  %4109 = vmatmul.msk.f32.gmra.mxu1 %vm2076_vm2, %v2074_v16  ;;  %vm2609_vm6 = vmor %vm2607_vm5, %vm2608_vm4  ;;  %vm2617_vm8 = vweird.f32 %v2398_v0 }
 0x5e3   : > { %v2603_v43 = vmul.f32 %v4210_v23, %v2602_v60  ;;  %v2600_v6 = vsel %vm2599_vm3, %v4208_v17, %v2596_v19 }
 0x5e4   : > { %v2805_v31 = vmul.f32 %v2600_v6, %v2312_v38 }
 0x5e5   : > { %v2604_v51 = vmul.f32 0.5, %v2603_v43  ;;  %v2250_v49 = vpop.f32.mrf.mxu0 }
 0x5e6   : > { %3101 = vperm.xlu0 %4177, %v2805_v31   ;;  %2912 = vperm.xlu2 %4176, %v2247_v25   ;;  %v4247_v25 = vld [vmem:[%s6012_s4 + $0x108] sm:$0xff] }
 0x5e7   : > { %v2605_v27 = vsub.f32 1.5, %v2604_v51  ;;  %v2400_v29 = vpop.f32.mrf.mxu1 }
 0x5e8   : > { %v4212_v44 = vpop.eup %4211  ;;  %v5744_v12 = vadd.f32 1e-05, %v2400_v29  ;;  %v3032_v16 = vpop.permute.xlu1 %3031 }
 0x5e9   : > { %v2612_v17 = vmul.f32 %v4212_v44, %v2398_v0  ;;  %v3199_v5 = vmul.f32 %v3032_v16, %v2995_v42  ;;  %v2606_v34 = vmul.f32 %v4210_v23, %v2605_v27  ;;  %v2848_v38 = vpop.permute.xlu0 %2847  ;;  %v2997_v0 = vsub.f32 %v5107_v15, %v5694_v61  ;;  %v2315_v15 = vld [vmem:[%s6013_s5 + $0x88] sm:$0xff] }
 0x5ea   : > { %4213 = vrsqrt.f32 %v5744_v12  ;;  %4110 = vmatmul.msk.f32.gmra.mxu1 %vm2076_vm2, %v4247_v25  ;;  %v2999_v29 = vsub.f32 %v5115_v57, %v2848_v38  ;;  %vm2618_vm2 = vweird.f32 %v4212_v44  ;;  %vm2627_vm12 = vweird.f32 %v5744_v12 }
 0x5eb   : > { %v2613_v41 = vmul.f32 %v4212_v44, %v2612_v17  ;;  %v3437_v60 = vadd.f32 %v5534_v39, %v3199_v5  ;;  %v2610_v1 = vsel %vm2609_vm6, %v4210_v23, %v2606_v34  ;;  %vm2619_vm9 = vmor %vm2617_vm8, %vm2618_vm2 }
 0x5ec   : > { %v2806_v6 = vmul.f32 %v2610_v1, %v2313_v53 }
 0x5ed   : > { %v2614_v19 = vmul.f32 0.5, %v2613_v41  ;;  %vm3471_vm7 = vcmp.ge.f32.partialorder %v3437_v60, 0.0  ;;  %v3505_v43 = vmul.f32 0.2, %v3437_v60  ;;  %v2253_v31 = vpop.f32.mrf.mxu0 }
 0x5ee   : > { %2917 = vperm.xlu0 %4177, %v2250_v49   ;;  %3106 = vperm.xlu1 %4178, %v2806_v6   ;;  %v2314_v49 = vld [vmem:[%s6013_s5 + $0x80] sm:$0xff] }
 0x5ef   : > { %v2615_v51 = vsub.f32 1.5, %v2614_v19  ;;  %v3539_v42 = vsel %vm3471_vm7, %v3437_v60, %v3505_v43  ;;  %v2403_v16 = vpop.f32.mrf.mxu1 }
 0x5f0   : > { %v4214_v27 = vpop.eup %4213  ;;  %3573 = vst [vmem:[%s5731_s8] sm:$0xff] %v3539_v42  ;;  %v5757_v17 = vadd.f32 1e-05, %v2403_v16  ;;  %v3052_v39 = vpop.permute.xlu2 %3051 }
 0x5f1   : > { %v2622_v23 = vmul.f32 %v4214_v27, %v5744_v12  ;;  %v3203_v5 = vmul.f32 %v3052_v39, %v2999_v29  ;;  %v2616_v25 = vmul.f32 %v4212_v44, %v2615_v51  ;;  %v5767_v6 = vpop.permute.xlu1 %2852  ;;  %vm2628_vm11 = vweird.f32 %v4214_v27 }
 0x5f2   : > { %4215 = vrsqrt.f32 %v5757_v17  ;;  %vm2629_vm13 = vmor %vm2627_vm12, %vm2628_vm11  ;;  %v2998_v12 = vsub.f32 %v5111_v30, %v5708_v2  ;;  %vm2637_vm0 = vweird.f32 %v5757_v17  ;;  %v2316_v30 = vld [vmem:[%s6013_s5 + $0x90] sm:$0xff] }
 0x5f3   : > { %v2623_v57 = vmul.f32 %v4214_v27, %v2622_v23  ;;  %v3441_v53 = vadd.f32 %v5596_v26, %v3203_v5  ;;  %v2620_v34 = vsel %vm2619_vm9, %v4212_v44, %v2616_v25 }
 0x5f4   : > { %v2807_v38 = vmul.f32 %v2620_v34, %v2314_v49 }
 0x5f5   : > { %v2624_v41 = vmul.f32 0.5, %v2623_v57  ;;  %vm3475_vm10 = vcmp.ge.f32.partialorder %v3441_v53, 0.0  ;;  %v3509_v60 = vmul.f32 0.2, %v3441_v53  ;;  %v2256_v1 = vpop.f32.mrf.mxu0 }
 0x5f6   : > { %3111 = vperm.xlu2 %4176, %v2807_v38   ;;  %2922 = vperm.xlu1 %4178, %v2253_v31  }
 0x5f7   : > { %v2625_v19 = vsub.f32 1.5, %v2624_v41  ;;  %v3543_v43 = vsel %vm3475_vm10, %v3441_v53, %v3509_v60  ;;  %v2406_v51 = vpop.f32.mrf.mxu1 }
 0x5f8   : > { %v4216_v42 = vpop.eup %4215  ;;  %3577 = vst [vmem:[%s5731_s8 + $0x20] sm:$0xff] %v3543_v43  ;;  %v2407_v26 = vadd.f32 1e-05, %v2406_v51  ;;  %v5770_v44 = vpop.permute.xlu2 %2867 }
 0x5f9   : > { %v3042_v29 = vpop.permute.xlu0 %3041  ;;  %v2632_v16 = vmul.f32 %v4216_v42, %v5757_v17  ;;  %v2626_v61 = vmul.f32 %v4214_v27, %v2625_v19  ;;  %vm2638_vm15 = vweird.f32 %v4216_v42 }
 0x5fa   : > { %v3201_v39 = vmul.f32 %v3042_v29, %v2997_v0  ;;  %4217 = vrsqrt.f32 %v2407_v26  ;;  %vm2639_vm1 = vmor %vm2637_vm0, %vm2638_vm15  ;;  %vm2647_vm5 = vweird.f32 %v2407_v26 }
 0x5fb   : > { %v2633_v31 = vmul.f32 %v4216_v42, %v2632_v16  ;;  %v2630_v5 = vsel %vm2629_vm13, %v4214_v27, %v2626_v61 }
 0x5fc   : > { %v3439_v23 = vadd.f32 %v5547_v59, %v3201_v39  ;;  %v2808_v57 = vmul.f32 %v2630_v5, %v2315_v15 }
 0x5fd   : > { %v2634_v49 = vmul.f32 0.5, %v2633_v31  ;;  %v2259_v53 = vpop.f32.mrf.mxu0 }
 0x5fe   : > { %vm3473_vm14 = vcmp.ge.f32.partialorder %v3439_v23, 0.0  ;;  %v3507_v25 = vmul.f32 0.2, %v3439_v23  ;;  %3116 = vperm.xlu0 %4177, %v2808_v57   ;;  %2927 = vperm.xlu2 %4176, %v2256_v1  }
 0x5ff   : > { %v2635_v34 = vsub.f32 1.5, %v2634_v49  ;;  %v2409_v60 = vpop.f32.mrf.mxu1 }
 0x600   : > { %v3541_v41 = vsel %vm3473_vm14, %v3439_v23, %v3507_v25  ;;  %v4218_v38 = vpop.eup %4217  ;;  %v5781_v0 = vadd.f32 1e-05, %v2409_v60  ;;  %v5783_v59 = vpop.permute.xlu2 %2877 }
 0x601   : > { %3575 = vst [vmem:[%s5731_s8 + $0x10] sm:$0xff] %v3541_v41  ;;  %v3047_v27 = vpop.permute.xlu1 %3046  ;;  %v2642_v19 = vmul.f32 %v4218_v38, %v2407_v26  ;;  %v2636_v2 = vmul.f32 %v4216_v42, %v2635_v34  ;;  %vm2648_vm4 = vweird.f32 %v4218_v38 }
 0x602   : > { %v3202_v43 = vmul.f32 %v3047_v27, %v2998_v12  ;;  %4219 = vrsqrt.f32 %v5781_v0  ;;  %vm2649_vm6 = vmor %vm2647_vm5, %vm2648_vm4  ;;  %vm2657_vm8 = vweird.f32 %v5781_v0 }
 0x603   : > { %v2643_v1 = vmul.f32 %v4218_v38, %v2642_v19  ;;  %v2640_v29 = vsel %vm2639_vm1, %v4216_v42, %v2636_v2  ;;  %v2317_v42 = vld [vmem:[%s6013_s5 + $0x98] sm:$0xff] }
 0x604   : > { %v3440_v51 = vadd.f32 %v5542_v56, %v3202_v43  ;;  %v2809_v15 = vmul.f32 %v2640_v29, %v2316_v30 }
 0x605   : > { %v2644_v16 = vmul.f32 0.5, %v2643_v1  ;;  %v2262_v61 = vpop.f32.mrf.mxu0 }
 0x606   : > { %vm3474_vm3 = vcmp.ge.f32.partialorder %v3440_v51, 0.0  ;;  %v3508_v39 = vmul.f32 0.2, %v3440_v51  ;;  %2932 = vperm.xlu0 %4177, %v2259_v53   ;;  %3121 = vperm.xlu1 %4178, %v2809_v15  }
 0x607   : > { %v2645_v31 = vsub.f32 1.5, %v2644_v16  ;;  %v2412_v23 = vpop.f32.mrf.mxu1 }
 0x608   : > { %v3542_v17 = vsel %vm3474_vm3, %v3440_v51, %v3508_v39  ;;  %v4220_v5 = vpop.eup %4219  ;;  %v2413_v49 = vadd.f32 1e-05, %v2412_v23  ;;  %v3067_v34 = vpop.permute.xlu2 %3066  ;;  %v3000_v51 = vsub.f32 %v5119_v62, %v5767_v6 }
 0x609   : > { %3576 = vst [vmem:[%s5731_s8 + $0x18] sm:$0xff] %v3542_v17  ;;  %v2863_v25 = vpop.permute.xlu1 %2862  ;;  %v2652_v57 = vmul.f32 %v4220_v5, %v5781_v0  ;;  %v2646_v12 = vmul.f32 %v4218_v38, %v2645_v31  ;;  %vm2658_vm2 = vweird.f32 %v4220_v5  ;;  %v2318_v31 = vld [vmem:[%s6013_s5 + $0xa0] sm:$0xff] }
 0x60a   : > { %v3002_v56 = vsub.f32 %v5127_v8, %v2863_v25  ;;  %4221 = vrsqrt.f32 %v2413_v49  ;;  %vm2659_vm9 = vmor %vm2657_vm8, %vm2658_vm2  ;;  %vm2667_vm12 = vweird.f32 %v2413_v49 }
 0x60b   : > { %v2653_v53 = vmul.f32 %v4220_v5, %v2652_v57  ;;  %v2650_v60 = vsel %vm2649_vm6, %v4218_v38, %v2646_v12 }
 0x60c   : > { %v3206_v41 = vmul.f32 %v3067_v34, %v3002_v56  ;;  %v2810_v27 = vmul.f32 %v2650_v60, %v2317_v42  ;;  %v3001_v34 = vsub.f32 %v5123_v3, %v5742_v45 }
 0x60d   : > { %v2654_v19 = vmul.f32 0.5, %v2653_v53  ;;  %v2265_v26 = vpop.f32.mrf.mxu0 }
 0x60e   : > { %v3444_v43 = vadd.f32 %v5611_v4, %v3206_v41  ;;  %3126 = vperm.xlu2 %4176, %v2810_v27   ;;  %2937 = vperm.xlu1 %4178, %v2262_v61   ;;  %v2319_v27 = vld [vmem:[%s6013_s5 + $0xa8] sm:$0xff] }
 0x60f   : > { %v2655_v30 = vsub.f32 1.5, %v2654_v19  ;;  %v2415_v2 = vpop.f32.mrf.mxu1 }
 0x610   : > { %vm3478_vm7 = vcmp.ge.f32.partialorder %v3444_v43, 0.0  ;;  %v3512_v8 = vmul.f32 0.2, %v3444_v43  ;;  %v4222_v1 = vpop.eup %4221  ;;  %v5800_v29 = vadd.f32 1e-05, %v2415_v2  ;;  %v3057_v16 = vpop.permute.xlu0 %3056 }
 0x611   : > { %v2662_v38 = vmul.f32 %v4222_v1, %v2413_v49  ;;  %v5802_v15 = vpop.permute.xlu1 %2872  ;;  %v3204_v4 = vmul.f32 %v3057_v16, %v3000_v51  ;;  %v2656_v62 = vmul.f32 %v4220_v5, %v2655_v30  ;;  %vm2668_vm11 = vweird.f32 %v4222_v1  ;;  %v5813_v53 = vpop.permute.xlu2 %2887 }
 0x612   : > { %v3546_v39 = vsel %vm3478_vm7, %v3444_v43, %v3512_v8  ;;  %4223 = vrsqrt.f32 %v5800_v29  ;;  %vm2669_vm13 = vmor %vm2667_vm12, %vm2668_vm11  ;;  %v3005_v51 = vsub.f32 %v5177_v58, %v5783_v59  ;;  %vm2677_vm0 = vweird.f32 %v5800_v29 }
 0x613   : > { %3580 = vst [vmem:[%s5731_s8 + $0x38] sm:$0xff] %v3546_v39  ;;  %v2663_v61 = vmul.f32 %v4222_v1, %v2662_v38  ;;  %v3442_v6 = vadd.f32 %v5557_v63, %v3204_v4  ;;  %v2660_v23 = vsel %vm2659_vm9, %v4220_v5, %v2656_v62  ;;  %v2320_v62 = vld [vmem:[%s6013_s5 + $0xb0] sm:$0xff] }
 0x614   : > { %v2811_v56 = vmul.f32 %v2660_v23, %v2318_v31 }
 0x615   : > { %v2664_v17 = vmul.f32 0.5, %v2663_v61  ;;  %v2268_v25 = vpop.f32.mrf.mxu0  ;;  %vm3476_vm10 = vcmp.ge.f32.partialorder %v3442_v6, 0.0  ;;  %v3510_v57 = vmul.f32 0.2, %v3442_v6 }
 0x616   : > { %2942 = vperm.xlu2 %4176, %v2265_v26   ;;  %3131 = vperm.xlu0 %4177, %v2811_v56   ;;  %v3003_v56 = vsub.f32 %v5131_v13, %v5770_v44 }
 0x617   : > { %v2665_v42 = vsub.f32 1.5, %v2664_v17  ;;  %v2418_v0 = vpop.f32.mrf.mxu1  ;;  %v3544_v41 = vsel %vm3476_vm10, %v3442_v6, %v3510_v57 }
 0x618   : > { %v4224_v12 = vpop.eup %4223  ;;  %v2419_v63 = vadd.f32 1e-05, %v2418_v0  ;;  %3578 = vst [vmem:[%s5731_s8 + $0x28] sm:$0xff] %v3544_v41 }
 0x619   : > { %v2672_v5 = vmul.f32 %v4224_v12, %v5800_v29  ;;  %v3062_v60 = vpop.permute.xlu1 %3061  ;;  %v2666_v19 = vmul.f32 %v4222_v1, %v2665_v42  ;;  %vm2678_vm15 = vweird.f32 %v4224_v12 }
 0x61a   : > { %4225 = vrsqrt.f32 %v2419_v63  ;;  %v3205_v43 = vmul.f32 %v3062_v60, %v3001_v34  ;;  %vm2679_vm1 = vmor %vm2677_vm0, %vm2678_vm15  ;;  %vm2687_vm5 = vweird.f32 %v2419_v63 }
 0x61b   : > { %v2673_v26 = vmul.f32 %v4224_v12, %v2672_v5  ;;  %v2670_v3 = vsel %vm2669_vm13, %v4222_v1, %v2666_v19  ;;  %v2321_v19 = vld [vmem:[%s6013_s5 + $0xb8] sm:$0xff] }
 0x61c   : > { %v3443_v45 = vadd.f32 %v5551_v47, %v3205_v43  ;;  %v2812_v30 = vmul.f32 %v2670_v3, %v2319_v27 }
 0x61d   : > { %v2674_v8 = vmul.f32 0.5, %v2673_v26  ;;  %v2271_v49 = vpop.f32.mrf.mxu0 }
 0x61e   : > { %vm3477_vm14 = vcmp.ge.f32.partialorder %v3443_v45, 0.0  ;;  %v3511_v2 = vmul.f32 0.2, %v3443_v45  ;;  %3136 = vperm.xlu1 %4178, %v2812_v30   ;;  %2947 = vperm.xlu0 %4177, %v2268_v25  }
 0x61f   : > { %v2675_v16 = vsub.f32 1.5, %v2674_v8  ;;  %v2421_v38 = vpop.f32.mrf.mxu1 }
 0x620   : > { %v4226_v39 = vpop.eup %4225  ;;  %v3545_v4 = vsel %vm3477_vm14, %v3443_v45, %v3511_v2  ;;  %v2422_v61 = vadd.f32 1e-05, %v2421_v38  ;;  %v3082_v1 = vpop.permute.xlu2 %3081 }
 0x621   : > { %v2682_v47 = vmul.f32 %v4226_v39, %v2419_v63  ;;  %3579 = vst [vmem:[%s5731_s8 + $0x30] sm:$0xff] %v3545_v4  ;;  %v3209_v31 = vmul.f32 %v3082_v1, %v3005_v51  ;;  %v2676_v6 = vmul.f32 %v4224_v12, %v2675_v16  ;;  %vm2688_vm4 = vweird.f32 %v4226_v39  ;;  %v5832_v5 = vpop.permute.xlu1 %2882  ;;  %v2322_v1 = vld [vmem:[%s6013_s5 + $0xc0] sm:$0xff] }
 0x622   : > { %4227 = vrsqrt.f32 %v2422_v61  ;;  %vm2689_vm6 = vmor %vm2687_vm5, %vm2688_vm4  ;;  %v3004_v63 = vsub.f32 %v5183_v36, %v5802_v15  ;;  %vm2697_vm8 = vweird.f32 %v2422_v61 }
 0x623   : > { %v2683_v58 = vmul.f32 %v4226_v39, %v2682_v47  ;;  %v3447_v59 = vadd.f32 %v5628_v7, %v3209_v31  ;;  %v2680_v17 = vsel %vm2679_vm1, %v4224_v12, %v2676_v6 }
 0x624   : > { %v2813_v23 = vmul.f32 %v2680_v17, %v2320_v62 }
 0x625   : > { %v2684_v25 = vmul.f32 0.5, %v2683_v58  ;;  %vm3481_vm3 = vcmp.ge.f32.partialorder %v3447_v59, 0.0  ;;  %v3515_v57 = vmul.f32 0.2, %v3447_v59  ;;  %v2274_v29 = vpop.f32.mrf.mxu0 }
 0x626   : > { %3141 = vperm.xlu2 %4176, %v2813_v23   ;;  %2952 = vperm.xlu1 %4178, %v2271_v49  }
 0x627   : > { %v2685_v42 = vsub.f32 1.5, %v2684_v25  ;;  %v3549_v0 = vsel %vm3481_vm3, %v3447_v59, %v3515_v57  ;;  %v2424_v34 = vpop.f32.mrf.mxu1 }
 0x628   : > { %v4228_v41 = vpop.eup %4227  ;;  %3583 = vst [vmem:[%s5731_s8 + $0x50] sm:$0xff] %v3549_v0  ;;  %v2425_v7 = vadd.f32 1e-05, %v2424_v34  ;;  %v3072_v12 = vpop.permute.xlu0 %3071  ;;  %v2323_v0 = vld [vmem:[%s6013_s5 + $0xc8] sm:$0xff] }
 0x629   : > { %v2692_v60 = vmul.f32 %v4228_v41, %v2422_v61  ;;  %v3207_v27 = vmul.f32 %v3072_v12, %v3003_v56  ;;  %v2686_v43 = vmul.f32 %v4226_v39, %v2685_v42  ;;  %vm2698_vm2 = vweird.f32 %v4228_v41  ;;  %v5844_v31 = vpop.permute.xlu2 %2897 }
 0x62a   : > { %4229 = vrsqrt.f32 %v2425_v7  ;;  %vm2699_vm9 = vmor %vm2697_vm8, %vm2698_vm2  ;;  %vm2707_vm12 = vweird.f32 %v2425_v7 }
 0x62b   : > { %v2693_v13 = vmul.f32 %v4228_v41, %v2692_v60  ;;  %v3445_v44 = vadd.f32 %v5573_v20, %v3207_v27  ;;  %v2690_v26 = vsel %vm2689_vm6, %v4226_v39, %v2686_v43 }
 0x62c   : > { %v2814_v30 = vmul.f32 %v2690_v26, %v2321_v19 }
 0x62d   : > { %v2694_v3 = vmul.f32 0.5, %v2693_v13  ;;  %vm3479_vm7 = vcmp.ge.f32.partialorder %v3445_v44, 0.0  ;;  %v3513_v45 = vmul.f32 0.2, %v3445_v44  ;;  %v2277_v8 = vpop.f32.mrf.mxu0 }
 0x62e   : > { %2957 = vperm.xlu2 %4176, %v2274_v29   ;;  %3146 = vperm.xlu0 %4177, %v2814_v30  }
 0x62f   : > { %v2695_v49 = vsub.f32 1.5, %v2694_v3  ;;  %v3547_v2 = vsel %vm3479_vm7, %v3445_v44, %v3513_v45  ;;  %v2427_v51 = vpop.f32.mrf.mxu1  ;;  %v3006_v45 = vsub.f32 %v5170_v14, %v5832_v5 }
 0x630   : > { %v4230_v16 = vpop.eup %4229  ;;  %3581 = vst [vmem:[%s5731_s8 + $0x40] sm:$0xff] %v3547_v2  ;;  %v2428_v38 = vadd.f32 1e-05, %v2427_v51  ;;  %v3077_v4 = vpop.permute.xlu1 %3076  ;;  %v2324_v2 = vld [vmem:[%s6013_s5 + $0xd0] sm:$0xff] }
 0x631   : > { %v2702_v20 = vmul.f32 %v4230_v16, %v2425_v7  ;;  %v3208_v39 = vmul.f32 %v3077_v4, %v3004_v63  ;;  %v2696_v47 = vmul.f32 %v4228_v41, %v2695_v49  ;;  %vm2708_vm11 = vweird.f32 %v4230_v16 }
 0x632   : > { %4231 = vrsqrt.f32 %v2428_v38  ;;  %vm2709_vm13 = vmor %vm2707_vm12, %vm2708_vm11  ;;  %vm2717_vm0 = vweird.f32 %v2428_v38 }
 0x633   : > { %v2703_v36 = vmul.f32 %v4230_v16, %v2702_v20  ;;  %v3446_v15 = vadd.f32 %v5566_v33, %v3208_v39  ;;  %v2700_v62 = vsel %vm2699_vm9, %v4228_v41, %v2696_v47 }
 0x634   : > { %v2815_v6 = vmul.f32 %v2700_v62, %v2322_v1 }
 0x635   : > { %v2704_v58 = vmul.f32 0.5, %v2703_v36  ;;  %vm3480_vm10 = vcmp.ge.f32.partialorder %v3446_v15, 0.0  ;;  %v3514_v61 = vmul.f32 0.2, %v3446_v15  ;;  %v2280_v59 = vpop.f32.mrf.mxu0 }
 0x636   : > { %3151 = vperm.xlu1 %4178, %v2815_v6   ;;  %2962 = vperm.xlu0 %4177, %v2277_v8  }
 0x637   : > { %v2705_v17 = vsub.f32 1.5, %v2704_v58  ;;  %v3548_v23 = vsel %vm3480_vm10, %v3446_v15, %v3514_v61  ;;  %v2430_v25 = vpop.f32.mrf.mxu1 }
 0x638   : > { %v4232_v57 = vpop.eup %4231  ;;  %3582 = vst [vmem:[%s5731_s8 + $0x48] sm:$0xff] %v3548_v23  ;;  %v2431_v29 = vadd.f32 1e-05, %v2430_v25  ;;  %v2893_v56 = vpop.permute.xlu1 %2892 }
 0x639   : > { %v2712_v42 = vmul.f32 %v4232_v57, %v2428_v38  ;;  %v3008_v33 = vsub.f32 %v5155_v52, %v2893_v56  ;;  %v2706_v34 = vmul.f32 %v4230_v16, %v2705_v17  ;;  %v3097_v41 = vpop.permute.xlu2 %3096  ;;  %vm2718_vm15 = vweird.f32 %v4232_v57 }
 0x63a   : > { %4233 = vrsqrt.f32 %v2431_v29  ;;  %vm2719_vm1 = vmor %vm2717_vm0, %vm2718_vm15  ;;  %v3007_v38 = vsub.f32 %v5161_v48, %v5813_v53  ;;  %vm2727_vm5 = vweird.f32 %v2431_v29 }
 0x63b   : > { %v2713_v12 = vmul.f32 %v4232_v57, %v2712_v42  ;;  %v3212_v60 = vmul.f32 %v3097_v41, %v3008_v33  ;;  %v2710_v27 = vsel %vm2709_vm13, %v4230_v16, %v2706_v34 }
 0x63c   : > { %v2816_v19 = vmul.f32 %v2710_v27, %v2323_v0 }
 0x63d   : > { %v2714_v43 = vmul.f32 0.5, %v2713_v12  ;;  %v3450_v13 = vadd.f32 %v5642_v46, %v3212_v60  ;;  %v2283_v7 = vpop.f32.mrf.mxu0 }
 0x63e   : > { %3156 = vperm.xlu2 %4176, %v2816_v19   ;;  %2967 = vperm.xlu1 %4178, %v2280_v59   ;;  %v2325_v59 = vld [vmem:[%s6013_s5 + $0xd8] sm:$0xff] }
 0x63f   : > { %v2715_v52 = vsub.f32 1.5, %v2714_v43  ;;  %vm3484_vm14 = vcmp.ge.f32.partialorder %v3450_v13, 0.0  ;;  %v3518_v44 = vmul.f32 0.2, %v3450_v13  ;;  %v2433_v26 = vpop.f32.mrf.mxu1  ;;  %v2326_v43 = vld [vmem:[%s6013_s5 + $0xe0] sm:$0xff] }
 0x640   : > { %v4234_v3 = vpop.eup %4233  ;;  %v2434_v30 = vadd.f32 1e-05, %v2433_v26  ;;  %v3087_v49 = vpop.permute.xlu0 %3086 }
 0x641   : > { %v2722_v8 = vmul.f32 %v4234_v3, %v2431_v29  ;;  %v3552_v63 = vsel %vm3484_vm14, %v3450_v13, %v3518_v44  ;;  %v3210_v46 = vmul.f32 %v3087_v49, %v3006_v45  ;;  %v2716_v51 = vmul.f32 %v4232_v57, %v2715_v52  ;;  %v5868_v48 = vpop.permute.xlu2 %2912 }
 0x642   : > { %3586 = vst [vmem:[%s5731_s8 + $0x68] sm:$0xff] %v3552_v63  ;;  %4235 = vrsqrt.f32 %v2434_v30  ;;  %vm2728_vm4 = vweird.f32 %v4234_v3  ;;  %vm2737_vm8 = vweird.f32 %v2434_v30 }
 0x643   : > { %v2723_v16 = vmul.f32 %v4234_v3, %v2722_v8  ;;  %v3448_v4 = vadd.f32 %v5587_v21, %v3210_v46  ;;  %v2720_v20 = vsel %vm2719_vm1, %v4232_v57, %v2716_v51  ;;  %vm2729_vm6 = vmor %vm2727_vm5, %vm2728_vm4 }
 0x644   : > { %v2817_v5 = vmul.f32 %v2720_v20, %v2324_v2 }
 0x645   : > { %v2724_v14 = vmul.f32 0.5, %v2723_v16  ;;  %vm3482_vm3 = vcmp.ge.f32.partialorder %v3448_v4, 0.0  ;;  %v3516_v39 = vmul.f32 0.2, %v3448_v4  ;;  %v2286_v36 = vpop.f32.mrf.mxu0 }
 0x646   : > { %2972 = vperm.xlu2 %4176, %v2283_v7   ;;  %3161 = vperm.xlu0 %4177, %v2817_v5  }
 0x647   : > { %v2725_v1 = vsub.f32 1.5, %v2724_v14  ;;  %v2436_v47 = vpop.f32.mrf.mxu1  ;;  %v3550_v62 = vsel %vm3482_vm3, %v3448_v4, %v3516_v39 }
 0x648   : > { %v4236_v15 = vpop.eup %4235  ;;  %v5862_v6 = vadd.f32 1e-05, %v2436_v47  ;;  %v3092_v21 = vpop.permute.xlu1 %3091  ;;  %3584 = vst [vmem:[%s5731_s8 + $0x58] sm:$0xff] %v3550_v62 }
 0x649   : > { %v2732_v58 = vmul.f32 %v4236_v15, %v2434_v30  ;;  %v3211_v61 = vmul.f32 %v3092_v21, %v3007_v38  ;;  %v2726_v17 = vmul.f32 %v4234_v3, %v2725_v1  ;;  %vm2738_vm2 = vweird.f32 %v4236_v15  ;;  %v5873_v41 = vpop.permute.xlu0 %2902 }
 0x64a   : > { %4237 = vrsqrt.f32 %v5862_v6  ;;  %vm2739_vm9 = vmor %vm2737_vm8, %vm2738_vm2  ;;  %vm2747_vm12 = vweird.f32 %v5862_v6  ;;  %v3010_v21 = vsub.f32 %v5144_v37, %v5873_v41 }
 0x64b   : > { %v2733_v53 = vmul.f32 %v4236_v15, %v2732_v58  ;;  %v3449_v23 = vadd.f32 %v5580_v55, %v3211_v61  ;;  %v2730_v25 = vsel %vm2729_vm6, %v4234_v3, %v2726_v17 }
 0x64c   : > { %v2818_v57 = vmul.f32 %v2730_v25, %v2325_v59  ;;  %v2328_v59 = vld [vmem:[%s6013_s5 + $0xf0] sm:$0xff] }
 0x64d   : > { %v2734_v29 = vmul.f32 0.5, %v2733_v53  ;;  %vm3483_vm7 = vcmp.ge.f32.partialorder %v3449_v23, 0.0  ;;  %v3517_v56 = vmul.f32 0.2, %v3449_v23  ;;  %v2289_v19 = vpop.f32.mrf.mxu0 }
 0x64e   : > { %3166 = vperm.xlu1 %4178, %v2818_v57   ;;  %2977 = vperm.xlu0 %4177, %v2286_v36  }
 0x64f   : > { %v2735_v42 = vsub.f32 1.5, %v2734_v29  ;;  %v3551_v33 = vsel %vm3483_vm7, %v3449_v23, %v3517_v56  ;;  %v2439_v0 = vpop.f32.mrf.mxu1 }
 0x650   : > { %v4238_v34 = vpop.eup %4237  ;;  %3585 = vst [vmem:[%s5731_s8 + $0x60] sm:$0xff] %v3551_v33  ;;  %v2440_v12 = vadd.f32 1e-05, %v2439_v0  ;;  %v2908_v60 = vpop.permute.xlu1 %2907 }
 0x651   : > { %v2742_v55 = vmul.f32 %v4238_v34, %v5862_v6  ;;  %v3011_v27 = vsub.f32 %v5174_v9, %v2908_v60  ;;  %v2736_v13 = vmul.f32 %v4236_v15, %v2735_v42  ;;  %v3112_v7 = vpop.permute.xlu2 %3111  ;;  %v3009_v9 = vsub.f32 %v5148_v24, %v5844_v31 }
 0x652   : > { %4239 = vrsqrt.f32 %v2440_v12  ;;  %vm2748_vm11 = vweird.f32 %v4238_v34  ;;  %vm2757_vm0 = vweird.f32 %v2440_v12 }
 0x653   : > { %v2743_v52 = vmul.f32 %v4238_v34, %v2742_v55  ;;  %v3215_v44 = vmul.f32 %v3112_v7, %v3011_v27  ;;  %v2740_v26 = vsel %vm2739_vm9, %v4236_v15, %v2736_v13  ;;  %vm2749_vm13 = vmor %vm2747_vm12, %vm2748_vm11 }
 0x654   : > { %v2819_v3 = vmul.f32 %v2740_v26, %v2326_v43 }
 0x655   : > { %v2744_v45 = vmul.f32 0.5, %v2743_v52  ;;  %v3453_v30 = vadd.f32 %v5660_v10, %v3215_v44  ;;  %v2327_v10 = vld [vmem:[%s6013_s5 + $0xe8] sm:$0xff]  ;;  %v2292_v5 = vpop.f32.mrf.mxu0 }
 0x656   : > { %3171 = vperm.xlu2 %4176, %v2819_v3   ;;  %2982 = vperm.xlu1 %4178, %v2289_v19  }
 0x657   : > { %v2745_v8 = vsub.f32 1.5, %v2744_v45  ;;  %vm3487_vm10 = vcmp.ge.f32.partialorder %v3453_v30, 0.0  ;;  %v3521_v63 = vmul.f32 0.2, %v3453_v30  ;;  %v2442_v49 = vpop.f32.mrf.mxu1 }
 0x658   : > { %v4240_v46 = vpop.eup %4239  ;;  %v2443_v2 = vadd.f32 1e-05, %v2442_v49  ;;  %v3102_v51 = vpop.permute.xlu0 %3101 }
 0x659   : > { %v2752_v16 = vmul.f32 %v4240_v46, %v2440_v12  ;;  %v3555_v4 = vsel %vm3487_vm10, %v3453_v30, %v3521_v63  ;;  %v3213_v20 = vmul.f32 %v3102_v51, %v3009_v9  ;;  %v2746_v24 = vmul.f32 %v4238_v34, %v2745_v8  ;;  %v5896_v25 = vpop.permute.xlu2 %2927 }
 0x65a   : > { %3589 = vst [vmem:[%s5731_s8 + $0x80] sm:$0xff] %v3555_v4  ;;  %4241 = vrsqrt.f32 %v2443_v2  ;;  %vm2758_vm15 = vweird.f32 %v4240_v46  ;;  %vm2767_vm5 = vweird.f32 %v2443_v2  ;;  %v3012_v8 = vsub.f32 %v5196_v28, %v5868_v48  ;;  %v3266_v28 = vld [vmem:[%s6014_s6 + $0x108] sm:$0xff] }
 0x65b   : > { %v2753_v31 = vmul.f32 %v4240_v46, %v2752_v16  ;;  %v3451_v14 = vadd.f32 %v5604_v35, %v3213_v20  ;;  %v2750_v39 = vsel %vm2749_vm13, %v4238_v34, %v2746_v24  ;;  %vm2759_vm1 = vmor %vm2757_vm0, %vm2758_vm15 }
 0x65c   : > { %v2820_v47 = vmul.f32 %v2750_v39, %v2327_v10 }
 0x65d   : > { %v2754_v38 = vmul.f32 0.5, %v2753_v31  ;;  %vm3485_vm14 = vcmp.ge.f32.partialorder %v3451_v14, 0.0  ;;  %v3519_v1 = vmul.f32 0.2, %v3451_v14 }
 0x65e   : > { %2987 = vperm.xlu2 %4176, %v2292_v5   ;;  %3176 = vperm.xlu0 %4177, %v2820_v47  }
 0x65f   : > { %v2755_v36 = vsub.f32 1.5, %v2754_v38  ;;  %v3553_v15 = vsel %vm3485_vm14, %v3451_v14, %v3519_v1  ;;  %v2445_v62 = vpop.f32.mrf.mxu1 }
 0x660   : > { %v4242_v6 = vpop.eup %4241  ;;  %3587 = vst [vmem:[%s5731_s8 + $0x70] sm:$0xff] %v3553_v15  ;;  %v2446_v58 = vadd.f32 1e-05, %v2445_v62  ;;  %v3107_v61 = vpop.permute.xlu1 %3106 }
 0x661   : > { %v2762_v35 = vmul.f32 %v4242_v6, %v2443_v2  ;;  %v2756_v17 = vmul.f32 %v4240_v46, %v2755_v36  ;;  %v3214_v53 = vmul.f32 %v3107_v61, %v3010_v21  ;;  %vm2768_vm4 = vweird.f32 %v4242_v6  ;;  %v2918_v55 = vpop.permute.xlu0 %2917  ;;  %v3264_v36 = vld [vmem:[%s6014_s6 + $0xf8] sm:$0xff]  ;;  %v6073_v61 = vld [vmem:[#allocation15_spill] sm:$0xff] }
 0x662   : > { %4243 = vrsqrt.f32 %v2446_v58  ;;  %vm2769_vm6 = vmor %vm2767_vm5, %vm2768_vm4  ;;  %vm2777_vm8 = vweird.f32 %v2446_v58  ;;  %v3013_v14 = vsub.f32 %v5212_v40, %v2918_v55 }
 0x663   : > { %v2763_v23 = vmul.f32 %v4242_v6, %v2762_v35  ;;  %v2760_v57 = vsel %vm2759_vm1, %v4240_v46, %v2756_v17  ;;  %v3452_v37 = vadd.f32 %v5599_v32, %v3214_v53  ;;  %v2329_v32 = vld [vmem:[%s6013_s5 + $0xf8] sm:$0xff]  ;;  %v2330_v46 = vld [vmem:[%s6013_s5 + $0x100] sm:$0xff] }
 0x664   : > { %v2821_v29 = vmul.f32 %v2760_v57, %v2328_v59  ;;  %v3265_v53 = vld [vmem:[%s6014_s6 + $0x100] sm:$0xff]  ;;  %v6074_v57 = vld [vmem:[#allocation27_spill] sm:$0xff] }
 0x665   : > { %v2764_v56 = vmul.f32 0.5, %v2763_v23  ;;  %vm3486_vm3 = vcmp.ge.f32.partialorder %v3452_v37, 0.0  ;;  %v3520_v42 = vmul.f32 0.2, %v3452_v37 }
 0x666   : > { %3181 = vperm.xlu1 %4178, %v2821_v29   ;;  %v6075_v29 = vld [vmem:[#allocation13_spill] sm:$0xff] }
 0x667   : > { %v2765_v33 = vsub.f32 1.5, %v2764_v56  ;;  %v2448_v0 = vpop.f32.mrf.mxu1  ;;  %v3554_v41 = vsel %vm3486_vm3, %v3452_v37, %v3520_v42  ;;  %v3015_v56 = vsub.f32 %v6075_v29, %v5896_v25 }
 0x668   : > { %v4244_v34 = vpop.eup %4243  ;;  %v2449_v12 = vadd.f32 1e-05, %v2448_v0  ;;  %3588 = vst [vmem:[%s5731_s8 + $0x78] sm:$0xff] %v3554_v41  ;;  %v2923_v27 = vpop.permute.xlu1 %2922 }
 0x669   : > { %v2772_v60 = vmul.f32 %v4244_v34, %v2446_v58  ;;  %v2766_v19 = vmul.f32 %v4242_v6, %v2765_v33  ;;  %v3014_v43 = vsub.f32 %v5228_v22, %v2923_v27  ;;  %v3127_v7 = vpop.permute.xlu2 %3126  ;;  %vm2778_vm7 = vweird.f32 %v4244_v34 }
 0x66a   : > { %4245 = vrsqrt.f32 %v2449_v12  ;;  %vm2779_vm9 = vmor %vm2777_vm8, %vm2778_vm7  ;;  %vm2787_vm12 = vweird.f32 %v2449_v12 }
 0x66b   : > { %v2773_v13 = vmul.f32 %v4244_v34, %v2772_v60  ;;  %v2770_v52 = vsel %vm2769_vm6, %v4242_v6, %v2766_v19  ;;  %v3218_v44 = vmul.f32 %v3127_v7, %v3014_v43 }
 0x66c   : > { %v2822_v26 = vmul.f32 %v2770_v52, %v2329_v32 }
 0x66d   : > { %v2774_v3 = vmul.f32 0.5, %v2773_v13  ;;  %v3456_v45 = vadd.f32 %v5675_v18, %v3218_v44  ;;  %v6078_v13 = vld [vmem:[#allocation12_spill] sm:$0xff] }
 0x66e   : > { %3186 = vperm.xlu2 %4176, %v2822_v26  }
 0x66f   : > { %v2775_v30 = vsub.f32 1.5, %v2774_v3  ;;  %vm3490_vm2 = vcmp.ge.f32.partialorder %v3456_v45, 0.0  ;;  %v3524_v63 = vmul.f32 0.2, %v3456_v45  ;;  %v6079_v3 = vld [vmem:[#allocation5_spill] sm:$0xff] }
 0x670   : > { %v4246_v9 = vpop.eup %4245  ;;  %v3117_v49 = vpop.permute.xlu0 %3116 }
 0x671   : > { %v2782_v22 = vmul.f32 %v4246_v9, %v2449_v12  ;;  %v2776_v2 = vmul.f32 %v4244_v34, %v2775_v30  ;;  %v3558_v18 = vsel %vm3490_vm2, %v3456_v45, %v3524_v63  ;;  %v3216_v51 = vmul.f32 %v3117_v49, %v3012_v8  ;;  %v2943_v47 = vpop.permute.xlu2 %2942  ;;  %v6077_v12 = vld [vmem:[#allocation14_spill] sm:$0xff]  ;;  %v6080_v8 = vld [vmem:[#allocation28_spill] sm:$0xff] }
 0x672   : > { %3592 = vst [vmem:[%s5731_s8 + $0x98] sm:$0xff] %v3558_v18  ;;  %vm2788_vm11 = vweird.f32 %v4246_v9  ;;  %v6081_v49 = vld [vmem:[#allocation16_spill] sm:$0xff] }
 0x673   : > { %v2783_v16 = vmul.f32 %v4246_v9, %v2782_v22  ;;  %v2780_v4 = vsel %vm2779_vm9, %v4244_v34, %v2776_v2  ;;  %v3454_v48 = vadd.f32 %v5618_v54, %v3216_v51  ;;  %v2331_v54 = vld [vmem:[%s6013_s5 + $0x108] sm:$0xff]  ;;  %vm2789_vm13 = vmor %vm2787_vm12, %vm2788_vm11  ;;  %v6076_v34 = vld [vmem:[#allocation7_spill] sm:$0xff] }
 0x674   : > { %v2823_v20 = vmul.f32 %v2780_v4, %v2330_v46  ;;  %v3018_v46 = vsub.f32 %v6081_v49, %v2943_v47 }
 0x675   : > { %v2784_v10 = vmul.f32 0.5, %v2783_v16  ;;  %vm3488_vm10 = vcmp.ge.f32.partialorder %v3454_v48, 0.0  ;;  %v3522_v24 = vmul.f32 0.2, %v3454_v48  ;;  %v6082_v16 = vld [vmem:[#allocation22_spill] sm:$0xff] }
 0x676   : > { %3191 = vperm.xlu0 %4177, %v2823_v20   ;;  %3434 = vperm.xlu2 %4176, %v3266_v28  }
 0x677   : > { %v2785_v31 = vsub.f32 1.5, %v2784_v10  ;;  %v3556_v5 = vsel %vm3488_vm10, %v3454_v48, %v3522_v24  ;;  %v6083_v48 = vld [vmem:[#allocation17_spill] sm:$0xff] }
 0x678   : > { %3590 = vst [vmem:[%s5731_s8 + $0x88] sm:$0xff] %v3556_v5  ;;  %v3122_v38 = vpop.permute.xlu1 %3121  ;;  %v2933_v35 = vpop.permute.xlu0 %2932  ;;  %v6084_v5 = vld [vmem:[#allocation11_spill] sm:$0xff] }
 0x679   : > { %v2786_v39 = vmul.f32 %v4246_v9, %v2785_v31  ;;  %v3217_v1 = vmul.f32 %v3122_v38, %v3013_v14  ;;  %v3016_v60 = vsub.f32 %v6077_v12, %v2933_v35  ;;  %v6087_v35 = vld [vmem:[#allocation10_spill] sm:$0xff] }
 0x67b   : > { %v2790_v15 = vsel %vm2789_vm13, %v4246_v9, %v2786_v39  ;;  %v3455_v40 = vadd.f32 %v5613_v11, %v3217_v1 }
 0x67c   : > { %v2824_v62 = vmul.f32 %v2790_v15, %v2331_v54 }
 0x67d   : > { %vm3489_vm14 = vcmp.ge.f32.partialorder %v3455_v40, 0.0  ;;  %v3523_v6 = vmul.f32 0.2, %v3455_v40 }
 0x67e   : > { %3424 = vperm.xlu0 %4177, %v3264_v36   ;;  %3196 = vperm.xlu1 %4178, %v2824_v62   ;;  %v6085_v36 = vld [vmem:[#allocation21_spill] sm:$0xff] }
 0x67f   : > { %v3557_v21 = vsel %vm3489_vm14, %v3455_v40, %v3523_v6  ;;  %v6086_v6 = vld [vmem:[#allocation29_spill] sm:$0xff] }
 0x680   : > { %3591 = vst [vmem:[%s5731_s8 + $0x90] sm:$0xff] %v3557_v21  ;;  %v2938_v58 = vpop.permute.xlu1 %2937  ;;  %v3142_v17 = vpop.permute.xlu2 %3141 }
 0x681   : > { %v3017_v59 = vsub.f32 %v6073_v61, %v2938_v58 }
 0x683   : > { %v3221_v23 = vmul.f32 %v3142_v17, %v3017_v59 }
 0x685   : > { %v3459_v11 = vadd.f32 %v6074_v57, %v3221_v23  ;;  %v6088_v23 = vld [vmem:[#allocation24_spill] sm:$0xff] }
 0x686   : > { %3429 = vperm.xlu1 %4178, %v3265_v53  }
 0x687   : > { %vm3493_vm15 = vcmp.ge.f32.partialorder %v3459_v11, 0.0  ;;  %v3527_v37 = vmul.f32 0.2, %v3459_v11 }
 0x688   : > { %v3132_v33 = vpop.permute.xlu0 %3131  ;;  %v2958_v43 = vpop.permute.xlu2 %2957 }
 0x689   : > { %v3561_v42 = vsel %vm3493_vm15, %v3459_v11, %v3527_v37  ;;  %v3219_v0 = vmul.f32 %v3132_v33, %v3015_v56  ;;  %v3021_v61 = vsub.f32 %v6087_v35, %v2958_v43  ;;  %v6089_v37 = vld [vmem:[#allocation6_spill] sm:$0xff] }
 0x68a   : > { %3595 = vst [vmem:[%s5731_s8 + $0xb0] sm:$0xff] %v3561_v42 }
 0x68b   : > { %v3457_v41 = vadd.f32 %v6076_v34, %v3219_v0  ;;  %v6090_v0 = vld [vmem:[#allocation23_spill] sm:$0xff] }
 0x68d   : > { %vm3491_vm0 = vcmp.ge.f32.partialorder %v3457_v41, 0.0  ;;  %v3525_v55 = vmul.f32 0.2, %v3457_v41 }
 0x68f   : > { %v3559_v32 = vsel %vm3491_vm0, %v3457_v41, %v3525_v55  ;;  %v6091_v55 = vld [vmem:[#allocation20_spill] sm:$0xff] }
 0x690   : > { %v3137_v27 = vpop.permute.xlu1 %3136  ;;  %3593 = vst [vmem:[%s5731_s8 + $0xa0] sm:$0xff] %v3559_v32  ;;  %v2948_v26 = vpop.permute.xlu0 %2947 }
 0x691   : > { %v3220_v19 = vmul.f32 %v3137_v27, %v3016_v60  ;;  %v3019_v20 = vsub.f32 %v6083_v48, %v2948_v26 }
 0x693   : > { %v3458_v7 = vadd.f32 %v6078_v13, %v3220_v19  ;;  %v6092_v13 = vld [vmem:[#allocation26_spill] sm:$0xff] }
 0x695   : > { %vm3492_vm1 = vcmp.ge.f32.partialorder %v3458_v7, 0.0  ;;  %v3526_v25 = vmul.f32 0.2, %v3458_v7 }
 0x697   : > { %v3560_v52 = vsel %vm3492_vm1, %v3458_v7, %v3526_v25 }
 0x698   : > { %3594 = vst [vmem:[%s5731_s8 + $0xa8] sm:$0xff] %v3560_v52  ;;  %v2953_v44 = vpop.permute.xlu1 %2952  ;;  %v3157_v30 = vpop.permute.xlu2 %3156  ;;  %v6093_v52 = vld [vmem:[#allocation18_spill] sm:$0xff] }
 0x699   : > { %v3020_v45 = vsub.f32 %v6079_v3, %v2953_v44 }
 0x69b   : > { %v3224_v9 = vmul.f32 %v3157_v30, %v3020_v45  ;;  %v6094_v30 = vld [vmem:[#allocation25_spill] sm:$0xff] }
 0x69d   : > { %v3462_v63 = vadd.f32 %v6080_v8, %v3224_v9 }
 0x69f   : > { %vm3496_vm3 = vcmp.ge.f32.partialorder %v3462_v63, 0.0  ;;  %v3530_v22 = vmul.f32 0.2, %v3462_v63 }
 0x6a0   : > { %v3147_v18 = vpop.permute.xlu0 %3146  ;;  %v2973_v14 = vpop.permute.xlu2 %2972 }
 0x6a1   : > { %v3564_v2 = vsel %vm3496_vm3, %v3462_v63, %v3530_v22  ;;  %v3222_v51 = vmul.f32 %v3147_v18, %v3018_v46  ;;  %v3024_v27 = vsub.f32 %v6091_v55, %v2973_v14 }
 0x6a2   : > { %3598 = vst [vmem:[%s5731_s8 + $0xc8] sm:$0xff] %v3564_v2  ;;  %v6095_v2 = vld [vmem:[#allocation19_spill] sm:$0xff] }
 0x6a3   : > { %v3460_v4 = vadd.f32 %v6082_v16, %v3222_v51  ;;  %v6096_v51 = vld [vmem:[#allocation9_spill] sm:$0xff] }
 0x6a4   : > { %v3028_v16 = vsub.f32 %v6096_v51, %v5738_v50 }
 0x6a5   : > { %vm3494_vm4 = vcmp.ge.f32.partialorder %v3460_v4, 0.0  ;;  %v3528_v28 = vmul.f32 0.2, %v3460_v4 }
 0x6a7   : > { %v3562_v10 = vsel %vm3494_vm4, %v3460_v4, %v3528_v28 }
 0x6a8   : > { %v3152_v24 = vpop.permute.xlu1 %3151  ;;  %3596 = vst [vmem:[%s5731_s8 + $0xb8] sm:$0xff] %v3562_v10  ;;  %v2963_v47 = vpop.permute.xlu0 %2962 }
 0x6a9   : > { %v3223_v31 = vmul.f32 %v3152_v24, %v3019_v20  ;;  %v3022_v29 = vsub.f32 %v6089_v37, %v2963_v47 }
 0x6ab   : > { %v3461_v39 = vadd.f32 %v6084_v5, %v3223_v31  ;;  %v6097_v5 = vld [vmem:[#allocation8_spill] sm:$0xff] }
 0x6ad   : > { %vm3495_vm5 = vcmp.ge.f32.partialorder %v3461_v39, 0.0  ;;  %v3529_v38 = vmul.f32 0.2, %v3461_v39 }
 0x6af   : > { %v3563_v54 = vsel %vm3495_vm5, %v3461_v39, %v3529_v38 }
 0x6b0   : > { %3597 = vst [vmem:[%s5731_s8 + $0xc0] sm:$0xff] %v3563_v54  ;;  %v2968_v1 = vpop.permute.xlu1 %2967  ;;  %v3172_v40 = vpop.permute.xlu2 %3171 }
 0x6b1   : > { %v3023_v15 = vsub.f32 %v6085_v36, %v2968_v1 }
 0x6b3   : > { %v3227_v62 = vmul.f32 %v3172_v40, %v3023_v15 }
 0x6b5   : > { %v3465_v21 = vadd.f32 %v6086_v6, %v3227_v62 }
 0x6b7   : > { %vm3499_vm6 = vcmp.ge.f32.partialorder %v3465_v21, 0.0  ;;  %v3533_v58 = vmul.f32 0.2, %v3465_v21 }
 0x6b8   : > { %v3162_v17 = vpop.permute.xlu0 %3161  ;;  %v2988_v22 = vpop.permute.xlu2 %2987 }
 0x6b9   : > { %v3567_v59 = vsel %vm3499_vm6, %v3465_v21, %v3533_v58  ;;  %v3225_v53 = vmul.f32 %v3162_v17, %v3021_v61  ;;  %v3027_v39 = vsub.f32 %v6097_v5, %v2988_v22 }
 0x6ba   : > { %3601 = vst [vmem:[%s5731_s8 + $0xe0] sm:$0xff] %v3567_v59 }
 0x6bb   : > { %v3463_v57 = vadd.f32 %v6088_v23, %v3225_v53 }
 0x6bd   : > { %vm3497_vm7 = vcmp.ge.f32.partialorder %v3463_v57, 0.0  ;;  %v3531_v11 = vmul.f32 0.2, %v3463_v57 }
 0x6bf   : > { %v3565_v56 = vsel %vm3497_vm7, %v3463_v57, %v3531_v11 }
 0x6c0   : > { %v3167_v42 = vpop.permute.xlu1 %3166  ;;  %3599 = vst [vmem:[%s5731_s8 + $0xd0] sm:$0xff] %v3565_v56  ;;  %v2978_v60 = vpop.permute.xlu0 %2977 }
 0x6c1   : > { %v3226_v33 = vmul.f32 %v3167_v42, %v3022_v29  ;;  %v3025_v44 = vsub.f32 %v6093_v52, %v2978_v60 }
 0x6c3   : > { %v3464_v34 = vadd.f32 %v6090_v0, %v3226_v33 }
 0x6c5   : > { %vm3498_vm2 = vcmp.ge.f32.partialorder %v3464_v34, 0.0  ;;  %v3532_v41 = vmul.f32 0.2, %v3464_v34 }
 0x6c7   : > { %v3566_v12 = vsel %vm3498_vm2, %v3464_v34, %v3532_v41 }
 0x6c8   : > { %3600 = vst [vmem:[%s5731_s8 + $0xd8] sm:$0xff] %v3566_v12  ;;  %v2983_v32 = vpop.permute.xlu1 %2982  ;;  %v3187_v49 = vpop.permute.xlu2 %3186 }
 0x6c9   : > { %v3026_v18 = vsub.f32 %v6095_v2, %v2983_v32 }
 0x6cb   : > { %v3230_v4 = vmul.f32 %v3187_v49, %v3026_v18 }
 0x6d0   : > { %v3177_v19 = vpop.permute.xlu0 %3176  ;;  %v3435_v24 = vpop.permute.xlu2 %3434 }
 0x6d1   : > { %v3228_v43 = vmul.f32 %v3177_v19, %v3024_v27 }
 0x6d3   : > { %v3466_v7 = vadd.f32 %v6092_v13, %v3228_v43 }
 0x6d5   : > { %vm3500_vm8 = vcmp.ge.f32.partialorder %v3466_v7, 0.0  ;;  %v3534_v25 = vmul.f32 0.2, %v3466_v7 }
 0x6d7   : > { %v3568_v26 = vsel %vm3500_vm8, %v3466_v7, %v3534_v25 }
 0x6d8   : > { %v3182_v3 = vpop.permute.xlu1 %3181  ;;  %3602 = vst [vmem:[%s5731_s8 + $0xe8] sm:$0xff] %v3568_v26 }
 0x6d9   : > { %v3229_v45 = vmul.f32 %v3182_v3, %v3025_v44 }
 0x6db   : > { %v3467_v9 = vadd.f32 %v6094_v30, %v3229_v45 }
 0x6dd   : > { %vm3501_vm9 = vcmp.ge.f32.partialorder %v3467_v9, 0.0  ;;  %v3535_v8 = vmul.f32 0.2, %v3467_v9 }
 0x6df   : > { %v3569_v63 = vsel %vm3501_vm9, %v3467_v9, %v3535_v8 }
 0x6e0   : > { %3603 = vst [vmem:[%s5731_s8 + $0xf0] sm:$0xff] %v3569_v63 }
 0x6e8   : > { %v3192_v46 = vpop.permute.xlu0 %3191 }
 0x6e9   : > { %v3231_v50 = vmul.f32 %v3192_v46, %v3027_v39 }
 0x6f0   : > { %v3197_v28 = vpop.permute.xlu1 %3196  ;;  %v3425_v48 = vpop.permute.xlu0 %3424 }
 0x6f1   : > { %v3232_v20 = vmul.f32 %v3197_v28, %v3028_v16  ;;  %v3468_v10 = vadd.f32 %v3425_v48, %v3230_v4 }
 0x6f3   : > { %v3470_v31 = vadd.f32 %v3435_v24, %v3232_v20  ;;  %vm3502_vm10 = vcmp.ge.f32.partialorder %v3468_v10, 0.0  ;;  %v3536_v14 = vmul.f32 0.2, %v3468_v10 }
 0x6f5   : > { %vm3504_vm11 = vcmp.ge.f32.partialorder %v3470_v31, 0.0  ;;  %v3538_v38 = vmul.f32 0.2, %v3470_v31  ;;  %v3570_v54 = vsel %vm3502_vm10, %v3468_v10, %v3536_v14 }
 0x6f6   : > { %3604 = vst [vmem:[%s5731_s8 + $0xf8] sm:$0xff] %v3570_v54 }
 0x6f7   : > { %v3572_v1 = vsel %vm3504_vm11, %v3470_v31, %v3538_v38 }
 0x6f8   : > { %3606 = vst [vmem:[%s5731_s8 + $0x108] sm:$0xff] %v3572_v1  ;;  %v3430_v47 = vpop.permute.xlu1 %3429 }
 0x6f9   : > { %v3469_v36 = vadd.f32 %v3430_v47, %v3231_v50 }
 0x6fb   : > { %vm3503_vm12 = vcmp.ge.f32.partialorder %v3469_v36, 0.0  ;;  %v3537_v15 = vmul.f32 0.2, %v3469_v36 }
 0x6fd   : > { %v3571_v40 = vsel %vm3503_vm12, %v3469_v36, %v3537_v15 }
 0x6fe   : > { %3605 = vst [vmem:[%s5731_s8 + $0x100] sm:$0xff] %v3571_v40 }
 0x6ff   : > { %4275 = shalt.err (!%p4272_p5)
}
 0x700   : > { %s4329_s21 = smov 128   ;;  %s4330_s8 = smov 8  }
 0x701   : > { %4118 = dma.vmem_to_hbm [thread:$0]  (%p4411_p4), %s3623_s27, 4352, %s3625_s22, %s3608_s23, %s4329_s21, %s4329_s21, %s4330_s8  }
 0x702 PF: > { %p4124_p6 = scmp.ge.s32.totalorder %s4326_s29, 2  ;;  %s3639_s19 = sand.u32 1, %s4306_s24  }
 0x703   : > { %s3640_s20 = scalar_lea.sflag [#allocation3], %s3639_s19 }
 0x704   : > { %p4121_p7 = pnand %p4124_p6, %p4418_p8 }
 0x706   : > { %p4122_p9 = pneg %p4121_p7 }
 0x708   : > { %4301 = dma.done.wait (%p4122_p9), %s3640_s20, 4352  }
 0x709   : > { %4303 = vsyncadd (%p4122_p9), %s3640_s20, 4294962944  ;;  %s20_s29 = sadd.s32 1, %s4326_s29   ;;  %s6098_s24 = smov %s4310_s25 }
 0x70a   : > { %p17_p10 = scmp.ge.s32.totalorder %s20_s29, 4   ;;  %s6099_s25 = smov %s4314_s26 }
 0x70b   : > { %s6100_s26 = smov %s4424_s14  ;;  %s6101_s27 = smov %s4322_s28 }
 0x70c   : > { %s6102_s28 = smov %s6104_s9  ;;  %19 = sbr.rel (!%p17_p10) target bundleno = 4 (0x4), region = 96 }
 0x711   :  { %3646 = vsyncpa [#allocation3], 1 }
 0x712   :  { %3648 = vsyncpa [#allocation3 + $0x1], 1 }

</bundles_post_ra>
